<compile_context>
chip_gen: v7x
topology: tpu7x:2x2x1
jax: 0.10.0
libtpu: 0.0.40
codegen_flags: <defaults>
</compile_context>

<pallas_src>
import jax
import jax.numpy as jnp
from jax.experimental import pallas as pl
from jax.experimental.pallas import tpu as pltpu


def _round_up(x, m):
    return (x + m - 1) // m * m


def mlp_kernel(x_ref, w1_ref, b1_ref, w2_ref, b2_ref, w3_ref, b3_ref,
               out3_ref, out2_ref, out1_ref):
    j = pl.program_id(1)
    nj = pl.num_programs(1)

    # ---- fc1 slab (bf16 x bf16 -> f32) + bias + ReLU -----------------------
    # (dropout = identity in eval mode)
    h1 = jnp.dot(x_ref[...], w1_ref[...],
                 preferred_element_type=jnp.float32)
    o1 = jnp.maximum(h1 + b1_ref[...], 0.0)
    out1_ref[...] = o1.astype(out1_ref.dtype)

    # ---- fc2 partial product, accumulated directly into resident out2 -----
    @pl.when(j == 0)
    def _():
        out2_ref[...] = jnp.zeros_like(out2_ref)

    out2_ref[...] += jnp.dot(o1.astype(w2_ref.dtype), w2_ref[...],
                             preferred_element_type=jnp.float32)

    # ---- finalize: fc2 bias + ReLU in place, then fc3 ----------------------
    @pl.when(j == nj - 1)
    def _():
        o2 = jnp.maximum(out2_ref[...] + b2_ref[...], 0.0)
        out2_ref[...] = o2
        o3 = jnp.dot(o2.astype(w3_ref.dtype), w3_ref[...],
                     preferred_element_type=jnp.float32) + b3_ref[...]
        out3_ref[...] = o3.astype(out3_ref.dtype)


def net_forward(x, w1, b1, w2, b2, w3, b3, *, tb=None, tn1=None):
    """x: [B, D_in]; w*: [in, out]; b*: [out]. Returns (out3, out2, out1)."""
    B, D_in = x.shape
    H1 = w1.shape[1]
    H2 = w2.shape[1]
    C = w3.shape[1]

    f32 = jnp.float32
    bf16 = jnp.bfloat16

    # ---- lane / sublane padding of the feature dims ------------------------
    Dp = _round_up(D_in, 128)     # fc1 K dim
    H2p = _round_up(H2, 128)      # fc2 N / fc3 K dim (500 -> 512 real model)
    Cp = _round_up(C, 128)        # lane-dense logits (2 -> 128)

    # ---- adaptive tile sizing ----------------------------------------------
    # Batch tile: large (amortizes W1/W2 re-streaming), multiple of 16 (bf16
    # sublane packing), but keep >= 2 batch tiles so megacore can shard.
    Bp16 = _round_up(B, 16)
    tb = 512 if tb is None else tb
    tb = max(16, min(tb, Bp16))
    if B >= 256:
        tb = min(tb, _round_up((B + 1) // 2, 16))

    tn1 = 1024 if tn1 is None else tn1              # fc1 output-slab width
    tn1 = max(128, min(tn1, _round_up(H1, 128)))

    def _vmem_bytes(tb_, tn1_):
        # double-buffered bf16 inputs + f32 biases + f32 outputs
        in_b = 2 * 2 * (tb_ * Dp + Dp * tn1_ + tn1_ * H2p + H2p * Cp)
        bias_b = 2 * 4 * (tn1_ + H2p + Cp)
        out_b = 2 * 4 * (tb_ * Cp + tb_ * H2p + tb_ * tn1_)
        return in_b + bias_b + out_b

    VMEM_BUDGET = 48 << 20                           # headroom under 56 MiB cap
    while _vmem_bytes(tb, tn1) > VMEM_BUDGET and tn1 > 256:
        tn1 //= 2
    while _vmem_bytes(tb, tn1) > VMEM_BUDGET and tb > 128:
        tb = _round_up(tb // 2, 16)

    Bp = _round_up(B, tb)                            # padded batch
    H1p = _round_up(H1, tn1)                         # padded hidden1

    # ---- zero-padded operands (bf16 weights/activations, f32 biases) ------
    xp = jnp.zeros((Bp, Dp), bf16).at[:B, :D_in].set(x.astype(bf16))
    w1p = jnp.zeros((Dp, H1p), bf16).at[:D_in, :H1].set(w1.astype(bf16))
    b1p = jnp.zeros((1, H1p), f32).at[:, :H1].set(b1.reshape(1, -1).astype(f32))
    w2p = jnp.zeros((H1p, H2p), bf16).at[:H1, :H2].set(w2.astype(bf16))
    b2p = jnp.zeros((1, H2p), f32).at[:, :H2].set(b2.reshape(1, -1).astype(f32))
    w3p = jnp.zeros((H2p, Cp), bf16).at[:H2, :C].set(w3.astype(bf16))
    b3p = jnp.zeros((1, Cp), f32).at[:, :C].set(b3.reshape(1, -1).astype(f32))

    grid = (Bp // tb, H1p // tn1)                    # (batch tiles, H1 slabs)

    in_specs = [
        pl.BlockSpec((tb, Dp),   lambda i, j: (i, 0)),   # x tile      (bf16)
        pl.BlockSpec((Dp, tn1),  lambda i, j: (0, j)),   # W1 slab     (bf16)
        pl.BlockSpec((1, tn1),   lambda i, j: (0, j)),   # b1 slab     (f32)
        pl.BlockSpec((tn1, H2p), lambda i, j: (j, 0)),   # W2 slab     (bf16)
        pl.BlockSpec((1, H2p),   lambda i, j: (0, 0)),   # b2          (f32)
        pl.BlockSpec((H2p, Cp),  lambda i, j: (0, 0)),   # W3          (bf16)
        pl.BlockSpec((1, Cp),    lambda i, j: (0, 0)),   # b3          (f32)
    ]
    out_specs = (
        pl.BlockSpec((tb, Cp),   lambda i, j: (i, 0)),   # out3 (resident over j)
        pl.BlockSpec((tb, H2p),  lambda i, j: (i, 0)),   # out2 = fc2 accumulator
        pl.BlockSpec((tb, tn1),  lambda i, j: (i, j)),   # out1 slab
    )
    out_shape = (
        jax.ShapeDtypeStruct((Bp, Cp), f32),
        jax.ShapeDtypeStruct((Bp, H2p), f32),
        jax.ShapeDtypeStruct((Bp, H1p), f32),
    )

    # ---- VMEM budget (capped for v7x's 64 MiB per TensorCore) -------------
    vmem_limit = int(_vmem_bytes(tb, tn1) * 1.25) + (4 << 20)
    vmem_limit = max(32 << 20, min(vmem_limit, 56 << 20))

    # ---- cost estimate: count W1/W2 re-streaming per batch tile -----------
    n_btiles = Bp // tb
    cost = pl.CostEstimate(
        flops=2 * Bp * (Dp * H1p + H1p * H2p + H2p * Cp),
        transcendentals=0,
        bytes_accessed=int(
            2 * n_btiles * (Dp * H1p + H1p * H2p)   # bf16 W1/W2, once per batch tile
            + 2 * (H2p * Cp)                        # bf16 W3
            + 2 * Bp * Dp                           # bf16 activations in
            + 4 * Bp * (H1p + H2p + Cp)             # f32 outputs
        ),
    )

    out3, out2, out1 = pl.pallas_call(
        mlp_kernel,
        out_shape=out_shape,
        grid_spec=pltpu.PrefetchScalarGridSpec(
            num_scalar_prefetch=0,
            grid=grid,
            in_specs=in_specs,
            out_specs=out_specs,
        ),
        compiler_params=pltpu.CompilerParams(
            dimension_semantics=("parallel", "arbitrary"),
            vmem_limit_bytes=vmem_limit,
        ),
        cost_estimate=cost,
    )(xp, w1p, b1p, w2p, b2p, w3p, b3p)

    # strip batch / lane / slab padding
    return out3[:B, :C], out2[:B, :H2], out1[:B, :H1]


def _linear_init(key, fan_in, fan_out):
    """Deterministic PyTorch-style nn.Linear init: U(-1/sqrt(in), 1/sqrt(in))."""
    kw, kb = jax.random.split(key)
    bound = 1.0 / jnp.sqrt(jnp.float32(fan_in))
    w = jax.random.uniform(kw, (fan_in, fan_out), jnp.float32, -bound, bound)
    b = jax.random.uniform(kb, (fan_out,), jnp.float32, -bound, bound)
    return w, b


if __name__ == "__main__":
    # SMALL shapes consistent with the module structure
    # (original: input=3600, hidden1=5000, hidden2=500, classes=2).
    # Chosen to exercise: batch padding + 2 batch tiles (megacore "parallel"
    # axis), 2 H1 slabs (fc2 accumulator init/finalize path), and the
    # lane-padding of D_in (300->384), H2 (200->256) and C (2->128).
    batch = 260
    input_size = 300
    hidden_size1 = 1500
    hidden_size2 = 200
    num_classes = 2

    key = jax.random.PRNGKey(0)
    kx, k1, k2, k3 = jax.random.split(key, 4)

    x = jax.random.normal(kx, (batch, input_size), jnp.float32)
    w1, b1 = _linear_init(k1, input_size, hidden_size1)
    w2, b2 = _linear_init(k2, hidden_size1, hidden_size2)
    w3, b3 = _linear_init(k3, hidden_size2, num_classes)

    out3, out2, out1 = net_forward(x, w1, b1, w2, b2, w3, b3)
    jax.block_until_ready((out3, out2, out1))

    assert out1.shape == (batch, hidden_size1)
    assert out2.shape == (batch, hidden_size2)
    assert out3.shape == (batch, num_classes)

    # Tight check against a reference that mirrors the kernel numerics
    # (operands rounded to bf16, f32 accumulation; eval-mode dropout = identity).
    def _bf16_round(a):
        return a.astype(jnp.bfloat16).astype(jnp.float32)

    r1 = jnp.maximum(_bf16_round(x) @ _bf16_round(w1) + b1, 0.0)
    r2 = jnp.maximum(_bf16_round(r1) @ _bf16_round(w2) + b2, 0.0)
    r3 = _bf16_round(r2) @ _bf16_round(w3) + b3
    assert jnp.allclose(out1, r1, atol=1e-2, rtol=1e-2)
    assert jnp.allclose(out2, r2, atol=1e-2, rtol=1e-2)
    assert jnp.allclose(out3, r3, atol=1e-2, rtol=1e-2)

    # Loose sanity check against the pure-f32 reference (bf16 operands lose
    # mantissa bits, accumulation stays f32).
    f1 = jnp.maximum(x @ w1 + b1, 0.0)
    f2 = jnp.maximum(f1 @ w2 + b2, 0.0)
    f3 = f2 @ w3 + b3
    assert jnp.allclose(out1, f1, atol=1e-1, rtol=1e-1)
    assert jnp.allclose(out2, f2, atol=1e-1, rtol=1e-1)
    assert jnp.allclose(out3, f3, atol=1e-1, rtol=1e-1)

    print("KERNEL_OK")
</pallas_src>

<mosaic_0001>
module attributes {stable_mosaic.version = 11 : i64} {
  func.func @mlp_kernel(%arg0: i32, %arg1: i32, %arg2: memref<144x384xbf16, #tpu.memory_space<vmem>>, %arg3: memref<384x1024xbf16, #tpu.memory_space<vmem>>, %arg4: memref<1x1024xf32, #tpu.memory_space<vmem>>, %arg5: memref<1024x256xbf16, #tpu.memory_space<vmem>>, %arg6: memref<1x256xf32, #tpu.memory_space<vmem>>, %arg7: memref<256x128xbf16, #tpu.memory_space<vmem>>, %arg8: memref<1x128xf32, #tpu.memory_space<vmem>>, %arg9: memref<144x128xf32, #tpu.memory_space<vmem>>, %arg10: memref<144x256xf32, #tpu.memory_space<vmem>>, %arg11: memref<144x1024xf32, #tpu.memory_space<vmem>>) attributes {dimension_semantics = [#tpu.dimension_semantics<parallel>, #tpu.dimension_semantics<arbitrary>], iteration_bounds = array<i64: 2, 2>, scalar_prefetch = 0 : i64, scratch_operands = 0 : i64, tpu.core_type = #tpu.core_type<tc>, window_params = [{transform_indices = @transform_0, window_bounds = array<i64: 144, 384>}, {transform_indices = @transform_1, window_bounds = array<i64: 384, 1024>}, {transform_indices = @transform_2, window_bounds = array<i64: 1, 1024>}, {transform_indices = @transform_3, window_bounds = array<i64: 1024, 256>}, {pipeline_mode = #tpu.pipeline_mode<synchronous>, transform_indices = @transform_4, window_bounds = array<i64: 1, 256>}, {pipeline_mode = #tpu.pipeline_mode<synchronous>, transform_indices = @transform_5, window_bounds = array<i64: 256, 128>}, {pipeline_mode = #tpu.pipeline_mode<synchronous>, transform_indices = @transform_6, window_bounds = array<i64: 1, 128>}, {transform_indices = @transform_7, window_bounds = array<i64: 144, 128>}, {transform_indices = @transform_8, window_bounds = array<i64: 144, 256>}, {transform_indices = @transform_9, window_bounds = array<i64: 144, 1024>}]} {
    %c0 = arith.constant 0 : index
    %c0_0 = arith.constant 0 : index
    %0 = vector.load %arg2[%c0, %c0_0] : memref<144x384xbf16, #tpu.memory_space<vmem>>, vector<144x384xbf16>
    %c0_1 = arith.constant 0 : index
    %c0_2 = arith.constant 0 : index
    %1 = vector.load %arg3[%c0_1, %c0_2] : memref<384x1024xbf16, #tpu.memory_space<vmem>>, vector<384x1024xbf16>
    %cst = arith.constant dense<0.000000e+00> : vector<144x1024xf32>
    %2 = tpu.matmul %0, %1, %cst {dimension_numbers = #tpu.dot_dimension_numbers<[1], [0], [0], [1], [0, 0, 1, 1], [], []>} : vector<144x384xbf16>, vector<384x1024xbf16>, vector<144x1024xf32> -> vector<144x1024xf32>
    %c0_3 = arith.constant 0 : index
    %c0_4 = arith.constant 0 : index
    %3 = vector.load %arg4[%c0_3, %c0_4] : memref<1x1024xf32, #tpu.memory_space<vmem>>, vector<1x1024xf32>
    %4 = vector.broadcast %3 : vector<1x1024xf32> to vector<144x1024xf32>
    %5 = arith.addf %2, %4 : vector<144x1024xf32>
    %cst_5 = arith.constant 0.000000e+00 : f32
    %6 = vector.broadcast %cst_5 : f32 to vector<144x1024xf32>
    %7 = arith.maximumf %5, %6 : vector<144x1024xf32>
    %c0_6 = arith.constant 0 : index
    %c0_7 = arith.constant 0 : index
    %8 = vector.load %arg11[%c0_6, %c0_7] : memref<144x1024xf32, #tpu.memory_space<vmem>>, vector<144x1024xf32>
    tpu.vector_store %arg11[%c0_6, %c0_7], %7 {strides = array<i32>} : memref<144x1024xf32, #tpu.memory_space<vmem>>, vector<144x1024xf32>,
    %c0_i32 = arith.constant 0 : i32
    %9 = arith.cmpi eq, %arg1, %c0_i32 : i32
    %10 = arith.extui %9 : i1 to i32
    %c0_i32_8 = arith.constant 0 : i32
    %11 = arith.cmpi ne, %10, %c0_i32_8 : i32
    scf.if %11 {
      %cst_17 = arith.constant 0.000000e+00 : f32
      %21 = vector.broadcast %cst_17 : f32 to vector<144x256xf32>
      %c0_18 = arith.constant 0 : index
      %c0_19 = arith.constant 0 : index
      %22 = vector.load %arg10[%c0_18, %c0_19] : memref<144x256xf32, #tpu.memory_space<vmem>>, vector<144x256xf32>
      tpu.vector_store %arg10[%c0_18, %c0_19], %21 {strides = array<i32>} : memref<144x256xf32, #tpu.memory_space<vmem>>, vector<144x256xf32>,
    } else {
    }
    %c0_9 = arith.constant 0 : index
    %c0_10 = arith.constant 0 : index
    %12 = vector.load %arg10[%c0_9, %c0_10] : memref<144x256xf32, #tpu.memory_space<vmem>>, vector<144x256xf32>
    %13 = arith.truncf %7 : vector<144x1024xf32> to vector<144x1024xbf16>
    %c0_11 = arith.constant 0 : index
    %c0_12 = arith.constant 0 : index
    %14 = vector.load %arg5[%c0_11, %c0_12] : memref<1024x256xbf16, #tpu.memory_space<vmem>>, vector<1024x256xbf16>
    %cst_13 = arith.constant dense<0.000000e+00> : vector<144x256xf32>
    %15 = tpu.matmul %13, %14, %cst_13 {dimension_numbers = #tpu.dot_dimension_numbers<[1], [0], [0], [1], [0, 0, 1, 1], [], []>} : vector<144x1024xbf16>, vector<1024x256xbf16>, vector<144x256xf32> -> vector<144x256xf32>
    %16 = arith.addf %12, %15 : vector<144x256xf32>
    %c0_14 = arith.constant 0 : index
    %c0_15 = arith.constant 0 : index
    %17 = vector.load %arg10[%c0_14, %c0_15] : memref<144x256xf32, #tpu.memory_space<vmem>>, vector<144x256xf32>
    tpu.vector_store %arg10[%c0_14, %c0_15], %16 {strides = array<i32>} : memref<144x256xf32, #tpu.memory_space<vmem>>, vector<144x256xf32>,
    %c1_i32 = arith.constant 1 : i32
    %18 = arith.cmpi eq, %arg1, %c1_i32 : i32
    %19 = arith.extui %18 : i1 to i32
    %c0_i32_16 = arith.constant 0 : i32
    %20 = arith.cmpi ne, %19, %c0_i32_16 : i32
    scf.if %20 {
      %c0_17 = arith.constant 0 : index
      %c0_18 = arith.constant 0 : index
      %21 = vector.load %arg10[%c0_17, %c0_18] : memref<144x256xf32, #tpu.memory_space<vmem>>, vector<144x256xf32>
      %c0_19 = arith.constant 0 : index
      %c0_20 = arith.constant 0 : index
      %22 = vector.load %arg6[%c0_19, %c0_20] : memref<1x256xf32, #tpu.memory_space<vmem>>, vector<1x256xf32>
      %23 = vector.broadcast %22 : vector<1x256xf32> to vector<144x256xf32>
      %24 = arith.addf %21, %23 : vector<144x256xf32>
      %cst_21 = arith.constant 0.000000e+00 : f32
      %25 = vector.broadcast %cst_21 : f32 to vector<144x256xf32>
      %26 = arith.maximumf %24, %25 : vector<144x256xf32>
      %c0_22 = arith.constant 0 : index
      %c0_23 = arith.constant 0 : index
      %27 = vector.load %arg10[%c0_22, %c0_23] : memref<144x256xf32, #tpu.memory_space<vmem>>, vector<144x256xf32>
      tpu.vector_store %arg10[%c0_22, %c0_23], %26 {strides = array<i32>} : memref<144x256xf32, #tpu.memory_space<vmem>>, vector<144x256xf32>,
      %28 = arith.truncf %26 : vector<144x256xf32> to vector<144x256xbf16>
      %c0_24 = arith.constant 0 : index
      %c0_25 = arith.constant 0 : index
      %29 = vector.load %arg7[%c0_24, %c0_25] : memref<256x128xbf16, #tpu.memory_space<vmem>>, vector<256x128xbf16>
      %cst_26 = arith.constant dense<0.000000e+00> : vector<144x128xf32>
      %30 = tpu.matmul %28, %29, %cst_26 {dimension_numbers = #tpu.dot_dimension_numbers<[1], [0], [0], [1], [0, 0, 1, 1], [], []>} : vector<144x256xbf16>, vector<256x128xbf16>, vector<144x128xf32> -> vector<144x128xf32>
      %c0_27 = arith.constant 0 : index
      %c0_28 = arith.constant 0 : index
      %31 = vector.load %arg8[%c0_27, %c0_28] : memref<1x128xf32, #tpu.memory_space<vmem>>, vector<1x128xf32>
      %32 = vector.broadcast %31 : vector<1x128xf32> to vector<144x128xf32>
      %33 = arith.addf %30, %32 : vector<144x128xf32>
      %c0_29 = arith.constant 0 : index
      %c0_30 = arith.constant 0 : index
      %34 = vector.load %arg9[%c0_29, %c0_30] : memref<144x128xf32, #tpu.memory_space<vmem>>, vector<144x128xf32>
      tpu.vector_store %arg9[%c0_29, %c0_30], %33 {strides = array<i32>} : memref<144x128xf32, #tpu.memory_space<vmem>>, vector<144x128xf32>,
    } else {
    }
    return
  }
  func.func @transform_0(%arg0: i32, %arg1: i32) -> (i32, i32) {
    %c0_i32 = arith.constant 0 : i32
    %c0_i32_0 = arith.constant 0 : i32
    return %arg0, %c0_i32 : i32, i32
  }
  func.func @transform_1(%arg0: i32, %arg1: i32) -> (i32, i32) {
    %c0_i32 = arith.constant 0 : i32
    %c0_i32_0 = arith.constant 0 : i32
    return %c0_i32, %arg1 : i32, i32
  }
  func.func @transform_2(%arg0: i32, %arg1: i32) -> (i32, i32) {
    %c0_i32 = arith.constant 0 : i32
    %c0_i32_0 = arith.constant 0 : i32
    return %c0_i32, %arg1 : i32, i32
  }
  func.func @transform_3(%arg0: i32, %arg1: i32) -> (i32, i32) {
    %c0_i32 = arith.constant 0 : i32
    %c0_i32_0 = arith.constant 0 : i32
    return %arg1, %c0_i32 : i32, i32
  }
  func.func @transform_4(%arg0: i32, %arg1: i32) -> (i32, i32) {
    %c0_i32 = arith.constant 0 : i32
    %c0_i32_0 = arith.constant 0 : i32
    %c0_i32_1 = arith.constant 0 : i32
    return %c0_i32, %c0_i32_0 : i32, i32
  }
  func.func @transform_5(%arg0: i32, %arg1: i32) -> (i32, i32) {
    %c0_i32 = arith.constant 0 : i32
    %c0_i32_0 = arith.constant 0 : i32
    %c0_i32_1 = arith.constant 0 : i32
    return %c0_i32, %c0_i32_0 : i32, i32
  }
  func.func @transform_6(%arg0: i32, %arg1: i32) -> (i32, i32) {
    %c0_i32 = arith.constant 0 : i32
    %c0_i32_0 = arith.constant 0 : i32
    %c0_i32_1 = arith.constant 0 : i32
    return %c0_i32, %c0_i32_0 : i32, i32
  }
  func.func @transform_7(%arg0: i32, %arg1: i32) -> (i32, i32) {
    %c0_i32 = arith.constant 0 : i32
    %c0_i32_0 = arith.constant 0 : i32
    return %arg0, %c0_i32 : i32, i32
  }
  func.func @transform_8(%arg0: i32, %arg1: i32) -> (i32, i32) {
    %c0_i32 = arith.constant 0 : i32
    %c0_i32_0 = arith.constant 0 : i32
    return %arg0, %c0_i32 : i32, i32
  }
  func.func @transform_9(%arg0: i32, %arg1: i32) -> (i32, i32) {
    %c0_i32 = arith.constant 0 : i32
    return %arg0, %arg1 : i32, i32
  }
}

</mosaic_0001>

<bundles_post_ra>
// kernel: tpu_custom_call.1
= control target key start
LH: loop header
LB: loop body
LE: loop exit
PB: predicated region body
PF: predicated region fallthrough
CT: control target
= control target key end

     0   :  { %s10426_s0 = inlined_call_operand.hbm [shape: bf16[288,384], index: 0, kind: input, shape index: {}]   ;;  %s10427_s1 = inlined_call_operand.hbm [shape: bf16[384,2048], index: 1, kind: input, shape index: {}]   ;;  %s10428_s2 = inlined_call_operand.hbm [shape: f32[1,2048], index: 2, kind: input, shape index: {}]   ;;  %s10429_s3 = inlined_call_operand.hbm [shape: bf16[2048,256], index: 3, kind: input, shape index: {}]   ;;  %s10430_s4 = inlined_call_operand.hbm [shape: f32[1,256], index: 4, kind: input, shape index: {}]   ;;  %s10431_s5 = inlined_call_operand.hbm [shape: bf16[256,128], index: 5, kind: input, shape index: {}]   ;;  %s10432_s6 = inlined_call_operand.hbm [shape: f32[1,128], index: 6, kind: input, shape index: {}]   ;;  %s10433_s7 = inlined_call_operand.hbm [shape: f32[288,128], index: 7, kind: output, shape index: {0}]   ;;  %s10434_s8 = inlined_call_operand.hbm [shape: f32[288,256], index: 8, kind: output, shape index: {1}]   ;;  %s10435_s9 = inlined_call_operand.hbm [shape: f32[288,2048], index: 9, kind: output, shape index: {2}]  }
   0x1   :  { %10709 = sst [smem:[#allocation138_spill]] %s10426_s0 }
   0x2   :  { %10710 = sst [smem:[#allocation139_spill]] %s10427_s1 }
   0x3   :  { %10711 = sst [smem:[#allocation140_spill]] %s10428_s2 }
   0x4   :  { %10712 = sst [smem:[#allocation141_spill]] %s10429_s3 }
   0x5   :  { %10713 = sst [smem:[#allocation142_spill]] %s10430_s4 }
   0x6   :  { %10714 = sst [smem:[#allocation143_spill]] %s10431_s5 }
   0x7   :  { %10715 = sst [smem:[#allocation144_spill]] %s10432_s6 }
   0x8   :  { %10716 = sst [smem:[#allocation145_spill]] %s10433_s7 }
   0x9   :  { %10717 = sst [smem:[#allocation146_spill]] %s10434_s8 }
   0xa   :  { %10718 = sst [smem:[#allocation147_spill]] %s10435_s9 }
   0xb   :  { %15 = vsyncpa [#allocation3], 0 }
   0xc   :  { %17 = vsyncpa [#allocation3 + $0x1], 0 }
   0xd   :  { %18 = vsyncpa [#allocation6], 0 }
   0xe   :  { %20 = vsyncpa [#allocation6 + $0x1], 0 }
   0xf   :  { %21 = vsyncpa [#allocation9], 0 }
  0x10   :  { %23 = vsyncpa [#allocation9 + $0x1], 0 }
  0x11   :  { %24 = vsyncpa [#allocation12], 0 }
  0x12   :  { %25 = vsyncpa [#allocation4], 0 }
  0x13   :  { %27 = vsyncpa [#allocation4 + $0x1], 0 }
  0x14   :  { %28 = vsyncpa [#allocation16], 0 }
  0x15   :  { %30 = vsyncpa [#allocation16 + $0x1], 0  ;;  %s7323_s30 = smov 0   ;;  %s7325_s10 = smov 0  }
  0x16   :  { %s7327_s11 = smov 0   ;;  %s7329_s12 = smov 0  }
  0x17   :  { %s7331_s13 = smov 0   ;;  %s7333_s14 = smov 0  }
  0x18   :  { %s7335_s15 = smov 0   ;;  %s7337_s16 = smov 0  }
  0x19   :  { %s7339_s17 = smov 0   ;;  %s7341_s18 = smov 0  }
  0x1a   :  { %s7343_s19 = smov 0   ;;  %s7345_s20 = smov 0  }
  0x1b   :  { %s7347_s21 = smov 0   ;;  %s7349_s22 = smov 0  }
  0x1c LB: > { %10719 = sst [smem:[#allocation26_spill]] %s7195_s10  ;;  %s7392_s23 = sadd.s32 4294967295, %s7243_s22   ;;  %s7243_s22 = sphi %s7349_s22, %s36_s22   ;;  %s7239_s21 = sphi %s7347_s21, %s11164_s21   ;;  %s7235_s20 = sphi %s7345_s20, %s11163_s20   ;;  %s7231_s19 = sphi %s7343_s19, %s11162_s19   ;;  %s7227_s18 = sphi %s7341_s18, %s11161_s18   ;;  %s7223_s17 = sphi %s7339_s17, %s11160_s17   ;;  %s7219_s16 = sphi %s7337_s16, %s11159_s16   ;;  %s7215_s15 = sphi %s7335_s15, %s11158_s15   ;;  %s7211_s14 = sphi %s7333_s14, %s11152_s14   ;;  %s7207_s13 = sphi %s7331_s13, %s11157_s13   ;;  %s7203_s12 = sphi %s7329_s12, %s11150_s12   ;;  %s7199_s11 = sphi %s7327_s11, %s11156_s11   ;;  %s7195_s10 = sphi %s7325_s10, %s11155_s10   ;;  %s7191_s30 = sphi %s7323_s30, %s11149_s30  }
  0x1d   : > { %10720 = sst [smem:[#allocation27_spill]] %s7207_s13  ;;  %s10436_s24 = sadd.s32 4294967294, %s7243_s22  }
  0x1e   : > { %10721 = sst [smem:[#allocation28_spill]] %s7211_s14  ;;  %p68_p0 = scmp.ne.s32.totalorder %s7219_s16, %s7215_s15 }
  0x1f   : > { %10722 = sst [smem:[#allocation29_spill]] %s7215_s15  ;;  %p10446_p1 = scmp.eq.s32.totalorder %s7392_s23, 0 }
  0x20   : > { %10723 = sst [smem:[#allocation30_spill]] %s7227_s18  ;;  %p94_p2 = scmp.ne.s32.totalorder %s7207_s13, %s7203_s12 }
  0x21   : > { %10724 = sst [smem:[#allocation31_spill]] %s7231_s19  ;;  %p10447_p3 = scmp.eq.s32.totalorder %s7392_s23, 3 }
  0x22   : > { %p7402_p4 = por %p10446_p1, %p68_p0  ;;  %p239_p5 = scmp.eq.s32.totalorder %s10436_s24, 3 }
  0x23   : > { %p7410_p6 = por %p94_p2, %p10446_p1  ;;  %p286_p8 = scmp.ne.s32.totalorder %s7199_s11, %s7195_s10 }
  0x24   : > { %s10725_s25 = scalar_select %p7402_p4, 1, 0 }
  0x25   : > { %s10727_s26 = scalar_select %p7410_p6, 1, 0 }
  0x26   : > { %10726 = sst [smem:[#allocation32_spill]] %s10725_s25  ;;  %p7415_p7 = por %p239_p5, %p68_p0 }
  0x27   : > { %10728 = sst [smem:[#allocation33_spill]] %s10727_s26  ;;  %p292_p9 = scmp.ne.s32.totalorder %s7195_s10, %s7191_s30 }
  0x28   : > { %s10729_s28 = scalar_select %p7415_p7, 1, 0 }
  0x29   : > { %p5414_p10 = scmp.ge.s32.totalorder %s7243_s22, 1  ;;  %p7426_p11 = por %p286_p8, %p10447_p3 }
  0x2a   : > { %10730 = sst [smem:[#allocation34_spill]] %s10729_s28  ;;  %p300_p12 = scmp.lt.s32.totalorder %s7243_s22, 5 }
  0x2b   : > { %s10731_s29 = scalar_select %p7426_p11, 1, 0 }
  0x2c   : > { %p7431_p13 = por %p292_p9, %p239_p5  ;;  %p7435_p2 = pnand %p5414_p10, %p300_p12 }
  0x2d   : > { %10732 = sst [smem:[#allocation35_spill]] %s10731_s29  ;;  %s7245_s27 = smov [#allocation10]  }
  0x2e   : > { %s10733_s12 = scalar_select %p7431_p13, 1, 0 }
  0x2f   : > { %s10735_s24 = scalar_select %p7435_p2, 1, 0 }
  0x30   : > { %10734 = sst [smem:[#allocation36_spill]] %s10733_s12  ;;  %s313_s28 = sshll.u32 %s7245_s27, 4  ;;  %s314_s28 = int_to_ptr.vmem [resolvable:$true] %s313_s28 }
  0x31   : > { %10736 = sst [smem:[#allocation37_spill]] %s10735_s24  ;;  %p6366_p0 = pneg %p7435_p2 }
  0x32   : > { %s7246_s15 = smov [#allocation11]   ;;  %s10738_s4 = sld [smem:[#allocation142_spill]] }
  0x33   : > { %p7443_p8 = pnand %p6366_p0, %p10446_p1  ;;  %s323_s9 = sshll.u32 %s7246_s15, 4  ;;  %s7447_s9 = int_to_ptr.vmem [resolvable:$true] %s323_s9 }
  0x35   : > { %s10737_s30 = scalar_select %p7443_p8, 1, 0 }
  0x36   : > { %p7457_p9 = pneg %p7443_p8 }
  0x38   : > { %s6813_s7 = scalar_lea.hbm %s10738_s4, 32 }
  0x39   : > { %p6814_p5 = scmp.ne.s32.totalorder %s10738_s4, %s6813_s7  ;;  %p6820_p0 = scmp.lt.u32.totalorder %s6813_s7, %s10738_s4 }
  0x3a   : > { %s10739_s27 = scalar_select %p7457_p9, 1, 0 }
  0x3b   : > { %p6816_p10 = pnand %p7457_p9, %p6814_p5 }
  0x3d   : > { %p6817_p12 = pneg %p6816_p10 }
  0x3f   : > { %p6822_p1 = pnand %p6820_p0, %p6817_p12 }
  0x41   : > { %6825 = shalt.err (!%p6822_p1)
}
  0x42   : > { %s6826_s29 = scalar_lea.vmem %s314_s28, 32  ;;  %p6834_p11 = scmp.lt.s32.totalorder %s314_s28, %s314_s28 }
  0x43   : > { %p6827_p3 = scmp.ne.s32.totalorder %s314_s28, %s6826_s29  ;;  %p6835_p6 = scmp.lt.s32.totalorder %s6826_s29, %s6826_s29 }
  0x45   : > { %p6829_p13 = pnand %p6827_p3, %p7457_p9  ;;  %p6836_p4 = por %p6835_p6, %p6834_p11 }
  0x47   : > { %p6830_p7 = pneg %p6829_p13 }
  0x49   : > { %p6837_p2 = pnand %p6836_p4, %p6830_p7 }
  0x4b   : > { %6840 = shalt.err (!%p6837_p2)
}
  0x4c   : > { %6369 = dma.hbm_to_vmem [thread:$0]  (!%p7443_p8), %s10738_s4, 32, %s314_s28, [#allocation9]  }
  0x4d   : > { %s10740_s5 = sld [smem:[#allocation143_spill]] }
  0x53   : > { %s6841_s12 = scalar_lea.hbm %s10740_s5, 2048 }
  0x54   : > { %p6842_p1 = scmp.ne.s32.totalorder %s10740_s5, %s6841_s12  ;;  %p6848_p4 = scmp.lt.u32.totalorder %s6841_s12, %s10740_s5 }
  0x56   : > { %p6844_p3 = pnand %p6842_p1, %p7457_p9 }
  0x58   : > { %p6845_p6 = pneg %p6844_p3 }
  0x5a   : > { %p6850_p7 = pnand %p6848_p4, %p6845_p6 }
  0x5c   : > { %6853 = shalt.err (!%p6850_p7)
}
  0x5d   : > { %s6854_s28 = scalar_lea.vmem %s7447_s9, 2048  ;;  %p6862_p5 = scmp.lt.s32.totalorder %s7447_s9, %s7447_s9 }
  0x5e   : > { %p6855_p11 = scmp.ne.s32.totalorder %s7447_s9, %s6854_s28  ;;  %p6863_p10 = scmp.lt.s32.totalorder %s6854_s28, %s6854_s28 }
  0x60   : > { %p6857_p13 = pnand %p6855_p11, %p7457_p9  ;;  %p6864_p12 = por %p6863_p10, %p6862_p5 }
  0x62   : > { %p6858_p2 = pneg %p6857_p13 }
  0x64   : > { %p6865_p0 = pnand %p6864_p12, %p6858_p2 }
  0x66   : > { %6868 = shalt.err (!%p6865_p0)
}
  0x67   : > { %s7247_s10 = smov 64   ;;  %s7248_s26 = smov 4  }
  0x68   : > { %6372 = dma.hbm_to_vmem [thread:$0]  (!%p7443_p8), %s10740_s5, 2048, %s7447_s9, [#allocation12], %s7247_s10, %s7247_s10, %s7248_s26  }
  0x69   : > { %p10461_p1 = scmp.eq.s32.totalorder %s7243_s22, 0  ;;  %s45_s7 = sadd.s32 1, %s7235_s20 }
  0x6a   : > { %s81_s18 = sadd.s32 1, %s7211_s14  ;;  %p7499_p3 = scmp.ge.s32.totalorder %s45_s7, 2 }
  0x6b   : > { %p88_p6 = scmp.ne.s32.totalorder %s7211_s14, %s7207_s13  ;;  %p10460_p4 = scmp.lt.s32.totalorder %s7243_s22, 4 }
  0x6c   : > { %s10741_s12 = scalar_select %p7499_p3, 1, 0 }
  0x6d   : > { %s11166_s7 = smov (%p7499_p3, %s45_s7), 0  ;;  %p90_p7 = por %p88_p6, %p10461_p1 }
  0x6e   : > { %10742 = sst [smem:[#allocation38_spill]] %s11166_s7  ;;  %s7515_s9 = ssub.s32 %s7235_s20, %s11166_s7 }
  0x6f   : > { %s7518_s29 = sand.u32 1, %s7211_s14   ;;  %p79_p11 = scmp.eq.s32.totalorder %s7515_s9, 0 }
  0x70   : > { %s6334_s28 = smul.u32 1536, %s7518_s29  ;;  %s5809_s10 = sshll.u32 %s7235_s20, 9 }
  0x71   : > { %p7525_p13 = pnand %p10460_p4, %p90_p7  ;;  %s10745_s1 = sld [smem:[#allocation139_spill]] }
  0x72   : > { %s7530_s8 = scalar_select %p79_p11, %s7211_s14, %s81_s18  }
  0x73   : > { %s10743_s26 = scalar_select %p7525_p13, 1, 0 }
  0x74   : > { %10744 = sst [smem:[#allocation39_spill]] %s7530_s8  ;;  %s374_s5 = scalar_lea.vmem [#allocation5], %s6334_s28 }
  0x75   : > { %s381_s7 = sshll.u32 %s374_s5, 4  ;;  %s10746_s13 = sand.u32 1, %s7243_s22   ;;  %s7537_s7 = int_to_ptr.vmem [resolvable:$true] %s381_s7 }
  0x76   : > { %s7541_s25 = scalar_lea.sflag [#allocation6], %s10746_s13  ;;  %p7547_p5 = pneg %p7525_p13 }
  0x77   : > { %s7535_s4 = scalar_lea.hbm %s10745_s1, %s5809_s10  ;;  %s6874_s5 = scalar_lea.hbm %s10745_s1, 49152 }
  0x78   : > { %s6869_s24 = scalar_lea.hbm %s7535_s4, 24576  ;;  %p6875_p0 = scmp.lt.u32.totalorder %s7535_s4, %s10745_s1 }
  0x79   : > { %p6870_p2 = scmp.ne.s32.totalorder %s7535_s4, %s6869_s24  ;;  %p6876_p6 = scmp.lt.u32.totalorder %s6874_s5, %s6869_s24 }
  0x7a   : > { %p6878_p11 = scmp.lt.u32.totalorder %s6869_s24, %s7535_s4 }
  0x7b   : > { %p6872_p10 = pnand %p7547_p5, %p6870_p2  ;;  %p6877_p7 = por %p6876_p6, %p6875_p0 }
  0x7d   : > { %p6873_p12 = pneg %p6872_p10  ;;  %p6879_p4 = por %p6878_p11, %p6877_p7 }
  0x7f   : > { %p6880_p1 = pnand %p6879_p4, %p6873_p12 }
  0x81   : > { %6883 = shalt.err (!%p6880_p1)
}
  0x82   : > { %s6884_s13 = scalar_lea.vmem %s7537_s7, 24576  ;;  %s7249_s15 = smov [#allocation5]  }
  0x83   : > { %p6885_p2 = scmp.ne.s32.totalorder %s7537_s7, %s6884_s13  ;;  %s6889_s10 = sshll.u32 %s7249_s15, 4  ;;  %s6890_s10 = int_to_ptr.vmem [resolvable:$false] %s6889_s10 }
  0x84   : > { %s6891_s28 = scalar_lea.vmem %s6890_s10, 49152  ;;  %p6892_p8 = scmp.lt.s32.totalorder %s7537_s7, %s6890_s10 }
  0x85   : > { %p6887_p10 = pnand %p6885_p2, %p7547_p5  ;;  %p6893_p9 = scmp.lt.s32.totalorder %s6891_s28, %s6884_s13 }
  0x87   : > { %p6888_p3 = pneg %p6887_p10  ;;  %p6894_p0 = por %p6893_p9, %p6892_p8 }
  0x89   : > { %p6895_p6 = pnand %p6894_p0, %p6888_p3 }
  0x8b   : > { %6898 = shalt.err (!%p6895_p6)
}
  0x8c   : > { %s7250_s24 = smov 1024   ;;  %s7251_s5 = smov 512  }
  0x8d   : > { %s7252_s19 = smov 32   ;;  %s7253_s1 = smov [#allocation13]  }
  0x8e   : > { %6382 = dma.hbm_to_vmem [thread:$0]  (!%p7525_p13), %s7535_s4, 24576, %s7537_s7, %s7541_s25, %s7250_s24, %s7251_s5, %s7252_s19  }
  0x8f   : > { %s337_s8 = sshll.u32 %s7253_s1, 4  ;;  %s10748_s6 = sld [smem:[#allocation144_spill]]  ;;  %s338_s8 = int_to_ptr.vmem [resolvable:$true] %s337_s8 }
  0x90   : > { %p10749_p9 = scmp.ne.s32.totalorder %s10739_s27, 0 }
  0x95   : > { %s6899_s13 = scalar_lea.hbm %s10748_s6, 16 }
  0x96   : > { %p6900_p8 = scmp.ne.s32.totalorder %s10748_s6, %s6899_s13  ;;  %p6906_p4 = scmp.lt.u32.totalorder %s6899_s13, %s10748_s6 }
  0x98   : > { %p6902_p1 = pnand %p6900_p8, %p10749_p9 }
  0x9a   : > { %p6903_p3 = pneg %p6902_p1 }
  0x9c   : > { %p6908_p12 = pnand %p6906_p4, %p6903_p3 }
  0x9e   : > { %6911 = shalt.err (!%p6908_p12)
}
  0x9f   : > { %s6912_s4 = scalar_lea.vmem %s338_s8, 16  ;;  %s6919_s1 = scalar_lea.vmem %s338_s8, 32 }
  0xa0   : > { %p6913_p7 = scmp.ne.s32.totalorder %s338_s8, %s6912_s4  ;;  %p6920_p10 = scmp.lt.s32.totalorder %s338_s8, %s338_s8 }
  0xa1   : > { %p6921_p0 = scmp.lt.s32.totalorder %s6919_s1, %s6912_s4 }
  0xa2   : > { %p6915_p11 = pnand %p6913_p7, %p10749_p9 }
  0xa3   : > { %p6922_p6 = por %p6921_p0, %p6920_p10 }
  0xa4   : > { %p6916_p2 = pneg %p6915_p11 }
  0xa6   : > { %p6923_p13 = pnand %p6922_p6, %p6916_p2 }
  0xa8   : > { %6926 = shalt.err (!%p6923_p13)
}
  0xa9   : > { %p10750_p8 = scmp.ne.s32.totalorder %s10737_s30, 0  ;;  %s48_s2 = sadd.s32 1, %s7239_s21 }
  0xaa   : > { %p10751_p13 = scmp.ne.s32.totalorder %s10741_s12, 0  ;;  %s55_s3 = sadd.s32 1, %s7223_s17 }
  0xab   : > { %6375 = dma.hbm_to_vmem [thread:$0]  (!%p10750_p8), %s10748_s6, 16, %s338_s8, [#allocation12]  }
  0xac   : > { %s11168_s2 = smov (!%p10751_p13, %s48_s2), %s7239_s21  ;;  %p62_p9 = scmp.ne.s32.totalorder %s7223_s17, %s7219_s16 }
  0xad   : > { %p50_p1 = scmp.ge.s32.totalorder %s11168_s2, 2  ;;  %s348_s30 = sand.u32 1, %s7223_s17  }
  0xae   : > { %p10752_p3 = scmp.eq.s32.totalorder %s7243_s22, 0  ;;  %p10754_p12 = scmp.eq.s32.totalorder %s7392_s23, 3 }
  0xaf   : > { %s11170_s2 = smov (%p50_p1, %s11168_s2), 0  ;;  %s6332_s12 = smul.u32 216, %s348_s30 }
  0xb0   : > { %p7599_p4 = por %p10752_p3, %p62_p9  ;;  %p7605_p7 = por %p10754_p12, %p62_p9 }
  0xb1   : > { %10756 = sst [smem:[#allocation40_spill]] %s11170_s2  ;;  %s52_s24 = ssub.s32 %s7239_s21, %s11170_s2 }
  0xb2   : > { %s10755_s8 = scalar_select %p7605_p7, 1, 0 }
  0xb3   : > { %p53_p11 = scmp.eq.s32.totalorder %s52_s24, 0  ;;  %s273_s5 = sor.u32 %s7515_s9, %s52_s24 }
  0xb4   : > { %p274_p2 = scmp.eq.s32.totalorder %s273_s5, 0  ;;  %s10757_s15 = sadd.s32 1, %s7199_s11 }
  0xb5   : > { %s7615_s19 = scalar_select %p53_p11, %s7223_s17, %s55_s3  }
  0xb6   : > { %s7620_s13 = scalar_select %p274_p2, %s7199_s11, %s10757_s15  }
  0xb7   : > { %s6403_s10 = smul.u32 3456, %s7239_s21  ;;  %s352_s28 = scalar_lea.vmem [#allocation2], %s6332_s12 }
  0xb8   : > { %s360_s4 = sshll.u32 %s352_s28, 4  ;;  %p10758_p10 = scmp.lt.s32.totalorder %s7243_s22, 4  ;;  %s7623_s4 = int_to_ptr.vmem [resolvable:$true] %s360_s4 }
  0xb9   : > { %s10760_s0 = sld [smem:[#allocation138_spill]]  ;;  %s7638_s3 = scalar_lea.sflag [#allocation3], %s348_s30 }
  0xba   : > { %p7629_p0 = pnand %p10758_p10, %p7599_p4 }
  0xbc   : > { %p6929_p8 = pneg %p7629_p0 }
  0xbf   : > { %s7636_s9 = scalar_lea.hbm %s10760_s0, %s6403_s10  ;;  %s6932_s5 = scalar_lea.hbm %s10760_s0, 6912 }
  0xc0   : > { %s6927_s12 = scalar_lea.hbm %s7636_s9, 3456  ;;  %p6933_p1 = scmp.lt.u32.totalorder %s7636_s9, %s10760_s0 }
  0xc1   : > { %p6928_p6 = scmp.ne.s32.totalorder %s7636_s9, %s6927_s12  ;;  %p6934_p3 = scmp.lt.u32.totalorder %s6932_s5, %s6927_s12 }
  0xc2   : > { %p6936_p12 = scmp.lt.u32.totalorder %s6927_s12, %s7636_s9 }
  0xc3   : > { %p6930_p13 = pnand %p6929_p8, %p6928_p6  ;;  %p6935_p4 = por %p6934_p3, %p6933_p1 }
  0xc5   : > { %p6931_p9 = pneg %p6930_p13  ;;  %p6937_p11 = por %p6936_p12, %p6935_p4 }
  0xc7   : > { %p6938_p2 = pnand %p6937_p11, %p6931_p9 }
  0xc9   : > { %6941 = shalt.err (!%p6938_p2)
}
  0xca   : > { %s6942_s30 = scalar_lea.vmem %s7623_s4, 3456  ;;  %s7254_s28 = smov [#allocation2]  }
  0xcb   : > { %p6943_p10 = scmp.ne.s32.totalorder %s7623_s4, %s6942_s30  ;;  %s6947_s14 = sshll.u32 %s7254_s28, 4  ;;  %s6948_s14 = int_to_ptr.vmem [resolvable:$false] %s6947_s14 }
  0xcc   : > { %s6949_s7 = scalar_lea.vmem %s6948_s14, 6912  ;;  %p6950_p7 = scmp.lt.s32.totalorder %s7623_s4, %s6948_s14 }
  0xcd   : > { %p6945_p6 = pnand %p6943_p10, %p6929_p8  ;;  %p6951_p1 = scmp.lt.s32.totalorder %s6949_s7, %s6942_s30 }
  0xcf   : > { %p6946_p13 = pneg %p6945_p6  ;;  %p6952_p3 = por %p6951_p1, %p6950_p7 }
  0xd1   : > { %p6953_p4 = pnand %p6952_p3, %p6946_p13 }
  0xd3   : > { %6956 = shalt.err (!%p6953_p4)
}
  0xd4   : > { %s7255_s12 = smov 192   ;;  %s7256_s27 = smov 12  }
  0xd5   : > { %6379 = dma.hbm_to_vmem [thread:$0]  (!%p7629_p0), %s7636_s9, 3456, %s7623_s4, %s7638_s3, %s7255_s12, %s7255_s12, %s7256_s27  }
  0xd6   : > { %s5422_s24 = sshll.u32 %s7518_s29, 3  ;;  %s5810_s5 = sshll.u32 %s7235_s20, 7 }
  0xd7   : > { %s10761_s30 = sld [smem:[#allocation140_spill]]  ;;  %s395_s7 = scalar_lea.vmem [#allocation7], %s5422_s24 }
  0xd8   : > { %s403_s0 = sshll.u32 %s395_s7, 4  ;;  %s5425_s6 = sshll.u32 %s7518_s29, 10  ;;  %s404_s0 = int_to_ptr.vmem [resolvable:$true] %s403_s0 }
  0xdd   : > { %s10762_s28 = smov %s10761_s30  ;;  %s7671_s14 = scalar_lea.hbm %s10761_s30, %s5810_s5 }
  0xde   : > { %s6957_s2 = scalar_lea.hbm %s7671_s14, 128  ;;  %s6962_s9 = scalar_lea.hbm %s10762_s28, 256 }
  0xdf   : > { %p6958_p7 = scmp.ne.s32.totalorder %s7671_s14, %s6957_s2  ;;  %p6963_p9 = scmp.lt.u32.totalorder %s7671_s14, %s10762_s28 }
  0xe0   : > { %p6964_p12 = scmp.lt.u32.totalorder %s6962_s9, %s6957_s2  ;;  %p6966_p2 = scmp.lt.u32.totalorder %s6957_s2, %s7671_s14 }
  0xe1   : > { %p6960_p8 = pnand %p6958_p7, %p7547_p5 }
  0xe2   : > { %p6965_p11 = por %p6964_p12, %p6963_p9 }
  0xe3   : > { %p6961_p0 = pneg %p6960_p8 }
  0xe4   : > { %p6967_p10 = por %p6966_p2, %p6965_p11 }
  0xe6   : > { %p6968_p6 = pnand %p6967_p10, %p6961_p0 }
  0xe8   : > { %6971 = shalt.err (!%p6968_p6)
}
  0xe9   : > { %s6972_s27 = scalar_lea.vmem %s404_s0, 128  ;;  %s7257_s24 = smov [#allocation7]  }
  0xea   : > { %p6973_p13 = scmp.ne.s32.totalorder %s404_s0, %s6972_s27  ;;  %s6977_s5 = sshll.u32 %s7257_s24, 4  ;;  %s6978_s5 = int_to_ptr.vmem [resolvable:$false] %s6977_s5 }
  0xeb   : > { %s6979_s15 = scalar_lea.vmem %s6978_s5, 256  ;;  %p6980_p4 = scmp.lt.s32.totalorder %s404_s0, %s6978_s5 }
  0xec   : > { %p6975_p1 = pnand %p6973_p13, %p7547_p5  ;;  %p6981_p7 = scmp.lt.s32.totalorder %s6979_s15, %s6972_s27 }
  0xee   : > { %p6976_p3 = pneg %p6975_p1  ;;  %p6982_p8 = por %p6981_p7, %p6980_p4 }
  0xf0   : > { %p6983_p9 = pnand %p6982_p8, %p6976_p3 }
  0xf2   : > { %6986 = shalt.err (!%p6983_p9)
}
  0xf3   : > { %p10763_p12 = scmp.ne.s32.totalorder %s10743_s26, 0  ;;  %s5812_s2 = sshll.u32 %s7235_s20, 14 }
  0xf4   : > { %s10764_s7 = sld [smem:[#allocation141_spill]]  ;;  %s414_s1 = scalar_lea.vmem [#allocation8], %s5425_s6 }
  0xf5   : > { %6385 = dma.hbm_to_vmem [thread:$0]  (!%p10763_p12), %s7671_s14, 128, %s404_s0, %s7541_s25  }
  0xf6   : > { %s422_s9 = sshll.u32 %s414_s1, 4  ;;  %s10765_s3 = sand.u32 1, %s7243_s22   ;;  %s7700_s9 = int_to_ptr.vmem [resolvable:$true] %s422_s9 }
  0xf7   : > { %s7704_s12 = scalar_lea.sflag [#allocation9], %s10765_s3 }
  0xfa   : > { %s7696_s4 = scalar_lea.hbm %s10764_s7, %s5812_s2  ;;  %s6992_s29 = scalar_lea.hbm %s10764_s7, 32768 }
  0xfb   : > { %s6987_s27 = scalar_lea.hbm %s7696_s4, 16384  ;;  %p6993_p10 = scmp.lt.u32.totalorder %s7696_s4, %s10764_s7 }
  0xfc   : > { %p6988_p0 = scmp.ne.s32.totalorder %s7696_s4, %s6987_s27  ;;  %p6994_p6 = scmp.lt.u32.totalorder %s6992_s29, %s6987_s27 }
  0xfd   : > { %p6996_p1 = scmp.lt.u32.totalorder %s6987_s27, %s7696_s4 }
  0xfe   : > { %p6990_p11 = pnand %p6988_p0, %p7547_p5  ;;  %p6995_p13 = por %p6994_p6, %p6993_p10 }
 0x100   : > { %p6991_p2 = pneg %p6990_p11  ;;  %p6997_p3 = por %p6996_p1, %p6995_p13 }
 0x102   : > { %p6998_p4 = pnand %p6997_p3, %p6991_p2 }
 0x104   : > { %7001 = shalt.err (!%p6998_p4)
}
 0x105   : > { %s7002_s6 = scalar_lea.vmem %s7700_s9, 16384  ;;  %s7258_s5 = smov [#allocation8]  }
 0x106   : > { %p7003_p7 = scmp.ne.s32.totalorder %s7700_s9, %s7002_s6  ;;  %s7007_s15 = sshll.u32 %s7258_s5, 4  ;;  %s7008_s15 = int_to_ptr.vmem [resolvable:$false] %s7007_s15 }
 0x107   : > { %s7009_s2 = scalar_lea.vmem %s7008_s15, 32768  ;;  %p7010_p0 = scmp.lt.s32.totalorder %s7700_s9, %s7008_s15 }
 0x108   : > { %p7005_p8 = pnand %p7003_p7, %p7547_p5  ;;  %p7011_p11 = scmp.lt.s32.totalorder %s7009_s2, %s7002_s6 }
 0x10a   : > { %p7006_p9 = pneg %p7005_p8  ;;  %p7012_p10 = por %p7011_p11, %p7010_p0 }
 0x10c   : > { %p7013_p6 = pnand %p7012_p10, %p7006_p9 }
 0x10e   : > { %7016 = shalt.err (!%p7013_p6)
}
 0x10f   : > { %s7259_s10 = smov 128   ;;  %s7260_s30 = smov 8  }
 0x110   : > { %6388 = dma.hbm_to_vmem [thread:$0]  (!%p10763_p12), %s7696_s4, 16384, %s7700_s9, %s7704_s12, %s7259_s10, %s7259_s10, %s7260_s30  }
 0x111   : > { %s10766_s18 = sld [smem:[#allocation37_spill]] }
 0x117   : > { %p10767_p5 = scmp.ne.s32.totalorder %s10766_s18, 0 }
 0x119   : > { %434 = sbr.rel (%p10767_p5) target bundleno = 1824 (0x720), region = 48 }
 0x120   : > { %s10768_s1 = sld [smem:[#allocation32_spill]]  ;;  %s7731_s3 = sand.u32 1, %s7219_s16  }
 0x121   : > { %s6335_s27 = smul.u32 216, %s7731_s3  ;;  %s437_s0 = scalar_lea.sflag [#allocation3], %s7731_s3 }
 0x123   : > { %s7735_s25 = scalar_lea.vmem [#allocation2], %s6335_s27 }
 0x126   : > { %p10769_p2 = scmp.ne.s32.totalorder %s10768_s1, 0 }
 0x128   : > { %7158 = dma.done.wait (%p10769_p2), %s437_s0, 3456  }
 0x129   : > { %7160 = vsyncadd (%p10769_p2), %s437_s0, 4294963840  ;;  %s10770_s26 = sld [smem:[#allocation27_spill]]  ;;  %s10771_s4 = sld [smem:[#allocation33_spill]] }
 0x12a   : > { %s7742_s9 = sand.u32 1, %s7392_s23  }
 0x12b   : > { %s446_s14 = scalar_lea.sflag [#allocation6], %s7742_s9 }
 0x12f   : > { %s447_s12 = sand.u32 1, %s10770_s26   ;;  %p10772_p12 = scmp.ne.s32.totalorder %s10771_s4, 0 }
 0x130   : > { %s6336_s29 = smul.u32 1536, %s447_s12 }
 0x132   : > { %s7746_s24 = scalar_lea.vmem [#allocation5], %s6336_s29 }
 0x133   : > { %7162 = dma.done.wait (%p10772_p12), %s446_s14, 24704  }
 0x134   : > { %7164 = vsyncadd (%p10772_p12), %s446_s14, 4294942592  ;;  %s5430_s6 = sshll.u32 %s447_s12, 3  ;;  %s5431_s5 = sshll.u32 %s447_s12, 10 }
 0x135   : > { %s7752_s15 = scalar_lea.vmem [#allocation7], %s5430_s6  ;;  %s464_s2 = scalar_lea.sflag [#allocation9], %s7742_s9 }
 0x136   : > { %s7755_s10 = scalar_lea.vmem [#allocation8], %s5431_s5 }
 0x137   : > { %7166 = dma.done.wait (%p10772_p12), %s464_s2, 16384  }
 0x138   : > { %7168 = vsyncadd (%p10772_p12), %s464_s2, 4294950912  ;;  %p10773_p13 = scmp.eq.s32.totalorder %s7392_s23, 0 }
 0x13a   : > { %7170 = dma.done.wait (%p10773_p13), [#allocation9], 32   ;;  %p10774_p1 = pmov %p10773_p13 }
 0x13c   : > { %7172 = vsyncadd (%p10774_p1), [#allocation9], 4294967264  ;;  %p10775_p3 = pmov %p10774_p1 }
 0x13d   : > { %p10776_p4 = pmov %p10774_p1 }
 0x13e   : > { %7174 = dma.done.wait (%p10775_p3), [#allocation12], 2064  }
 0x13f   : > { %7176 = vsyncadd (%p10776_p4), [#allocation12], 4294965232  ;;  %s6337_s30 = smul.u32 144, %s7731_s3  ;;  %v7261_v0 = vmov 0   ;;  %v584_v1 = vld [vmem:[%s7746_s24] sm:$0xff]  ;;  %s10778_s23 = sld [smem:[#allocation26_spill]] }
 0x140   : > { %s6338_s18 = smul.u32 288, %s7731_s3  ;;  %2077 = vmatprep.mubr.bf16.mxu0 %v7261_v0  ;;  %v588_v2 = vld [vmem:[%s7746_s24 + $0x20] sm:$0xff]  ;;  %s10881_s4 = sld [smem:[#allocation30_spill]] }
 0x141   : > { %v592_v3 = vld [vmem:[%s7746_s24 + $0x40] sm:$0xff]  ;;  %v5463_v4 = vcombine.high %v584_v1, %v588_v2  ;;  %v5462_v5 = vcombine.low %v584_v1, %v588_v2 }
 0x142   : > { %v596_v6 = vld [vmem:[%s7746_s24 + $0x60] sm:$0xff]  ;;  %s9353_s26 = scalar_lea.vmem [#allocation15], %s6338_s18 }
 0x143   : > { %v5471_v7 = vcombine.high %v592_v3, %v596_v6  ;;  %v600_v8 = vld [vmem:[%s7746_s24 + $0x80] sm:$0xff]  ;;  %1922 = vmatprep.subr.bf16.mxu1 %v5463_v4  ;;  %v5470_v10 = vcombine.low %v592_v3, %v596_v6 }
 0x144   : > { %v604_v9 = vld [vmem:[%s7746_s24 + $0xa0] sm:$0xff]  ;;  %1923 = vmatpush1.bf16.msra.mxu1 %v5462_v5 }
 0x145   : > { %1924 = vmatprep.subr.bf16.mxu1 %v5471_v7  ;;  %v5479_v11 = vcombine.high %v600_v8, %v604_v9  ;;  %v608_v12 = vld [vmem:[%s7746_s24 + $0xc0] sm:$0xff]  ;;  %v5478_v20 = vcombine.low %v600_v8, %v604_v9  ;;  %s536_s1 = sand.u32 1, %s10778_s23  }
 0x146   : > { %v612_v13 = vld [vmem:[%s7746_s24 + $0xe0] sm:$0xff]  ;;  %s6339_s27 = smul.u32 1152, %s536_s1  ;;  %p5654_p7 = scmp.ne.s32.totalorder %s10881_s4, 0 }
 0x147   : > { %v712_v14 = vld [vmem:[%s7746_s24 + $0x400] sm:$0xff]  ;;  %v5487_v23 = vcombine.high %v608_v12, %v612_v13  ;;  %v5486_v29 = vcombine.low %v608_v12, %v612_v13 }
 0x148   : > { %v716_v15 = vld [vmem:[%s7746_s24 + $0x420] sm:$0xff]  ;;  %1925 = vmatpush1.bf16.msra.mxu1 %v5470_v10  ;;  %s8215_s0 = scalar_lea.vmem [#allocation17], %s6339_s27 }
 0x149   : > { %v5591_v16 = vcombine.high %v712_v14, %v716_v15  ;;  %v5590_v17 = vcombine.low %v712_v14, %v716_v15  ;;  %v720_v18 = vld [vmem:[%s7746_s24 + $0x440] sm:$0xff]  ;;  %1926 = vmatprep.subr.bf16.mxu1 %v5479_v11 }
 0x14a   : > { %v724_v19 = vld [vmem:[%s7746_s24 + $0x460] sm:$0xff] }
 0x14b   : > { %v5599_v21 = vcombine.high %v720_v18, %v724_v19  ;;  %v728_v22 = vld [vmem:[%s7746_s24 + $0x480] sm:$0xff]  ;;  %2045 = vmatprep.subr.bf16.mxu0 %v5591_v16  ;;  %v5598_v27 = vcombine.low %v720_v18, %v724_v19 }
 0x14c   : > { %v732_v24 = vld [vmem:[%s7746_s24 + $0x4a0] sm:$0xff]  ;;  %2046 = vmatpush1.bf16.msra.mxu0 %v5590_v17  ;;  %1927 = vmatpush1.bf16.msra.mxu1 %v5478_v20 }
 0x14d   : > { %v616_v25 = vld [vmem:[%s7746_s24 + $0x100] sm:$0xff]  ;;  %2047 = vmatprep.subr.bf16.mxu0 %v5599_v21  ;;  %v5607_v28 = vcombine.high %v728_v22, %v732_v24  ;;  %1928 = vmatprep.subr.bf16.mxu1 %v5487_v23  ;;  %v5606_v35 = vcombine.low %v728_v22, %v732_v24  ;;  %v7825_v24 = vld [vmem:[%s7735_s25 + $0x20] ss:$12 sps:$4 sm:$0xff]  }
 0x14e   : > { %v620_v26 = vld [vmem:[%s7746_s24 + $0x120] sm:$0xff] }
 0x14f   : > { %v736_v30 = vld [vmem:[%s7746_s24 + $0x4c0] sm:$0xff]  ;;  %v5495_v32 = vcombine.high %v616_v25, %v620_v26  ;;  %v5494_v39 = vcombine.low %v616_v25, %v620_v26 }
 0x150   : > { %v740_v31 = vld [vmem:[%s7746_s24 + $0x4e0] sm:$0xff]  ;;  %2048 = vmatpush1.bf16.msra.mxu0 %v5598_v27  ;;  %1929 = vmatpush1.bf16.msra.mxu1 %v5486_v29  ;;  %v586_v27 = vld [vmem:[%s7746_s24 + $0x10] sm:$0xff] }
 0x151   : > { %v624_v33 = vld [vmem:[%s7746_s24 + $0x140] sm:$0xff]  ;;  %2049 = vmatprep.subr.bf16.mxu0 %v5607_v28  ;;  %v5615_v36 = vcombine.high %v736_v30, %v740_v31  ;;  %1930 = vmatprep.subr.bf16.mxu1 %v5495_v32  ;;  %v5614_v44 = vcombine.low %v736_v30, %v740_v31  ;;  %v590_v28 = vld [vmem:[%s7746_s24 + $0x30] sm:$0xff] }
 0x152   : > { %v628_v34 = vld [vmem:[%s7746_s24 + $0x160] sm:$0xff]  ;;  %v5466_v30 = vcombine.low %v586_v27, %v590_v28  ;;  %v594_v31 = vld [vmem:[%s7746_s24 + $0x50] sm:$0xff] }
 0x153   : > { %v744_v37 = vld [vmem:[%s7746_s24 + $0x500] sm:$0xff]  ;;  %v5503_v41 = vcombine.high %v624_v33, %v628_v34  ;;  %v5502_v46 = vcombine.low %v624_v33, %v628_v34  ;;  %v5467_v34 = vcombine.high %v586_v27, %v590_v28  ;;  %v617_v28 = vld [vmem:[%s7746_s24 + $0x108] sm:$0xff] }
 0x154   : > { %v748_v38 = vld [vmem:[%s7746_s24 + $0x520] sm:$0xff]  ;;  %2050 = vmatpush1.bf16.msra.mxu0 %v5606_v35  ;;  %1931 = vmatpush1.bf16.msra.mxu1 %v5494_v39  ;;  %v598_v35 = vld [vmem:[%s7746_s24 + $0x70] sm:$0xff] }
 0x155   : > { %v7795_v40 = vld [vmem:[%s7735_s25 + $0x4] ss:$12 sps:$4 sm:$0xff]   ;;  %2051 = vmatprep.subr.bf16.mxu0 %v5615_v36  ;;  %v5623_v45 = vcombine.high %v744_v37, %v748_v38  ;;  %1932 = vmatprep.subr.bf16.mxu1 %v5503_v41  ;;  %v5622_v52 = vcombine.low %v744_v37, %v748_v38  ;;  %v7815_v14 = vld [vmem:[%s7735_s25 + $0x8] ss:$12 sps:$4 sm:$0xff]   ;;  %v5475_v36 = vcombine.high %v594_v31, %v598_v35 }
 0x156   : > { %v632_v42 = vld [vmem:[%s7746_s24 + $0x180] sm:$0xff]  ;;  %1954 = vmatprep.mubr.bf16.mxu1 %v7795_v40  ;;  %v602_v38 = vld [vmem:[%s7746_s24 + $0x90] sm:$0xff] }
 0x157   : > { %v636_v43 = vld [vmem:[%s7746_s24 + $0x1a0] sm:$0xff]  ;;  %v606_v39 = vld [vmem:[%s7746_s24 + $0xb0] sm:$0xff] }
 0x158   : > { %v752_v47 = vld [vmem:[%s7746_s24 + $0x540] sm:$0xff]  ;;  %v5511_v49 = vcombine.high %v632_v42, %v636_v43  ;;  %2052 = vmatpush1.bf16.msra.mxu0 %v5614_v44  ;;  %1933 = vmatpush1.bf16.msra.mxu1 %v5502_v46  ;;  %v5510_v54 = vcombine.low %v632_v42, %v636_v43  ;;  %v5483_v46 = vcombine.high %v602_v38, %v606_v39 }
 0x159   : > { %v756_v48 = vld [vmem:[%s7746_s24 + $0x560] sm:$0xff]  ;;  %2053 = vmatprep.subr.bf16.mxu0 %v5623_v45  ;;  %v5474_v45 = vcombine.low %v594_v31, %v598_v35 }
 0x15a   : > { %v640_v50 = vld [vmem:[%s7746_s24 + $0x1c0] sm:$0xff]  ;;  %v5631_v53 = vcombine.high %v752_v47, %v756_v48  ;;  %1934 = vmatprep.subr.bf16.mxu1 %v5511_v49  ;;  %v5630_v60 = vcombine.low %v752_v47, %v756_v48  ;;  %v610_v48 = vld [vmem:[%s7746_s24 + $0xd0] sm:$0xff] }
 0x15b   : > { %v644_v51 = vld [vmem:[%s7746_s24 + $0x1e0] sm:$0xff]  ;;  %v614_v49 = vld [vmem:[%s7746_s24 + $0xf0] sm:$0xff] }
 0x15c   : > { %v760_v55 = vld [vmem:[%s7746_s24 + $0x580] sm:$0xff]  ;;  %v5519_v57 = vcombine.high %v640_v50, %v644_v51  ;;  %2054 = vmatpush1.bf16.msra.mxu0 %v5622_v52  ;;  %1935 = vmatpush1.bf16.msra.mxu1 %v5510_v54  ;;  %v5518_v63 = vcombine.low %v640_v50, %v644_v51  ;;  %v585_v51 = vld [vmem:[%s7746_s24 + $0x8] sm:$0xff]  ;;  %v5491_v54 = vcombine.high %v610_v48, %v614_v49 }
 0x15d   : > { %v764_v56 = vld [vmem:[%s7746_s24 + $0x5a0] sm:$0xff]  ;;  %2055 = vmatprep.subr.bf16.mxu0 %v5631_v53  ;;  %v589_v52 = vld [vmem:[%s7746_s24 + $0x28] sm:$0xff]  ;;  %v5482_v53 = vcombine.low %v602_v38, %v606_v39 }
 0x15e   : > { %v648_v58 = vld [vmem:[%s7746_s24 + $0x200] sm:$0xff]  ;;  %v5639_v61 = vcombine.high %v760_v55, %v764_v56  ;;  %1936 = vmatprep.subr.bf16.mxu1 %v5519_v57  ;;  %v5638_v5 = vcombine.low %v760_v55, %v764_v56  ;;  %v618_v56 = vld [vmem:[%s7746_s24 + $0x110] sm:$0xff]  ;;  %v629_v38 = vld [vmem:[%s7746_s24 + $0x168] sm:$0xff] }
 0x15f   : > { %v652_v59 = vld [vmem:[%s7746_s24 + $0x220] sm:$0xff]  ;;  %v622_v57 = vld [vmem:[%s7746_s24 + $0x130] sm:$0xff] }
 0x160   : > { %v768_v62 = vld [vmem:[%s7746_s24 + $0x5c0] sm:$0xff]  ;;  %v5527_v2 = vcombine.high %v648_v58, %v652_v59  ;;  %2056 = vmatpush1.bf16.msra.mxu0 %v5630_v60  ;;  %1937 = vmatpush1.bf16.msra.mxu1 %v5518_v63  ;;  %v5526_v7 = vcombine.low %v648_v58, %v652_v59  ;;  %v5465_v58 = vcombine.high %v585_v51, %v589_v52  ;;  %v593_v60 = vld [vmem:[%s7746_s24 + $0x48] sm:$0xff] }
 0x161   : > { %v772_v1 = vld [vmem:[%s7746_s24 + $0x5e0] sm:$0xff]  ;;  %2057 = vmatprep.subr.bf16.mxu0 %v5639_v61  ;;  %v597_v61 = vld [vmem:[%s7746_s24 + $0x68] sm:$0xff] }
 0x162   : > { %v656_v3 = vld [vmem:[%s7746_s24 + $0x240] sm:$0xff]  ;;  %v5647_v6 = vcombine.high %v768_v62, %v772_v1  ;;  %1938 = vmatprep.subr.bf16.mxu1 %v5527_v2  ;;  %v5646_v11 = vcombine.low %v768_v62, %v772_v1  ;;  %v5490_v62 = vcombine.low %v610_v48, %v614_v49  ;;  %v7857_v63 = vld [vmem:[%s7735_s25] ss:$12 sps:$4 sm:$0xff]   ;;  %v5499_v1 = vcombine.high %v618_v56, %v622_v57 }
 0x163   : > { %v660_v4 = vld [vmem:[%s7746_s24 + $0x260] sm:$0xff]  ;;  %v5464_v2 = vcombine.low %v585_v51, %v589_v52  ;;  %v633_v49 = vld [vmem:[%s7746_s24 + $0x188] sm:$0xff] }
 0x164   : > { %v5535_v8 = vcombine.high %v656_v3, %v660_v4  ;;  %v664_v9 = vld [vmem:[%s7746_s24 + $0x280] sm:$0xff]  ;;  %2058 = vmatpush1.bf16.msra.mxu0 %v5638_v5  ;;  %1939 = vmatpush1.bf16.msra.mxu1 %v5526_v7  ;;  %v5534_v12 = vcombine.low %v656_v3, %v660_v4  ;;  %v626_v4 = vld [vmem:[%s7746_s24 + $0x150] sm:$0xff]  ;;  %v601_v7 = vld [vmem:[%s7746_s24 + $0x88] sm:$0xff] }
 0x165   : > { %v668_v10 = vld [vmem:[%s7746_s24 + $0x2a0] sm:$0xff]  ;;  %2059 = vmatprep.subr.bf16.mxu0 %v5647_v6  ;;  %v630_v5 = vld [vmem:[%s7746_s24 + $0x170] sm:$0xff]  ;;  %v5473_v6 = vcombine.high %v593_v60, %v597_v61 }
 0x166   : > { %1940 = vmatprep.subr.bf16.mxu1 %v5535_v8  ;;  %v5543_v13 = vcombine.high %v664_v9, %v668_v10  ;;  %v672_v15 = vld [vmem:[%s7746_s24 + $0x2c0] sm:$0xff]  ;;  %v5542_v17 = vcombine.low %v664_v9, %v668_v10  ;;  %v605_v8 = vld [vmem:[%s7746_s24 + $0xa8] sm:$0xff]  ;;  %v5498_v9 = vcombine.low %v618_v56, %v622_v57  ;;  %v5507_v10 = vcombine.high %v626_v4, %v630_v5 }
 0x167   : > { %v676_v16 = vld [vmem:[%s7746_s24 + $0x2e0] sm:$0xff] }
 0x168   : > { %2060 = vmatpush1.bf16.msra.mxu0 %v5646_v11  ;;  %1941 = vmatpush1.bf16.msra.mxu1 %v5534_v12  ;;  %v5551_v18 = vcombine.high %v672_v15, %v676_v16  ;;  %v680_v19 = vld [vmem:[%s7746_s24 + $0x300] sm:$0xff]  ;;  %v5550_v21 = vcombine.low %v672_v15, %v676_v16  ;;  %v5472_v11 = vcombine.low %v593_v60, %v597_v61  ;;  %v634_v12 = vld [vmem:[%s7746_s24 + $0x190] sm:$0xff]  ;;  %v645_v60 = vld [vmem:[%s7746_s24 + $0x1e8] sm:$0xff] }
 0x169   : > { %1942 = vmatprep.subr.bf16.mxu1 %v5543_v13  ;;  %v684_v20 = vld [vmem:[%s7746_s24 + $0x320] sm:$0xff]  ;;  %2414 = vmatprep.subr.bf16.mxu0 %v5467_v34  ;;  %v638_v13 = vld [vmem:[%s7746_s24 + $0x1b0] sm:$0xff]  ;;  %v5481_v15 = vcombine.high %v601_v7, %v605_v8 }
 0x16a   : > { %v5559_v22 = vcombine.high %v680_v19, %v684_v20  ;;  %v688_v23 = vld [vmem:[%s7746_s24 + $0x340] sm:$0xff]  ;;  %v5558_v26 = vcombine.low %v680_v19, %v684_v20  ;;  %v5506_v19 = vcombine.low %v626_v4, %v630_v5  ;;  %v654_v34 = vld [vmem:[%s7746_s24 + $0x230] sm:$0xff] }
 0x16b   : > { %2078 = vmatmul.mubr.bf16.vlgmr.msra.gmra.mrb[0].mxu0 %v7815_v14  ;;  %v692_v25 = vld [vmem:[%s7746_s24 + $0x360] sm:$0xff]  ;;  %v674_v5 = vld [vmem:[%s7746_s24 + $0x2d0] sm:$0xff] }
 0x16c   : > { %2087 = vmatprep.mubr.bf16.mxu0 %v7261_v0  ;;  %1943 = vmatpush1.bf16.msra.mxu1 %v5542_v17  ;;  %v5567_v29 = vcombine.high %v688_v23, %v692_v25  ;;  %v696_v32 = vld [vmem:[%s7746_s24 + $0x380] sm:$0xff]  ;;  %v5566_v37 = vcombine.low %v688_v23, %v692_v25  ;;  %v609_v17 = vld [vmem:[%s7746_s24 + $0xc8] sm:$0xff]  ;;  %v642_v25 = vld [vmem:[%s7746_s24 + $0x1d0] sm:$0xff] }
 0x16d   : > { %1944 = vmatprep.subr.bf16.mxu1 %v5551_v18  ;;  %v700_v33 = vld [vmem:[%s7746_s24 + $0x3a0] sm:$0xff]  ;;  %2415 = vmatpush1.bf16.msra.mxu0 %v5466_v30  ;;  %v613_v18 = vld [vmem:[%s7746_s24 + $0xe8] sm:$0xff]  ;;  %v5514_v30 = vcombine.low %v634_v12, %v638_v13 }
 0x16e   : > { %v5575_v41 = vcombine.high %v696_v32, %v700_v33  ;;  %v7839_v42 = vld [vmem:[%s7735_s25 + $0x38] ss:$12 sps:$4 sm:$0xff]   ;;  %2416 = vmatprep.subr.bf16.mxu0 %v5475_v36  ;;  %v5574_v47 = vcombine.low %v696_v32, %v700_v33  ;;  %v7852_v59 = vld [vmem:[%s7735_s25 + $0x50] ss:$12 sps:$4 sm:$0xff]   ;;  %v7873_v16 = vld [vmem:[%s7735_s25 + $0x68] ss:$12 sps:$4 sm:$0xff]   ;;  %v5489_v27 = vcombine.high %v609_v17, %v613_v18  ;;  %v5488_v32 = vcombine.low %v609_v17, %v613_v18 }
 0x16f   : > { %v704_v43 = vld [vmem:[%s7746_s24 + $0x3c0] sm:$0xff]  ;;  %v650_v33 = vld [vmem:[%s7746_s24 + $0x210] sm:$0xff] }
 0x170   : > { %1945 = vmatpush1.bf16.msra.mxu1 %v5550_v21  ;;  %v708_v44 = vld [vmem:[%s7746_s24 + $0x3e0] sm:$0xff]  ;;  %v5515_v21 = vcombine.high %v634_v12, %v638_v13  ;;  %v7894_v36 = vld [vmem:[%s7735_s25 + $0x80] ss:$12 sps:$4 sm:$0xff]   ;;  %v5530_v51 = vcombine.low %v650_v33, %v654_v34 }
 0x171   : > { %1946 = vmatprep.subr.bf16.mxu1 %v5559_v22  ;;  %v5583_v50 = vcombine.high %v704_v43, %v708_v44  ;;  %2417 = vmatpush1.bf16.msra.mxu0 %v5474_v45  ;;  %v5582_v55 = vcombine.low %v704_v43, %v708_v44  ;;  %v7860_v3 = vld [vmem:[%s7735_s25 + $0x1c] ss:$12 sps:$4 sm:$0xff]   ;;  %v7878_v20 = vld [vmem:[%s7735_s25 + $0x18] ss:$12 sps:$4 sm:$0xff]   ;;  %v5480_v22 = vcombine.low %v601_v7, %v605_v8  ;;  %v7881_v23 = vld [vmem:[%s7735_s25 + $0x34] ss:$12 sps:$4 sm:$0xff]  }
 0x172   : > { %2418 = vmatprep.subr.bf16.mxu0 %v5483_v46  ;;  %v5531_v43 = vcombine.high %v650_v33, %v654_v34  ;;  %v7902_v45 = vld [vmem:[%s7735_s25 + $0x4c] ss:$12 sps:$4 sm:$0xff]   ;;  %v7923_v4 = vld [vmem:[%s7735_s25 + $0x64] ss:$12 sps:$4 sm:$0xff]  }
 0x173   : > { %2088 = vmatmul.mubr.bf16.gmra.mrb[4].mxu0 %v7825_v24  ;;  %v658_v46 = vld [vmem:[%s7746_s24 + $0x250] sm:$0xff]  ;;  %v649_v8 = vld [vmem:[%s7746_s24 + $0x208] sm:$0xff] }
 0x174   : > { %2097 = vmatprep.mubr.bf16.mxu0 %v7261_v0  ;;  %1947 = vmatpush1.bf16.msra.mxu1 %v5558_v26  ;;  %v646_v26 = vld [vmem:[%s7746_s24 + $0x1f0] sm:$0xff]  ;;  %v7936_v18 = vld [vmem:[%s7735_s25 + $0xb0] ss:$12 sps:$4 sm:$0xff]  }
 0x175   : > { %1948 = vmatprep.subr.bf16.mxu1 %v5567_v29  ;;  %2419 = vmatpush1.bf16.msra.mxu0 %v5482_v53  ;;  %v621_v29 = vld [vmem:[%s7746_s24 + $0x128] sm:$0xff]  ;;  %v5523_v31 = vcombine.high %v642_v25, %v646_v26  ;;  %v5522_v39 = vcombine.low %v642_v25, %v646_v26  ;;  %v682_v13 = vld [vmem:[%s7746_s24 + $0x310] sm:$0xff] }
 0x176   : > { %2420 = vmatprep.subr.bf16.mxu0 %v5491_v54  ;;  %v5497_v35 = vcombine.high %v617_v28, %v621_v29  ;;  %v5496_v44 = vcombine.low %v617_v28, %v621_v29  ;;  %v666_v54 = vld [vmem:[%s7746_s24 + $0x290] sm:$0xff]  ;;  %v669_v33 = vld [vmem:[%s7746_s24 + $0x2a8] sm:$0xff] }
 0x177   : > { %v7915_v57 = vld [vmem:[%s7735_s25 + $0x98] ss:$12 sps:$4 sm:$0xff]   ;;  %v7941_v25 = vld [vmem:[%s7735_s25 + $0x60] ss:$12 sps:$4 sm:$0xff]   ;;  %v7944_v28 = vld [vmem:[%s7735_s25 + $0x7c] ss:$12 sps:$4 sm:$0xff]  }
 0x178   : > { %1949 = vmatpush1.bf16.msra.mxu1 %v5566_v37  ;;  %v625_v37 = vld [vmem:[%s7746_s24 + $0x148] sm:$0xff]  ;;  %v690_v29 = vld [vmem:[%s7746_s24 + $0x350] sm:$0xff] }
 0x179   : > { %1950 = vmatprep.subr.bf16.mxu1 %v5575_v41  ;;  %2421 = vmatpush1.bf16.msra.mxu0 %v5490_v62  ;;  %v7899_v41 = vld [vmem:[%s7735_s25 + $0x30] ss:$12 sps:$4 sm:$0xff]   ;;  %v5505_v48 = vcombine.high %v625_v37, %v629_v38  ;;  %v5504_v53 = vcombine.low %v625_v37, %v629_v38  ;;  %v7920_v62 = vld [vmem:[%s7735_s25 + $0x48] ss:$12 sps:$4 sm:$0xff]  }
 0x17a   : > { %2422 = vmatprep.subr.bf16.mxu0 %v5499_v1  ;;  %v698_v38 = vld [vmem:[%s7746_s24 + $0x390] sm:$0xff] }
 0x17b   : > { %2098 = vmatmul.mubr.bf16.gmra.mrb[8].mxu0 %v7839_v42 }
 0x17c   : > { %2107 = vmatprep.mubr.bf16.mxu0 %v7261_v0  ;;  %1951 = vmatpush1.bf16.msra.mxu1 %v5574_v47  ;;  %v662_v47 = vld [vmem:[%s7746_s24 + $0x270] sm:$0xff] }
 0x17d   : > { %1952 = vmatprep.subr.bf16.mxu1 %v5583_v50  ;;  %2423 = vmatpush1.bf16.msra.mxu0 %v5498_v9  ;;  %v637_v50 = vld [vmem:[%s7746_s24 + $0x1a8] sm:$0xff]  ;;  %v5539_v52 = vcombine.high %v658_v46, %v662_v47  ;;  %v5538_v61 = vcombine.low %v658_v46, %v662_v47 }
 0x17e   : > { %2424 = vmatprep.subr.bf16.mxu0 %v5507_v10  ;;  %v5513_v56 = vcombine.high %v633_v49, %v637_v50  ;;  %v653_v9 = vld [vmem:[%s7746_s24 + $0x228] sm:$0xff] }
 0x17f   : > { %v5529_v17 = vcombine.high %v649_v8, %v653_v9  ;;  %v673_v46 = vld [vmem:[%s7746_s24 + $0x2c8] sm:$0xff] }
 0x180   : > { %1953 = vmatpush1.bf16.msra.mxu1 %v5582_v55  ;;  %v670_v55 = vld [vmem:[%s7746_s24 + $0x2b0] sm:$0xff]  ;;  %v677_v47 = vld [vmem:[%s7746_s24 + $0x2e8] sm:$0xff] }
 0x181   : > { %2168 = vmatprep.subr.bf16.mxu1 %v5465_v58  ;;  %2425 = vmatpush1.bf16.msra.mxu0 %v5506_v19  ;;  %v641_v58 = vld [vmem:[%s7746_s24 + $0x1c8] sm:$0xff]  ;;  %v5547_v1 = vcombine.high %v666_v54, %v670_v55  ;;  %v5546_v10 = vcombine.low %v666_v54, %v670_v55  ;;  %v710_v54 = vld [vmem:[%s7746_s24 + $0x3f0] sm:$0xff]  ;;  %v5553_v55 = vcombine.high %v673_v46, %v677_v47 }
 0x182   : > { %2426 = vmatprep.subr.bf16.mxu0 %v5515_v21  ;;  %v5521_v7 = vcombine.high %v641_v58, %v645_v60  ;;  %v5520_v12 = vcombine.low %v641_v58, %v645_v60  ;;  %v657_v19 = vld [vmem:[%s7746_s24 + $0x248] sm:$0xff] }
 0x183   : > { %2108 = vmatmul.mubr.bf16.gmra.mrb[12].mxu0 %v7852_v59  ;;  %1955 = vmatmul.mubr.bf16.vlgmr.msra.gmra.mrb[0].mxu1 %v7857_v63  ;;  %v661_v21 = vld [vmem:[%s7746_s24 + $0x268] sm:$0xff] }
 0x184   : > { %2117 = vmatprep.mubr.bf16.mxu0 %v7261_v0  ;;  %2169 = vmatpush1.bf16.msra.mxu1 %v5464_v2  ;;  %v5512_v2 = vcombine.low %v633_v49, %v637_v50  ;;  %v5536_v37 = vcombine.low %v657_v19, %v661_v21  ;;  %v7962_v49 = vld [vmem:[%s7735_s25 + $0x78] ss:$12 sps:$4 sm:$0xff]  }
 0x185   : > { %1964 = vmatprep.mubr.bf16.mxu1 %v7860_v3  ;;  %2170 = vmatprep.subr.bf16.mxu1 %v5473_v6  ;;  %v678_v6 = vld [vmem:[%s7746_s24 + $0x2f0] sm:$0xff]  ;;  %v685_v58 = vld [vmem:[%s7746_s24 + $0x328] sm:$0xff] }
 0x186   : > { %2427 = vmatpush1.bf16.msra.mxu0 %v5514_v30  ;;  %v694_v30 = vld [vmem:[%s7746_s24 + $0x370] sm:$0xff] }
 0x187   : > { %2428 = vmatprep.subr.bf16.mxu0 %v5523_v31  ;;  %v5537_v31 = vcombine.high %v657_v19, %v661_v21  ;;  %v718_v19 = vld [vmem:[%s7746_s24 + $0x430] sm:$0xff] }
 0x188   : > { %2171 = vmatpush1.bf16.msra.mxu1 %v5472_v11  ;;  %v5555_v11 = vcombine.high %v674_v5, %v678_v6 }
 0x189   : > { %2172 = vmatprep.subr.bf16.mxu1 %v5481_v15  ;;  %v686_v15 = vld [vmem:[%s7746_s24 + $0x330] sm:$0xff] }
 0x18a   : > { %2429 = vmatpush1.bf16.msra.mxu0 %v5522_v39  ;;  %v5563_v26 = vcombine.high %v682_v13, %v686_v15  ;;  %v5562_v34 = vcombine.low %v682_v13, %v686_v15  ;;  %v702_v39 = vld [vmem:[%s7746_s24 + $0x3b0] sm:$0xff]  ;;  %v701_v13 = vld [vmem:[%s7746_s24 + $0x3a8] sm:$0xff] }
 0x18b   : > { %2118 = vmatmul.mubr.bf16.gmra.mrb[16].mxu0 %v7873_v16  ;;  %1965 = vmatmul.mubr.bf16.gmra.mrb[4].mxu1 %v7878_v20  ;;  %v5579_v50 = vcombine.high %v698_v38, %v702_v39  ;;  %v5578_v60 = vcombine.low %v698_v38, %v702_v39  ;;  %v717_v38 = vld [vmem:[%s7746_s24 + $0x428] sm:$0xff] }
 0x18c   : > { %2127 = vmatprep.mubr.bf16.mxu0 %v7261_v0  ;;  %2173 = vmatpush1.bf16.msra.mxu1 %v5480_v22  ;;  %v5554_v22 = vcombine.low %v674_v5, %v678_v6  ;;  %v689_v5 = vld [vmem:[%s7746_s24 + $0x348] sm:$0xff] }
 0x18d   : > { %1974 = vmatprep.mubr.bf16.mxu1 %v7881_v23  ;;  %2174 = vmatprep.subr.bf16.mxu1 %v5489_v27  ;;  %v5528_v27 = vcombine.low %v649_v8, %v653_v9  ;;  %v693_v6 = vld [vmem:[%s7746_s24 + $0x368] sm:$0xff] }
 0x18e   : > { %2430 = vmatprep.subr.bf16.mxu0 %v5531_v43  ;;  %v7978_v8 = vld [vmem:[%s7735_s25 + $0x90] ss:$12 sps:$4 sm:$0xff]   ;;  %v5568_v15 = vcombine.low %v689_v5, %v693_v6 }
 0x18f   : > { %2431 = vmatpush1.bf16.msra.mxu0 %v5530_v51 }
 0x190   : > { %2175 = vmatpush1.bf16.msra.mxu1 %v5488_v32  ;;  %2432 = vmatprep.subr.bf16.mxu0 %v5539_v52  ;;  %v665_v32 = vld [vmem:[%s7746_s24 + $0x288] sm:$0xff] }
 0x191   : > { %2176 = vmatprep.subr.bf16.mxu1 %v5497_v35  ;;  %v5571_v35 = vcombine.high %v690_v29, %v694_v30  ;;  %v5545_v43 = vcombine.high %v665_v32, %v669_v33  ;;  %v5544_v51 = vcombine.low %v665_v32, %v669_v33  ;;  %v7965_v52 = vld [vmem:[%s7735_s25 + $0x94] ss:$12 sps:$4 sm:$0xff]  }
 0x193   : > { %2128 = vmatmul.mubr.bf16.gmra.mrb[20].mxu0 %v7894_v36  ;;  %1975 = vmatmul.mubr.bf16.gmra.mrb[8].mxu1 %v7899_v41 }
 0x194   : > { %2137 = vmatprep.mubr.bf16.mxu0 %v7261_v0  ;;  %2177 = vmatpush1.bf16.msra.mxu1 %v5496_v44  ;;  %v7957_v44 = vld [vmem:[%s7735_s25 + $0xc8] ss:$12 sps:$4 sm:$0xff]  }
 0x195   : > { %1984 = vmatprep.mubr.bf16.mxu1 %v7902_v45  ;;  %2178 = vmatprep.subr.bf16.mxu1 %v5505_v48  ;;  %v5570_v48 = vcombine.low %v690_v29, %v694_v30  ;;  %v7994_v30 = vld [vmem:[%s7735_s25 + $0xa8] ss:$12 sps:$4 sm:$0xff]  }
 0x196   : > { %2433 = vmatpush1.bf16.msra.mxu0 %v5538_v61 }
 0x197   : > { %2434 = vmatprep.subr.bf16.mxu0 %v5547_v1  ;;  %v5552_v1 = vcombine.low %v673_v46, %v677_v47  ;;  %v730_v47 = vld [vmem:[%s7746_s24 + $0x490] sm:$0xff] }
 0x198   : > { %2179 = vmatpush1.bf16.msra.mxu1 %v5504_v53  ;;  %v706_v53 = vld [vmem:[%s7746_s24 + $0x3d0] sm:$0xff] }
 0x199   : > { %2180 = vmatprep.subr.bf16.mxu1 %v5513_v56  ;;  %v681_v56 = vld [vmem:[%s7746_s24 + $0x308] sm:$0xff]  ;;  %v5587_v61 = vcombine.high %v706_v53, %v710_v54 }
 0x19a   : > { %2435 = vmatpush1.bf16.msra.mxu0 %v5546_v10  ;;  %v5560_v9 = vcombine.low %v681_v56, %v685_v58  ;;  %v7981_v10 = vld [vmem:[%s7735_s25 + $0xac] ss:$12 sps:$4 sm:$0xff]  }
 0x19b   : > { %2138 = vmatmul.mubr.bf16.gmra.mrb[24].mxu0 %v7915_v57  ;;  %1985 = vmatmul.mubr.bf16.gmra.mrb[12].mxu1 %v7920_v62 }
 0x19c   : > { %2147 = vmatprep.mubr.bf16.mxu0 %v7261_v0  ;;  %2181 = vmatpush1.bf16.msra.mxu1 %v5512_v2  ;;  %v5561_v2 = vcombine.high %v681_v56, %v685_v58  ;;  %v742_v56 = vld [vmem:[%s7746_s24 + $0x4f0] sm:$0xff] }
 0x19d   : > { %1994 = vmatprep.mubr.bf16.mxu1 %v7923_v4  ;;  %2182 = vmatprep.subr.bf16.mxu1 %v5521_v7  ;;  %v5586_v7 = vcombine.low %v706_v53, %v710_v54  ;;  %v8010_v53 = vld [vmem:[%s7735_s25 + $0xc0] ss:$12 sps:$4 sm:$0xff]  }
 0x19e   : > { %2436 = vmatprep.subr.bf16.mxu0 %v5555_v11  ;;  %v5569_v11 = vcombine.high %v689_v5, %v693_v6  ;;  %v721_v5 = vld [vmem:[%s7746_s24 + $0x448] sm:$0xff] }
 0x19f   : > { %2437 = vmatpush1.bf16.msra.mxu0 %v5554_v22  ;;  %v725_v6 = vld [vmem:[%s7746_s24 + $0x468] sm:$0xff] }
 0x1a0   : > { %2183 = vmatpush1.bf16.msra.mxu1 %v5520_v12  ;;  %2438 = vmatprep.subr.bf16.mxu0 %v5563_v26  ;;  %v697_v12 = vld [vmem:[%s7746_s24 + $0x388] sm:$0xff] }
 0x1a1   : > { %2184 = vmatprep.subr.bf16.mxu1 %v5529_v17  ;;  %v714_v17 = vld [vmem:[%s7746_s24 + $0x410] sm:$0xff]  ;;  %v5577_v21 = vcombine.high %v697_v12, %v701_v13  ;;  %v705_v26 = vld [vmem:[%s7746_s24 + $0x3c8] sm:$0xff]  ;;  %v5576_v32 = vcombine.low %v697_v12, %v701_v13 }
 0x1a2   : > { %v5594_v22 = vcombine.low %v714_v17, %v718_v19  ;;  %v5595_v29 = vcombine.high %v714_v17, %v718_v19  ;;  %v754_v12 = vld [vmem:[%s7746_s24 + $0x550] sm:$0xff] }
 0x1a3   : > { %2148 = vmatmul.mubr.bf16.gmra.mrb[28].mxu0 %v7936_v18  ;;  %1995 = vmatmul.mubr.bf16.gmra.mrb[16].mxu1 %v7941_v25  ;;  %v758_v13 = vld [vmem:[%s7746_s24 + $0x570] sm:$0xff] }
 0x1a4   : > { %2157 = vmatprep.mubr.bf16.mxu0 %v7261_v0  ;;  %2185 = vmatpush1.bf16.msra.mxu1 %v5528_v27  ;;  %v709_v27 = vld [vmem:[%s7746_s24 + $0x3e8] sm:$0xff]  ;;  %v5635_v17 = vcombine.high %v754_v12, %v758_v13  ;;  %v5634_v19 = vcombine.low %v754_v12, %v758_v13  ;;  %v627_v13 = vld [vmem:[%s7746_s24 + $0x158] sm:$0xff] }
 0x1a5   : > { %2004 = vmatprep.mubr.bf16.mxu1 %v7944_v28  ;;  %2186 = vmatprep.subr.bf16.mxu1 %v5537_v31  ;;  %v7997_v31 = vld [vmem:[%s7735_s25 + $0xc4] ss:$12 sps:$4 sm:$0xff]   ;;  %v5585_v33 = vcombine.high %v705_v26, %v709_v27  ;;  %v5584_v46 = vcombine.low %v705_v26, %v709_v27 }
 0x1a6   : > { %2439 = vmatpush1.bf16.msra.mxu0 %v5562_v34  ;;  %v722_v34 = vld [vmem:[%s7746_s24 + $0x450] sm:$0xff] }
 0x1a7   : > { %2440 = vmatprep.subr.bf16.mxu0 %v5571_v35  ;;  %v726_v35 = vld [vmem:[%s7746_s24 + $0x470] sm:$0xff] }
 0x1a8   : > { %2187 = vmatpush1.bf16.msra.mxu1 %v5536_v37  ;;  %v713_v37 = vld [vmem:[%s7746_s24 + $0x408] sm:$0xff]  ;;  %v5603_v39 = vcombine.high %v722_v34, %v726_v35  ;;  %v766_v26 = vld [vmem:[%s7746_s24 + $0x5b0] sm:$0xff] }
 0x1a9   : > { %2188 = vmatprep.subr.bf16.mxu1 %v5545_v43  ;;  %v5602_v43 = vcombine.low %v722_v34, %v726_v35  ;;  %v770_v35 = vld [vmem:[%s7746_s24 + $0x5d0] sm:$0xff] }
 0x1aa   : > { %2441 = vmatpush1.bf16.msra.mxu0 %v5570_v48  ;;  %v734_v48 = vld [vmem:[%s7746_s24 + $0x4b0] sm:$0xff] }
 0x1ab   : > { %2158 = vmatmul.mubr.bf16.gmra.mrb[32].mxu0 %v7957_v44  ;;  %2005 = vmatmul.mubr.bf16.gmra.mrb[20].mxu1 %v7962_v49  ;;  %v5610_v54 = vcombine.low %v730_v47, %v734_v48 }
 0x1ac   : > { %2446 = vmatprep.mubr.bf16.mxu0 %v7795_v40  ;;  %2442 = vmatprep.subr.bf16.mxu0 %v5579_v50  ;;  %v5593_v50 = vcombine.high %v713_v37, %v717_v38 }
 0x1ad   : > { %2189 = vmatpush1.bf16.msra.mxu1 %v5544_v51  ;;  %2014 = vmatprep.mubr.bf16.mxu1 %v7965_v52  ;;  %v5611_v51 = vcombine.high %v730_v47, %v734_v48 }
 0x1ae   : > { %2190 = vmatprep.subr.bf16.mxu1 %v5553_v55  ;;  %2443 = vmatpush1.bf16.msra.mxu0 %v5578_v60  ;;  %v738_v55 = vld [vmem:[%s7746_s24 + $0x4d0] sm:$0xff] }
 0x1af   : > { %2444 = vmatprep.subr.bf16.mxu0 %v5587_v61  ;;  %v5619_v58 = vcombine.high %v738_v55, %v742_v56  ;;  %v5618_v60 = vcombine.low %v738_v55, %v742_v56  ;;  %v746_v61 = vld [vmem:[%s7746_s24 + $0x510] sm:$0xff]  ;;  %v765_v55 = vld [vmem:[%s7746_s24 + $0x5a8] sm:$0xff] }
 0x1b1   : > { %2191 = vmatpush1.bf16.msra.mxu1 %v5552_v1  ;;  %v750_v1 = vld [vmem:[%s7746_s24 + $0x530] sm:$0xff] }
 0x1b2   : > { %2192 = vmatprep.subr.bf16.mxu1 %v5561_v2  ;;  %2445 = vmatpush1.bf16.msra.mxu0 %v5586_v7  ;;  %v5627_v2 = vcombine.high %v746_v61, %v750_v1  ;;  %v5626_v7 = vcombine.low %v746_v61, %v750_v1  ;;  %v773_v61 = vld [vmem:[%s7746_s24 + $0x5e8] sm:$0xff] }
 0x1b3   : > { %2015 = vmatmul.mubr.bf16.gmra.mrb[24].mxu1 %v7978_v8  ;;  %2537 = vmatprep.subr.bf16.mxu0 %v5595_v29 }
 0x1b4   : > { %2024 = vmatprep.mubr.bf16.mxu1 %v7981_v10 }
 0x1b5   : > { %2193 = vmatpush1.bf16.msra.mxu1 %v5560_v9  ;;  %2447 = vmatmul.mubr.bf16.vlgmr.msra.gmra.mrb[36].mxu0 %v7857_v63  ;;  %v5592_v9 = vcombine.low %v713_v37, %v717_v38  ;;  %v774_v37 = vld [vmem:[%s7746_s24 + $0x5f0] sm:$0xff]  ;;  %v745_v38 = vld [vmem:[%s7746_s24 + $0x508] sm:$0xff] }
 0x1b6   : > { %2194 = vmatprep.subr.bf16.mxu1 %v5569_v11  ;;  %2456 = vmatprep.mubr.bf16.mxu0 %v7860_v3  ;;  %v5601_v11 = vcombine.high %v721_v5, %v725_v6 }
 0x1b7   : > { %2538 = vmatpush1.bf16.msra.mxu0 %v5594_v22  ;;  %v5600_v22 = vcombine.low %v721_v5, %v725_v6  ;;  %v587_v5 = vld [vmem:[%s7746_s24 + $0x18] sm:$0xff] }
 0x1b8   : > { %2539 = vmatprep.subr.bf16.mxu0 %v5603_v39  ;;  %v749_v39 = vld [vmem:[%s7746_s24 + $0x528] sm:$0xff]  ;;  %v591_v6 = vld [vmem:[%s7746_s24 + $0x38] sm:$0xff] }
 0x1b9   : > { %2195 = vmatpush1.bf16.msra.mxu1 %v5568_v15  ;;  %v733_v15 = vld [vmem:[%s7746_s24 + $0x4a8] sm:$0xff]  ;;  %v5625_v48 = vcombine.high %v745_v38, %v749_v39 }
 0x1ba   : > { %2196 = vmatprep.subr.bf16.mxu1 %v5577_v21  ;;  %v762_v21 = vld [vmem:[%s7746_s24 + $0x590] sm:$0xff] }
 0x1bb   : > { %2025 = vmatmul.mubr.bf16.gmra.mrb[28].mxu1 %v7994_v30  ;;  %2540 = vmatpush1.bf16.msra.mxu0 %v5602_v43  ;;  %v5643_v29 = vcombine.high %v762_v21, %v766_v26  ;;  %v5651_v43 = vcombine.high %v770_v35, %v774_v37 }
 0x1bc   : > { %2034 = vmatprep.mubr.bf16.mxu1 %v7997_v31  ;;  %2541 = vmatprep.subr.bf16.mxu0 %v5611_v51  ;;  %v757_v51 = vld [vmem:[%s7746_s24 + $0x568] sm:$0xff] }
 0x1bd   : > { %2197 = vmatpush1.bf16.msra.mxu1 %v5576_v32  ;;  %2457 = vmatmul.mubr.bf16.gmra.mrb[40].mxu0 %v7878_v20  ;;  %v737_v32 = vld [vmem:[%s7746_s24 + $0x4c8] sm:$0xff] }
 0x1be   : > { %2198 = vmatprep.subr.bf16.mxu1 %v5585_v33  ;;  %2466 = vmatprep.mubr.bf16.mxu0 %v7881_v23  ;;  %v741_v33 = vld [vmem:[%s7746_s24 + $0x4e8] sm:$0xff] }
 0x1bf   : > { %2542 = vmatpush1.bf16.msra.mxu0 %v5610_v54  ;;  %v5617_v34 = vcombine.high %v737_v32, %v741_v33  ;;  %v5616_v47 = vcombine.low %v737_v32, %v741_v33  ;;  %v651_v33 = vld [vmem:[%s7746_s24 + $0x218] sm:$0xff] }
 0x1c0   : > { %2543 = vmatprep.subr.bf16.mxu0 %v5619_v58 }
 0x1c1   : > { %2199 = vmatpush1.bf16.msra.mxu1 %v5584_v46  ;;  %v5650_v46 = vcombine.low %v770_v35, %v774_v37  ;;  %v663_v35 = vld [vmem:[%s7746_s24 + $0x278] sm:$0xff] }
 0x1c2   : > { %2291 = vmatprep.subr.bf16.mxu1 %v5593_v50  ;;  %v753_v50 = vld [vmem:[%s7746_s24 + $0x548] sm:$0xff] }
 0x1c3   : > { %2035 = vmatmul.mubr.bf16.gmra.mrb[32].mxu1 %v8010_v53  ;;  %2544 = vmatpush1.bf16.msra.mxu0 %v5618_v60  ;;  %v5633_v54 = vcombine.high %v753_v50, %v757_v51  ;;  %v5632_v56 = vcombine.low %v753_v50, %v757_v51  ;;  %v769_v60 = vld [vmem:[%s7746_s24 + $0x5c8] sm:$0xff] }
 0x1c4   : > { %2200 = vmatprep.mubr.bf16.mxu1 %v7795_v40  ;;  %2545 = vmatprep.subr.bf16.mxu0 %v5627_v2  ;;  %v729_v40 = vld [vmem:[%s7746_s24 + $0x488] sm:$0xff]  ;;  %v5649_v2 = vcombine.high %v769_v60, %v773_v61 }
 0x1c5   : > { %2467 = vmatmul.mubr.bf16.gmra.mrb[44].mxu0 %v7899_v41  ;;  %v5609_v27 = vcombine.high %v729_v40, %v733_v15 }
 0x1c6   : > { %2476 = vmatprep.mubr.bf16.mxu0 %v7902_v45 }
 0x1c7   : > { %2546 = vmatpush1.bf16.msra.mxu0 %v5626_v7 }
 0x1c8   : > { %2547 = vmatprep.subr.bf16.mxu0 %v5635_v17 }
 0x1cb   : > { %2201 = vmatmul.mubr.bf16.vlgmr.msra.gmra.mrb[36].mxu1 %v7857_v63  ;;  %2548 = vmatpush1.bf16.msra.mxu0 %v5634_v19  ;;  %v5642_v63 = vcombine.low %v762_v21, %v766_v26  ;;  %v635_v19 = vld [vmem:[%s7746_s24 + $0x198] sm:$0xff] }
 0x1cc   : > { %2292 = vmatpush1.bf16.msra.mxu1 %v5592_v9  ;;  %2210 = vmatprep.mubr.bf16.mxu1 %v7860_v3  ;;  %v5608_v3 = vcombine.low %v729_v40, %v733_v15  ;;  %v619_v9 = vld [vmem:[%s7746_s24 + $0x118] sm:$0xff] }
 0x1cd   : > { %2293 = vmatprep.subr.bf16.mxu1 %v5601_v11  ;;  %2477 = vmatmul.mubr.bf16.gmra.mrb[48].mxu0 %v7920_v62  ;;  %v631_v40 = vld [vmem:[%s7746_s24 + $0x178] sm:$0xff] }
 0x1ce   : > { %2486 = vmatprep.mubr.bf16.mxu0 %v7923_v4  ;;  %2549 = vmatprep.subr.bf16.mxu0 %v5643_v29  ;;  %v5509_v17 = vcombine.high %v627_v13, %v631_v40  ;;  %v5508_v21 = vcombine.low %v627_v13, %v631_v40  ;;  %v643_v26 = vld [vmem:[%s7746_s24 + $0x1d8] sm:$0xff]  ;;  %v8165_v40 = vld [vmem:[%s7752_s15] sm:$0xff] }
 0x1cf   : > { %2550 = vmatpush1.bf16.msra.mxu0 %v5642_v63 }
 0x1d0   : > { %2294 = vmatpush1.bf16.msra.mxu1 %v5600_v22  ;;  %2551 = vmatprep.subr.bf16.mxu0 %v5651_v43 }
 0x1d1   : > { %2295 = vmatprep.subr.bf16.mxu1 %v5609_v27  ;;  %v647_v27 = vld [vmem:[%s7746_s24 + $0x1f8] sm:$0xff] }
 0x1d2   : > { %v5525_v32 = vcombine.high %v643_v26, %v647_v27  ;;  %v5524_v63 = vcombine.low %v643_v26, %v647_v27  ;;  %v727_v27 = vld [vmem:[%s7746_s24 + $0x478] sm:$0xff] }
 0x1d3   : > { %2211 = vmatmul.mubr.bf16.gmra.mrb[40].mxu1 %v7878_v20  ;;  %2552 = vmatpush1.bf16.msra.mxu0 %v5650_v46  ;;  %v5624_v20 = vcombine.low %v745_v38, %v749_v39  ;;  %v667_v39 = vld [vmem:[%s7746_s24 + $0x298] sm:$0xff] }
 0x1d4   : > { %2220 = vmatprep.mubr.bf16.mxu1 %v7881_v23  ;;  %2296 = vmatpush1.bf16.msra.mxu1 %v5608_v3  ;;  %v761_v23 = vld [vmem:[%s7746_s24 + $0x588] sm:$0xff] }
 0x1d5   : > { %2297 = vmatprep.subr.bf16.mxu1 %v5617_v34  ;;  %2487 = vmatmul.mubr.bf16.gmra.mrb[52].mxu0 %v7941_v25  ;;  %v5641_v58 = vcombine.high %v761_v23, %v765_v55  ;;  %v5640_v1 = vcombine.low %v761_v23, %v765_v55  ;;  %v659_v34 = vld [vmem:[%s7746_s24 + $0x258] sm:$0xff] }
 0x1d6   : > { %2496 = vmatprep.mubr.bf16.mxu0 %v7944_v28  ;;  %v5541_v38 = vcombine.high %v659_v34, %v663_v35  ;;  %v5540_v43 = vcombine.low %v659_v34, %v663_v35 }
 0x1d8   : > { %2298 = vmatpush1.bf16.msra.mxu1 %v5616_v47  ;;  %v675_v47 = vld [vmem:[%s7746_s24 + $0x2d8] sm:$0xff] }
 0x1d9   : > { %2299 = vmatprep.subr.bf16.mxu1 %v5625_v48  ;;  %v679_v48 = vld [vmem:[%s7746_s24 + $0x2f8] sm:$0xff] }
 0x1da   : > { %v5557_v51 = vcombine.high %v675_v47, %v679_v48 }
 0x1db   : > { %2221 = vmatmul.mubr.bf16.gmra.mrb[44].mxu1 %v7899_v41  ;;  %v5648_v41 = vcombine.low %v769_v60, %v773_v61  ;;  %v695_v60 = vld [vmem:[%s7746_s24 + $0x378] sm:$0xff] }
 0x1dc   : > { %2230 = vmatprep.mubr.bf16.mxu1 %v7902_v45  ;;  %2300 = vmatpush1.bf16.msra.mxu1 %v5624_v20  ;;  %v5469_v45 = vcombine.high %v587_v5, %v591_v6  ;;  %v683_v20 = vld [vmem:[%s7746_s24 + $0x318] sm:$0xff] }
 0x1dd   : > { %2301 = vmatprep.subr.bf16.mxu1 %v5633_v54  ;;  %2497 = vmatmul.mubr.bf16.gmra.mrb[56].mxu0 %v7962_v49  ;;  %v5556_v54 = vcombine.low %v675_v47, %v679_v48  ;;  %v735_v47 = vld [vmem:[%s7746_s24 + $0x4b8] sm:$0xff] }
 0x1de   : > { %2506 = vmatprep.mubr.bf16.mxu0 %v7965_v52 }
 0x1e0   : > { %2302 = vmatpush1.bf16.msra.mxu1 %v5632_v56 }
 0x1e1   : > { %2303 = vmatprep.subr.bf16.mxu1 %v5641_v58  ;;  %v691_v58 = vld [vmem:[%s7746_s24 + $0x358] sm:$0xff] }
 0x1e3   : > { %2231 = vmatmul.mubr.bf16.gmra.mrb[48].mxu1 %v7920_v62  ;;  %v595_v62 = vld [vmem:[%s7746_s24 + $0x58] sm:$0xff] }
 0x1e4   : > { %2240 = vmatprep.mubr.bf16.mxu1 %v7923_v4  ;;  %2304 = vmatpush1.bf16.msra.mxu1 %v5640_v1  ;;  %v599_v4 = vld [vmem:[%s7746_s24 + $0x78] sm:$0xff] }
 0x1e5   : > { %2305 = vmatprep.subr.bf16.mxu1 %v5649_v2  ;;  %2507 = vmatmul.mubr.bf16.gmra.mrb[60].mxu0 %v7978_v8  ;;  %v5573_v2 = vcombine.high %v691_v58, %v695_v60 }
 0x1e6   : > { %2516 = vmatprep.mubr.bf16.mxu0 %v7981_v10 }
 0x1e8   : > { %2306 = vmatpush1.bf16.msra.mxu1 %v5648_v41  ;;  %v5572_v41 = vcombine.low %v691_v58, %v695_v60 }
 0x1e9   : > { %2660 = vmatprep.subr.bf16.mxu1 %v5469_v45 }
 0x1eb   : > { %2241 = vmatmul.mubr.bf16.gmra.mrb[52].mxu1 %v7941_v25  ;;  %v5468_v25 = vcombine.low %v587_v5, %v591_v6  ;;  %v699_v5 = vld [vmem:[%s7746_s24 + $0x398] sm:$0xff] }
 0x1ec   : > { %2250 = vmatprep.mubr.bf16.mxu1 %v7944_v28  ;;  %v5477_v28 = vcombine.high %v595_v62, %v599_v4  ;;  %v703_v6 = vld [vmem:[%s7746_s24 + $0x3b8] sm:$0xff] }
 0x1ed   : > { %2517 = vmatmul.mubr.bf16.gmra.mrb[64].mxu0 %v7994_v30 }
 0x1ee   : > { %2526 = vmatprep.mubr.bf16.mxu0 %v7997_v31 }
 0x1f3   : > { %2251 = vmatmul.mubr.bf16.gmra.mrb[56].mxu1 %v7962_v49  ;;  %v603_v49 = vld [vmem:[%s7746_s24 + $0x98] sm:$0xff] }
 0x1f4   : > { %2260 = vmatprep.mubr.bf16.mxu1 %v7965_v52  ;;  %v607_v52 = vld [vmem:[%s7746_s24 + $0xb8] sm:$0xff] }
 0x1f5   : > { %2527 = vmatmul.mubr.bf16.gmra.mrb[68].mxu0 %v8010_v53 }
 0x1f6   : > { %2569 = vmatprep.mubr.bf16.mxu0 %v7261_v0 }
 0x1fb   : > { %2261 = vmatmul.mubr.bf16.gmra.mrb[60].mxu1 %v7978_v8  ;;  %v5476_v8 = vcombine.low %v595_v62, %v599_v4  ;;  %v5581_v62 = vcombine.high %v699_v5, %v703_v6 }
 0x1fc   : > { %2270 = vmatprep.mubr.bf16.mxu1 %v7981_v10  ;;  %v5485_v10 = vcombine.high %v603_v49, %v607_v52 }
 0x1fd   : > { %2570 = vmatmul.mubr.bf16.vlgmr.msra.gmra.mrb[36].mxu0 %v7815_v14 }
 0x1fe   : > { %2579 = vmatprep.mubr.bf16.mxu0 %v7261_v0 }
 0x203   : > { %2271 = vmatmul.mubr.bf16.gmra.mrb[64].mxu1 %v7994_v30  ;;  %v611_v30 = vld [vmem:[%s7746_s24 + $0xd8] sm:$0xff] }
 0x204   : > { %2280 = vmatprep.mubr.bf16.mxu1 %v7997_v31  ;;  %v615_v31 = vld [vmem:[%s7746_s24 + $0xf8] sm:$0xff] }
 0x205   : > { %2580 = vmatmul.mubr.bf16.gmra.mrb[40].mxu0 %v7825_v24  ;;  %v5493_v7 = vcombine.high %v611_v30, %v615_v31  ;;  %v5492_v11 = vcombine.low %v611_v30, %v615_v31  ;;  %v715_v30 = vld [vmem:[%s7746_s24 + $0x418] sm:$0xff] }
 0x206   : > { %2589 = vmatprep.mubr.bf16.mxu0 %v7261_v0  ;;  %v719_v31 = vld [vmem:[%s7746_s24 + $0x438] sm:$0xff] }
 0x207   : > { %v5596_v34 = vcombine.low %v715_v30, %v719_v31 }
 0x20b   : > { %2281 = vmatmul.mubr.bf16.gmra.mrb[68].mxu1 %v8010_v53  ;;  %v5484_v53 = vcombine.low %v603_v49, %v607_v52  ;;  %v778_v52 = vlaneseq }
 0x20c   : > { %2323 = vmatprep.mubr.bf16.mxu1 %v7261_v0 }
 0x20d   : > { %2590 = vmatmul.mubr.bf16.gmra.mrb[44].mxu0 %v7839_v42 }
 0x20e   : > { %2599 = vmatprep.mubr.bf16.mxu0 %v7261_v0 }
 0x213   : > { %2324 = vmatmul.mubr.bf16.vlgmr.msra.gmra.mrb[36].mxu1 %v7815_v14  ;;  %v623_v14 = vld [vmem:[%s7746_s24 + $0x138] sm:$0xff] }
 0x214   : > { %2661 = vmatpush1.bf16.msra.mxu1 %v5468_v25  ;;  %2333 = vmatprep.mubr.bf16.mxu1 %v7261_v0  ;;  %v5501_v12 = vcombine.high %v619_v9, %v623_v14  ;;  %v5500_v15 = vcombine.low %v619_v9, %v623_v14  ;;  %v707_v25 = vld [vmem:[%s7746_s24 + $0x3d8] sm:$0xff]  ;;  %v5597_v14 = vcombine.high %v715_v30, %v719_v31 }
 0x215   : > { %2662 = vmatprep.subr.bf16.mxu1 %v5477_v28  ;;  %2600 = vmatmul.mubr.bf16.gmra.mrb[48].mxu0 %v7852_v59  ;;  %v711_v28 = vld [vmem:[%s7746_s24 + $0x3f8] sm:$0xff] }
 0x216   : > { %2609 = vmatprep.mubr.bf16.mxu0 %v7261_v0 }
 0x218   : > { %2663 = vmatpush1.bf16.msra.mxu1 %v5476_v8 }
 0x219   : > { %2664 = vmatprep.subr.bf16.mxu1 %v5485_v10  ;;  %v5589_v10 = vcombine.high %v707_v25, %v711_v28 }
 0x21b   : > { %2334 = vmatmul.mubr.bf16.gmra.mrb[40].mxu1 %v7825_v24  ;;  %v639_v24 = vld [vmem:[%s7746_s24 + $0x1b8] sm:$0xff] }
 0x21c   : > { %2665 = vmatpush1.bf16.msra.mxu1 %v5484_v53  ;;  %2343 = vmatprep.mubr.bf16.mxu1 %v7261_v0  ;;  %v5517_v22 = vcombine.high %v635_v19, %v639_v24  ;;  %v5516_v29 = vcombine.low %v635_v19, %v639_v24  ;;  %v8152_v53 = vshrl.u32 %v778_v52, 7  ;;  %v6577_v24 = vld [vmem:[%s7735_s25 + $0x4] ss:$12 sps:$4 sm:$0xff]  }
 0x21d   : > { %2666 = vmatprep.subr.bf16.mxu1 %v5493_v7  ;;  %2610 = vmatmul.mubr.bf16.gmra.mrb[52].mxu0 %v7873_v16  ;;  %v5588_v7 = vcombine.low %v707_v25, %v711_v28 }
 0x21e   : > { %2619 = vmatprep.mubr.bf16.mxu0 %v7261_v0  ;;  %10777 = vst [vmem:[#allocation41_spill] sm:$0xff] %v8152_v53  ;;  %v10474_v13 = vsub.s32 0, %v8152_v53 }
 0x220   : > { %2667 = vmatpush1.bf16.msra.mxu1 %v5492_v11 }
 0x221   : > { %2668 = vmatprep.subr.bf16.mxu1 %v5501_v12 }
 0x223   : > { %2344 = vmatmul.mubr.bf16.gmra.mrb[44].mxu1 %v7839_v42  ;;  %v655_v42 = vld [vmem:[%s7746_s24 + $0x238] sm:$0xff] }
 0x224   : > { %2669 = vmatpush1.bf16.msra.mxu1 %v5500_v15  ;;  %2353 = vmatprep.mubr.bf16.mxu1 %v7261_v0  ;;  %v5533_v3 = vcombine.high %v651_v33, %v655_v42  ;;  %v5532_v37 = vcombine.low %v651_v33, %v655_v42  ;;  %v10473_v15 = vsub.s32 1, %v8152_v53 }
 0x225   : > { %2670 = vmatprep.subr.bf16.mxu1 %v5509_v17  ;;  %2620 = vmatmul.mubr.bf16.gmra.mrb[56].mxu0 %v7894_v36  ;;  %v8172_v17 = vrot.slane %v8165_v40, %v10474_v13 }
 0x226   : > { %2629 = vmatprep.mubr.bf16.mxu0 %v7261_v0  ;;  %v8178_v19 = vrot.slane %v8165_v40, %v10473_v15 }
 0x228   : > { %2671 = vmatpush1.bf16.msra.mxu1 %v5508_v21 }
 0x229   : > { %2672 = vmatprep.subr.bf16.mxu1 %v5517_v22 }
 0x22b   : > { %2354 = vmatmul.mubr.bf16.gmra.mrb[48].mxu1 %v7852_v59  ;;  %v671_v59 = vld [vmem:[%s7746_s24 + $0x2b8] sm:$0xff] }
 0x22c   : > { %2673 = vmatpush1.bf16.msra.mxu1 %v5516_v29  ;;  %2363 = vmatprep.mubr.bf16.mxu1 %v7261_v0  ;;  %v5549_v46 = vcombine.high %v667_v39, %v671_v59  ;;  %v5548_v50 = vcombine.low %v667_v39, %v671_v59 }
 0x22d   : > { %2674 = vmatprep.subr.bf16.mxu1 %v5525_v32  ;;  %2630 = vmatmul.mubr.bf16.gmra.mrb[60].mxu0 %v7915_v57 }
 0x22e   : > { %2639 = vmatprep.mubr.bf16.mxu0 %v7261_v0 }
 0x230   : > { %2675 = vmatpush1.bf16.msra.mxu1 %v5524_v63 }
 0x231   : > { %2676 = vmatprep.subr.bf16.mxu1 %v5533_v3 }
 0x233   : > { %2364 = vmatmul.mubr.bf16.gmra.mrb[52].mxu1 %v7873_v16  ;;  %v687_v16 = vld [vmem:[%s7746_s24 + $0x338] sm:$0xff] }
 0x234   : > { %2677 = vmatpush1.bf16.msra.mxu1 %v5532_v37  ;;  %2373 = vmatprep.mubr.bf16.mxu1 %v7261_v0  ;;  %v5565_v55 = vcombine.high %v683_v20, %v687_v16  ;;  %v5564_v1 = vcombine.low %v683_v20, %v687_v16 }
 0x235   : > { %2678 = vmatprep.subr.bf16.mxu1 %v5541_v38  ;;  %2640 = vmatmul.mubr.bf16.gmra.mrb[64].mxu0 %v7936_v18 }
 0x236   : > { %2649 = vmatprep.mubr.bf16.mxu0 %v7261_v0 }
 0x238   : > { %2679 = vmatpush1.bf16.msra.mxu1 %v5540_v43 }
 0x239   : > { %2680 = vmatprep.subr.bf16.mxu1 %v5549_v46  ;;  %v731_v46 = vld [vmem:[%s7746_s24 + $0x498] sm:$0xff] }
 0x23a   : > { %v5613_v58 = vcombine.high %v731_v46, %v735_v47  ;;  %v5612_v52 = vcombine.low %v731_v46, %v735_v47  ;;  %v759_v46 = vld [vmem:[%s7746_s24 + $0x578] sm:$0xff] }
 0x23b   : > { %2374 = vmatmul.mubr.bf16.gmra.mrb[56].mxu1 %v7894_v36 }
 0x23c   : > { %2681 = vmatpush1.bf16.msra.mxu1 %v5548_v50  ;;  %2383 = vmatprep.mubr.bf16.mxu1 %v7261_v0 }
 0x23d   : > { %2682 = vmatprep.subr.bf16.mxu1 %v5557_v51  ;;  %2650 = vmatmul.mubr.bf16.gmra.mrb[68].mxu0 %v7957_v44  ;;  %v6578_v51 = vld [vmem:[%s7735_s25] ss:$12 sps:$4 sm:$0xff]  }
 0x23e   : > { %v8124_v23 = vpop.f32.mrb[0].mxu0 }
 0x23f   : > { %v8126_v56 = vpop.f32.mrb[1].mxu0 }
 0x240   : > { %v8131_v61 = vpop.f32.mrb[2].mxu0  ;;  %2683 = vmatpush1.bf16.msra.mxu1 %v5556_v54  ;;  %v6579_v54 = vld [vmem:[%s7735_s25 + $0x1c] ss:$12 sps:$4 sm:$0xff]  }
 0x241   : > { %v8133_v36 = vpop.f32.mrb[3].mxu0  ;;  %2684 = vmatprep.subr.bf16.mxu1 %v5565_v55 }
 0x243   : > { %2384 = vmatmul.mubr.bf16.gmra.mrb[60].mxu1 %v7915_v57  ;;  %v5580_v57 = vcombine.low %v699_v5, %v703_v6 }
 0x244   : > { %2393 = vmatprep.mubr.bf16.mxu1 %v7261_v0  ;;  %2685 = vmatpush1.bf16.msra.mxu1 %v5564_v1  ;;  %v739_v1 = vld [vmem:[%s7746_s24 + $0x4d8] sm:$0xff] }
 0x245   : > { %2686 = vmatprep.subr.bf16.mxu1 %v5573_v2  ;;  %v743_v2 = vld [vmem:[%s7746_s24 + $0x4f8] sm:$0xff] }
 0x246   : > { %v8139_v45 = vpop.f32.mrb[4].mxu0  ;;  %v5621_v31 = vcombine.high %v739_v1, %v743_v2 }
 0x247   : > { %v8141_v4 = vpop.f32.mrb[5].mxu0 }
 0x248   : > { %v8145_v49 = vpop.f32.mrb[6].mxu0  ;;  %2687 = vmatpush1.bf16.msra.mxu1 %v5572_v41 }
 0x249   : > { %v8147_v8 = vpop.f32.mrb[7].mxu0  ;;  %2688 = vmatprep.subr.bf16.mxu1 %v5581_v62 }
 0x24b   : > { %2394 = vmatmul.mubr.bf16.gmra.mrb[64].mxu1 %v7936_v18 }
 0x24c   : > { %2403 = vmatprep.mubr.bf16.mxu1 %v7261_v0  ;;  %2689 = vmatpush1.bf16.msra.mxu1 %v5580_v57 }
 0x24d   : > { %2690 = vmatprep.subr.bf16.mxu1 %v5589_v10 }
 0x24e   : > { %v8155_v9 = vpop.f32.mrb[8].mxu0 }
 0x24f   : > { %v8157_v11 = vpop.f32.mrb[9].mxu0 }
 0x250   : > { %v8159_v12 = vpop.f32.mrb[10].mxu0  ;;  %2691 = vmatpush1.bf16.msra.mxu1 %v5588_v7 }
 0x251   : > { %v8162_v18 = vpop.f32.mrb[11].mxu0  ;;  %2783 = vmatprep.subr.bf16.mxu1 %v5597_v14 }
 0x253   : > { %2404 = vmatmul.mubr.bf16.gmra.mrb[68].mxu1 %v7957_v44  ;;  %v723_v44 = vld [vmem:[%s7746_s24 + $0x458] sm:$0xff] }
 0x254   : > { %2692 = vmatprep.mubr.bf16.mxu1 %v6577_v24  ;;  %v5605_v39 = vcombine.high %v723_v44, %v727_v27  ;;  %v747_v24 = vld [vmem:[%s7746_s24 + $0x518] sm:$0xff] }
 0x256   : > { %v8181_v21 = vpop.f32.mrb[12].mxu0  ;;  %v1956_v26 = vpop.f32.mrb[0].mxu1 }
 0x257   : > { %v8183_v22 = vpop.f32.mrb[13].mxu0  ;;  %v1957_v32 = vadd.f32 %v1956_v26, %v8172_v17  ;;  %v1958_v33 = vpop.f32.mrb[1].mxu1  ;;  %v751_v26 = vld [vmem:[%s7746_s24 + $0x538] sm:$0xff] }
 0x258   : > { %v8187_v29 = vpop.f32.mrb[14].mxu0  ;;  %v1959_v63 = vadd.f32 %v1958_v33, %v8178_v19  ;;  %v1960_v3 = vpop.f32.mrb[2].mxu1 }
 0x259   : > { %v8190_v42 = vpop.f32.mrb[15].mxu0  ;;  %v1961_v35 = vadd.f32 %v1960_v3, %v8172_v17  ;;  %v8195_v37 = vadd.f32 %v8124_v23, %v1957_v32  ;;  %v1962_v38 = vpop.f32.mrb[3].mxu1  ;;  %v5604_v23 = vcombine.low %v723_v44, %v727_v27  ;;  %v6580_v32 = vld [vmem:[%s7735_s25 + $0x18] ss:$12 sps:$4 sm:$0xff]  }
 0x25a   : > { %v1963_v59 = vadd.f32 %v1962_v38, %v8178_v19  ;;  %v8199_v43 = vadd.f32 %v8126_v56, %v1959_v63  ;;  %v6581_v63 = vld [vmem:[%s7735_s25 + $0x34] ss:$12 sps:$4 sm:$0xff]  }
 0x25b   : > { %v10516_v48 = vmax.f32 %v8195_v37, 0.0  ;;  %v8205_v50 = vadd.f32 %v8131_v61, %v1961_v35  ;;  %2693 = vmatmul.mubr.bf16.vlgmr.msra.gmra.mrb[72].mxu1 %v6578_v51 }
 0x25c   : > { %v10520_v20 = vmax.f32 %v8199_v43, 0.0  ;;  %v8210_v16 = vadd.f32 %v8133_v36, %v1963_v59  ;;  %2784 = vmatpush1.bf16.msra.mxu1 %v5596_v34  ;;  %2702 = vmatprep.mubr.bf16.mxu1 %v6579_v54  ;;  %v5629_v34 = vcombine.high %v747_v24, %v751_v26  ;;  %v755_v59 = vld [vmem:[%s7746_s24 + $0x558] sm:$0xff] }
 0x25d   : > { %3050 = vst [vmem:[%s8215_s0] sm:$0xff] %v10516_v48  ;;  %v10515_v56 = vmax.f32 %v8205_v50, 0.0  ;;  %2785 = vmatprep.subr.bf16.mxu1 %v5605_v39 }
 0x25e   : > { %v8213_v55 = vpop.f32.mrb[16].mxu0  ;;  %3051 = vst [vmem:[%s8215_s0 + $0x8] sm:$0xff] %v10520_v20  ;;  %v10519_v61 = vmax.f32 %v8210_v16, 0.0  ;;  %v1966_v36 = vpop.f32.mrb[4].mxu1 }
 0x25f   : > { %v8221_v60 = vpop.f32.mrb[17].mxu0  ;;  %3058 = vst [vmem:[%s8215_s0 + $0x40] sm:$0xff] %v10515_v56  ;;  %v1967_v6 = vadd.f32 %v1966_v36, %v8172_v17  ;;  %v1968_v41 = vpop.f32.mrb[5].mxu1  ;;  %v5628_v36 = vcombine.low %v747_v24, %v751_v26  ;;  %v6583_v26 = vld [vmem:[%s7735_s25 + $0x4c] ss:$12 sps:$4 sm:$0xff]  }
 0x260   : > { %v8229_v5 = vpop.f32.mrb[18].mxu0  ;;  %3059 = vst [vmem:[%s8215_s0 + $0x48] sm:$0xff] %v10519_v61  ;;  %v1969_v25 = vadd.f32 %v1968_v41, %v8178_v19  ;;  %v1970_v28 = vpop.f32.mrb[6].mxu1  ;;  %2786 = vmatpush1.bf16.msra.mxu1 %v5604_v23  ;;  %v5637_v41 = vcombine.high %v755_v59, %v759_v46 }
 0x261   : > { %v8235_v62 = vpop.f32.mrb[19].mxu0  ;;  %v1971_v57 = vadd.f32 %v1970_v28, %v8172_v17  ;;  %v8243_v10 = vadd.f32 %v8139_v45, %v1967_v6  ;;  %v1972_v30 = vpop.f32.mrb[7].mxu1  ;;  %2787 = vmatprep.subr.bf16.mxu1 %v5613_v58 }
 0x262   : > { %v1973_v7 = vadd.f32 %v1972_v30, %v8178_v19  ;;  %v8247_v14 = vadd.f32 %v8141_v4, %v1969_v25  ;;  %v5620_v4 = vcombine.low %v739_v1, %v743_v2 }
 0x263   : > { %v10510_v44 = vmax.f32 %v8243_v10, 0.0  ;;  %v8253_v27 = vadd.f32 %v8145_v49, %v1971_v57  ;;  %2703 = vmatmul.mubr.bf16.gmra.mrb[76].mxu1 %v6580_v32  ;;  %v767_v57 = vld [vmem:[%s7746_s24 + $0x5b8] sm:$0xff]  ;;  %v5636_v32 = vcombine.low %v755_v59, %v759_v46 }
 0x264   : > { %v10514_v45 = vmax.f32 %v8247_v14, 0.0  ;;  %v8258_v33 = vadd.f32 %v8147_v8, %v1973_v7  ;;  %2712 = vmatprep.mubr.bf16.mxu1 %v6581_v63  ;;  %2788 = vmatpush1.bf16.msra.mxu1 %v5612_v52  ;;  %v763_v52 = vld [vmem:[%s7746_s24 + $0x598] sm:$0xff] }
 0x265   : > { %3066 = vst [vmem:[%s8215_s0 + $0x80] sm:$0xff] %v10510_v44  ;;  %v10509_v49 = vmax.f32 %v8253_v27, 0.0  ;;  %2789 = vmatprep.subr.bf16.mxu1 %v5621_v31  ;;  %v6582_v7 = vld [vmem:[%s7735_s25 + $0x30] ss:$12 sps:$4 sm:$0xff]   ;;  %v6603_v44 = vld [vmem:[%s7735_s25 + $0xc8] ss:$12 sps:$4 sm:$0xff]  }
 0x266   : > { %v8261_v3 = vpop.f32.mrb[20].mxu0  ;;  %3067 = vst [vmem:[%s8215_s0 + $0x88] sm:$0xff] %v10514_v45  ;;  %v10512_v8 = vmax.f32 %v8258_v33, 0.0  ;;  %v1976_v38 = vpop.f32.mrb[8].mxu1  ;;  %v775_v59 = vld [vmem:[%s7746_s24 + $0x5f8] sm:$0xff] }
 0x267   : > { %v8267_v35 = vpop.f32.mrb[21].mxu0  ;;  %3074 = vst [vmem:[%s8215_s0 + $0xc0] sm:$0xff] %v10509_v49  ;;  %v1977_v47 = vadd.f32 %v1976_v38, %v8172_v17  ;;  %v1978_v51 = vpop.f32.mrb[9].mxu1 }
 0x268   : > { %v8273_v39 = vpop.f32.mrb[22].mxu0  ;;  %3075 = vst [vmem:[%s8215_s0 + $0xc8] sm:$0xff] %v10512_v8  ;;  %v1979_v23 = vadd.f32 %v1978_v51, %v8178_v19  ;;  %v1980_v58 = vpop.f32.mrb[10].mxu1  ;;  %2790 = vmatpush1.bf16.msra.mxu1 %v5620_v4  ;;  %v5645_v4 = vcombine.high %v763_v52, %v767_v57 }
 0x269   : > { %v8281_v54 = vpop.f32.mrb[23].mxu0  ;;  %v1981_v1 = vadd.f32 %v1980_v58, %v8172_v17  ;;  %v8289_v2 = vadd.f32 %v8155_v9, %v1977_v47  ;;  %v1982_v6 = vpop.f32.mrb[11].mxu1  ;;  %2791 = vmatprep.subr.bf16.mxu1 %v5629_v34  ;;  %v771_v47 = vld [vmem:[%s7746_s24 + $0x5d8] sm:$0xff] }
 0x26a   : > { %v1983_v25 = vadd.f32 %v1982_v6, %v8178_v19  ;;  %v8293_v28 = vadd.f32 %v8157_v11, %v1979_v23 }
 0x26b   : > { %v10502_v30 = vmax.f32 %v8289_v2, 0.0  ;;  %v8299_v31 = vadd.f32 %v8159_v12, %v1981_v1  ;;  %2713 = vmatmul.mubr.bf16.gmra.mrb[80].mxu1 %v6582_v7  ;;  %v5644_v1 = vcombine.low %v763_v52, %v767_v57  ;;  %v5653_v7 = vcombine.high %v771_v47, %v775_v59  ;;  %v6584_v52 = vld [vmem:[%s7735_s25 + $0x48] ss:$12 sps:$4 sm:$0xff]  }
 0x26c   : > { %v10507_v9 = vmax.f32 %v8293_v28, 0.0  ;;  %v8304_v24 = vadd.f32 %v8162_v18, %v1983_v25  ;;  %2722 = vmatprep.mubr.bf16.mxu1 %v6583_v26  ;;  %2792 = vmatpush1.bf16.msra.mxu1 %v5628_v36 }
 0x26d   : > { %3082 = vst [vmem:[%s8215_s0 + $0x100] sm:$0xff] %v10502_v30  ;;  %v10501_v12 = vmax.f32 %v8299_v31, 0.0  ;;  %2793 = vmatprep.subr.bf16.mxu1 %v5637_v41 }
 0x26e   : > { %v8307_v11 = vpop.f32.mrb[24].mxu0  ;;  %3083 = vst [vmem:[%s8215_s0 + $0x108] sm:$0xff] %v10507_v9  ;;  %v10505_v18 = vmax.f32 %v8304_v24, 0.0  ;;  %v1986_v34 = vpop.f32.mrb[12].mxu1 }
 0x26f   : > { %v8313_v63 = vpop.f32.mrb[25].mxu0  ;;  %3090 = vst [vmem:[%s8215_s0 + $0x140] sm:$0xff] %v10501_v12  ;;  %v1987_v46 = vadd.f32 %v1986_v34, %v8172_v17  ;;  %v1988_v51 = vpop.f32.mrb[13].mxu1  ;;  %v6602_v12 = vld [vmem:[%s7735_s25 + $0xb0] ss:$12 sps:$4 sm:$0xff]  }
 0x270   : > { %v8319_v38 = vpop.f32.mrb[26].mxu0  ;;  %3091 = vst [vmem:[%s8215_s0 + $0x148] sm:$0xff] %v10505_v18  ;;  %v1989_v58 = vadd.f32 %v1988_v51, %v8178_v19  ;;  %v1990_v36 = vpop.f32.mrb[14].mxu1  ;;  %2794 = vmatpush1.bf16.msra.mxu1 %v5636_v32 }
 0x271   : > { %v8327_v23 = vpop.f32.mrb[27].mxu0  ;;  %v1991_v6 = vadd.f32 %v1990_v36, %v8172_v17  ;;  %v8335_v41 = vadd.f32 %v8181_v21, %v1987_v46  ;;  %v1992_v25 = vpop.f32.mrb[15].mxu1  ;;  %2795 = vmatprep.subr.bf16.mxu1 %v5645_v4  ;;  %v6585_v4 = vld [vmem:[%s7735_s25 + $0x64] ss:$12 sps:$4 sm:$0xff]  }
 0x272   : > { %v1993_v26 = vadd.f32 %v1992_v25, %v8178_v19  ;;  %v8339_v34 = vadd.f32 %v8183_v22, %v1989_v58  ;;  %v5652_v22 = vcombine.low %v771_v47, %v775_v59 }
 0x273   : > { %v10478_v51 = vmax.f32 %v8335_v41, 0.0  ;;  %v8343_v32 = vadd.f32 %v8187_v29, %v1991_v6  ;;  %2723 = vmatmul.mubr.bf16.gmra.mrb[84].mxu1 %v6584_v52 }
 0x274   : > { %v10481_v21 = vmax.f32 %v8339_v34, 0.0  ;;  %v8348_v57 = vadd.f32 %v8190_v42, %v1993_v26  ;;  %2732 = vmatprep.mubr.bf16.mxu1 %v6585_v4  ;;  %2796 = vmatpush1.bf16.msra.mxu1 %v5644_v1 }
 0x275   : > { %3098 = vst [vmem:[%s8215_s0 + $0x180] sm:$0xff] %v10478_v51  ;;  %v10475_v29 = vmax.f32 %v8343_v32, 0.0  ;;  %2797 = vmatprep.subr.bf16.mxu1 %v5653_v7 }
 0x276   : > { %v8351_v46 = vpop.f32.mrb[28].mxu0  ;;  %3099 = vst [vmem:[%s8215_s0 + $0x188] sm:$0xff] %v10481_v21  ;;  %v10480_v42 = vmax.f32 %v8348_v57, 0.0  ;;  %v1996_v36 = vpop.f32.mrb[16].mxu1 }
 0x277   : > { %v8357_v58 = vpop.f32.mrb[29].mxu0  ;;  %3106 = vst [vmem:[%s8215_s0 + $0x1c0] sm:$0xff] %v10475_v29  ;;  %v1997_v47 = vadd.f32 %v1996_v36, %v8172_v17  ;;  %v1998_v59 = vpop.f32.mrb[17].mxu1  ;;  %v6586_v29 = vld [vmem:[%s7735_s25 + $0x60] ss:$12 sps:$4 sm:$0xff]  }
 0x278   : > { %v8363_v6 = vpop.f32.mrb[30].mxu0  ;;  %3107 = vst [vmem:[%s8215_s0 + $0x1c8] sm:$0xff] %v10480_v42  ;;  %v1999_v25 = vadd.f32 %v1998_v59, %v8178_v19  ;;  %v2000_v7 = vpop.f32.mrb[18].mxu1  ;;  %2798 = vmatpush1.bf16.msra.mxu1 %v5652_v22 }
 0x279   : > { %v8369_v1 = vpop.f32.mrb[31].mxu0  ;;  %v2001_v26 = vadd.f32 %v2000_v7, %v8172_v17  ;;  %v8377_v52 = vadd.f32 %v8213_v55, %v1997_v47  ;;  %v2002_v4 = vpop.f32.mrb[19].mxu1  ;;  %v6587_v47 = vld [vmem:[%s7735_s25 + $0x7c] ss:$12 sps:$4 sm:$0xff]  }
 0x27a   : > { %v2003_v36 = vadd.f32 %v2002_v4, %v8178_v19  ;;  %v8381_v15 = vadd.f32 %v8221_v60, %v1999_v25 }
 0x27b   : > { %v10476_v13 = vmax.f32 %v8377_v52, 0.0  ;;  %v8385_v59 = vadd.f32 %v8229_v5, %v2001_v26  ;;  %2733 = vmatmul.mubr.bf16.gmra.mrb[88].mxu1 %v6586_v29 }
 0x27c   : > { %v10477_v22 = vmax.f32 %v8381_v15, 0.0  ;;  %v8390_v55 = vadd.f32 %v8235_v62, %v2003_v36  ;;  %2742 = vmatprep.mubr.bf16.mxu1 %v6587_v47 }
 0x27d   : > { %3114 = vst [vmem:[%s8215_s0 + $0x200] sm:$0xff] %v10476_v13  ;;  %v10479_v60 = vmax.f32 %v8385_v59, 0.0 }
 0x27e   : > { %v8393_v7 = vpop.f32.mrb[32].mxu0  ;;  %3115 = vst [vmem:[%s8215_s0 + $0x208] sm:$0xff] %v10477_v22  ;;  %v10482_v5 = vmax.f32 %v8390_v55, 0.0  ;;  %v2006_v29 = vpop.f32.mrb[20].mxu1 }
 0x27f   : > { %v8399_v25 = vpop.f32.mrb[33].mxu0  ;;  %3122 = vst [vmem:[%s8215_s0 + $0x240] sm:$0xff] %v10479_v60  ;;  %v2007_v26 = vadd.f32 %v2006_v29, %v8172_v17  ;;  %v2008_v4 = vpop.f32.mrb[21].mxu1 }
 0x280   : > { %v8405_v62 = vpop.f32.mrb[34].mxu0  ;;  %3123 = vst [vmem:[%s8215_s0 + $0x248] sm:$0xff] %v10482_v5  ;;  %v2009_v47 = vadd.f32 %v2008_v4, %v8178_v19  ;;  %v2010_v13 = vpop.f32.mrb[22].mxu1  ;;  %v6588_v4 = vld [vmem:[%s7735_s25 + $0x78] ss:$12 sps:$4 sm:$0xff]  }
 0x281   : > { %v8411_v36 = vpop.f32.mrb[35].mxu0  ;;  %v2011_v22 = vadd.f32 %v2010_v13, %v8172_v17  ;;  %v8419_v51 = vadd.f32 %v8261_v3, %v2007_v26  ;;  %v2012_v60 = vpop.f32.mrb[23].mxu1  ;;  %v6589_v26 = vld [vmem:[%s7735_s25 + $0x94] ss:$12 sps:$4 sm:$0xff]  }
 0x282   : > { %v2013_v29 = vadd.f32 %v2012_v60, %v8178_v19  ;;  %v8423_v42 = vadd.f32 %v8267_v35, %v2009_v47 }
 0x283   : > { %v10483_v21 = vmax.f32 %v8419_v51, 0.0  ;;  %v8427_v5 = vadd.f32 %v8273_v39, %v2011_v22  ;;  %2743 = vmatmul.mubr.bf16.gmra.mrb[92].mxu1 %v6588_v4 }
 0x284   : > { %v10485_v13 = vmax.f32 %v8423_v42, 0.0  ;;  %v8432_v3 = vadd.f32 %v8281_v54, %v2013_v29  ;;  %2752 = vmatprep.mubr.bf16.mxu1 %v6589_v26 }
 0x285   : > { %3130 = vst [vmem:[%s8215_s0 + $0x280] sm:$0xff] %v10483_v21  ;;  %v10484_v35 = vmax.f32 %v8427_v5, 0.0 }
 0x286   : > { %3131 = vst [vmem:[%s8215_s0 + $0x288] sm:$0xff] %v10485_v13  ;;  %v10486_v39 = vmax.f32 %v8432_v3, 0.0  ;;  %v2016_v22 = vpop.f32.mrb[24].mxu1 }
 0x287   : > { %3138 = vst [vmem:[%s8215_s0 + $0x2c0] sm:$0xff] %v10484_v35  ;;  %v2017_v54 = vadd.f32 %v2016_v22, %v8172_v17  ;;  %v2018_v60 = vpop.f32.mrb[25].mxu1 }
 0x288   : > { %3139 = vst [vmem:[%s8215_s0 + $0x2c8] sm:$0xff] %v10486_v39  ;;  %v2019_v47 = vadd.f32 %v2018_v60, %v8178_v19  ;;  %v2020_v29 = vpop.f32.mrb[26].mxu1  ;;  %v6590_v60 = vld [vmem:[%s7735_s25 + $0x90] ss:$12 sps:$4 sm:$0xff]  }
 0x289   : > { %v2021_v4 = vadd.f32 %v2020_v29, %v8172_v17  ;;  %v8453_v26 = vadd.f32 %v8307_v11, %v2017_v54  ;;  %v2022_v21 = vpop.f32.mrb[27].mxu1  ;;  %v6591_v54 = vld [vmem:[%s7735_s25 + $0xac] ss:$12 sps:$4 sm:$0xff]  }
 0x28a   : > { %v2023_v35 = vadd.f32 %v2022_v21, %v8178_v19  ;;  %v8457_v22 = vadd.f32 %v8313_v63, %v2019_v47 }
 0x28b   : > { %v10487_v13 = vmax.f32 %v8453_v26, 0.0  ;;  %v8461_v39 = vadd.f32 %v8319_v38, %v2021_v4  ;;  %2753 = vmatmul.mubr.bf16.gmra.mrb[96].mxu1 %v6590_v60 }
 0x28c   : > { %v10489_v29 = vmax.f32 %v8457_v22, 0.0  ;;  %v8466_v11 = vadd.f32 %v8327_v23, %v2023_v35  ;;  %2762 = vmatprep.mubr.bf16.mxu1 %v6591_v54 }
 0x28d   : > { %3146 = vst [vmem:[%s8215_s0 + $0x300] sm:$0xff] %v10487_v13  ;;  %v10488_v63 = vmax.f32 %v8461_v39, 0.0 }
 0x28e   : > { %3147 = vst [vmem:[%s8215_s0 + $0x308] sm:$0xff] %v10489_v29  ;;  %v10490_v38 = vmax.f32 %v8466_v11, 0.0  ;;  %v2026_v21 = vpop.f32.mrb[28].mxu1 }
 0x28f   : > { %3154 = vst [vmem:[%s8215_s0 + $0x340] sm:$0xff] %v10488_v63  ;;  %v2027_v23 = vadd.f32 %v2026_v21, %v8172_v17  ;;  %v2028_v35 = vpop.f32.mrb[29].mxu1 }
 0x290   : > { %3155 = vst [vmem:[%s8215_s0 + $0x348] sm:$0xff] %v10490_v38  ;;  %v2029_v47 = vadd.f32 %v2028_v35, %v8178_v19  ;;  %v2030_v4 = vpop.f32.mrb[30].mxu1  ;;  %v6592_v35 = vld [vmem:[%s7735_s25 + $0xa8] ss:$12 sps:$4 sm:$0xff]  }
 0x291   : > { %v2031_v60 = vadd.f32 %v2030_v4, %v8172_v17  ;;  %v8487_v54 = vadd.f32 %v8351_v46, %v2027_v23  ;;  %v2032_v13 = vpop.f32.mrb[31].mxu1  ;;  %v6593_v23 = vld [vmem:[%s7735_s25 + $0xc4] ss:$12 sps:$4 sm:$0xff]  }
 0x292   : > { %v2033_v63 = vadd.f32 %v2032_v13, %v8178_v19  ;;  %v8491_v21 = vadd.f32 %v8357_v58, %v2029_v47 }
 0x293   : > { %v10491_v29 = vmax.f32 %v8487_v54, 0.0  ;;  %v8495_v38 = vadd.f32 %v8363_v6, %v2031_v60  ;;  %2763 = vmatmul.mubr.bf16.gmra.mrb[100].mxu1 %v6592_v35 }
 0x294   : > { %v10494_v4 = vmax.f32 %v8491_v21, 0.0  ;;  %v8500_v46 = vadd.f32 %v8369_v1, %v2033_v63  ;;  %2772 = vmatprep.mubr.bf16.mxu1 %v6593_v23 }
 0x295   : > { %3162 = vst [vmem:[%s8215_s0 + $0x380] sm:$0xff] %v10491_v29  ;;  %v10492_v58 = vmax.f32 %v8495_v38, 0.0 }
 0x296   : > { %3163 = vst [vmem:[%s8215_s0 + $0x388] sm:$0xff] %v10494_v4  ;;  %v10493_v6 = vmax.f32 %v8500_v46, 0.0  ;;  %v2036_v13 = vpop.f32.mrb[32].mxu1  ;;  %v6594_v4 = vld [vmem:[%s7735_s25 + $0xc0] ss:$12 sps:$4 sm:$0xff]  }
 0x297   : > { %3170 = vst [vmem:[%s8215_s0 + $0x3c0] sm:$0xff] %v10492_v58  ;;  %v2037_v1 = vadd.f32 %v2036_v13, %v8172_v17  ;;  %v2038_v63 = vpop.f32.mrb[33].mxu1 }
 0x298   : > { %3171 = vst [vmem:[%s8215_s0 + $0x3c8] sm:$0xff] %v10493_v6  ;;  %v2039_v47 = vadd.f32 %v2038_v63, %v8178_v19  ;;  %v2040_v60 = vpop.f32.mrb[34].mxu1 }
 0x299   : > { %v2041_v35 = vadd.f32 %v2040_v60, %v8172_v17  ;;  %v8521_v23 = vadd.f32 %v8393_v7, %v2037_v1  ;;  %v2042_v29 = vpop.f32.mrb[35].mxu1  ;;  %v6599_v1 = vld [vmem:[%s7735_s25 + $0x68] ss:$12 sps:$4 sm:$0xff]   ;;  %v800_v60 = vsub.s32 5, %v8152_v53 }
 0x29a   : > { %v2043_v13 = vadd.f32 %v2042_v29, %v8178_v19  ;;  %v8525_v58 = vadd.f32 %v8399_v25, %v2039_v47  ;;  %v6597_v29 = vld [vmem:[%s7735_s25 + $0x38] ss:$12 sps:$4 sm:$0xff]   ;;  %v796_v47 = vsub.s32 4, %v8152_v53 }
 0x29b   : > { %v10496_v6 = vmax.f32 %v8521_v23, 0.0  ;;  %v8529_v63 = vadd.f32 %v8405_v62, %v2041_v35  ;;  %2773 = vmatmul.mubr.bf16.gmra.mrb[104].mxu1 %v6594_v4  ;;  %v6595_v62 = vld [vmem:[%s7735_s25 + $0x8] ss:$12 sps:$4 sm:$0xff]   ;;  %v6598_v4 = vld [vmem:[%s7735_s25 + $0x50] ss:$12 sps:$4 sm:$0xff]  }
 0x29c   : > { %v10499_v17 = vmax.f32 %v8525_v58, 0.0  ;;  %v8534_v7 = vadd.f32 %v8411_v36, %v2043_v13  ;;  %2815 = vmatprep.mubr.bf16.mxu1 %v7261_v0  ;;  %v6596_v36 = vld [vmem:[%s7735_s25 + $0x20] ss:$12 sps:$4 sm:$0xff]   ;;  %v8566_v13 = vrot.slane %v8165_v40, %v796_v47 }
 0x29d   : > { %3178 = vst [vmem:[%s8215_s0 + $0x400] sm:$0xff] %v10496_v6  ;;  %v10495_v19 = vmax.f32 %v8529_v63, 0.0  ;;  %v6600_v35 = vld [vmem:[%s7735_s25 + $0x80] ss:$12 sps:$4 sm:$0xff]  }
 0x29e   : > { %3179 = vst [vmem:[%s8215_s0 + $0x408] sm:$0xff] %v10499_v17  ;;  %v10497_v25 = vmax.f32 %v8534_v7, 0.0 }
 0x29f   : > { %3186 = vst [vmem:[%s8215_s0 + $0x440] sm:$0xff] %v10495_v19  ;;  %v6601_v19 = vld [vmem:[%s7735_s25 + $0x98] ss:$12 sps:$4 sm:$0xff]   ;;  %s9349_s25 = scalar_lea.vmem [#allocation14], %s6337_s30 }
 0x2a0   : > { %3187 = vst [vmem:[%s8215_s0 + $0x448] sm:$0xff] %v10497_v25 }
 0x2a3   : > { %2816 = vmatmul.mubr.bf16.vlgmr.msra.gmra.mrb[72].mxu1 %v6595_v62  ;;  %v8569_v62 = vrot.slane %v8165_v40, %v800_v60 }
 0x2a4   : > { %2825 = vmatprep.mubr.bf16.mxu1 %v7261_v0 }
 0x2ab   : > { %2826 = vmatmul.mubr.bf16.gmra.mrb[76].mxu1 %v6596_v36 }
 0x2ac   : > { %2835 = vmatprep.mubr.bf16.mxu1 %v7261_v0 }
 0x2b3   : > { %2836 = vmatmul.mubr.bf16.gmra.mrb[80].mxu1 %v6597_v29 }
 0x2b4   : > { %2845 = vmatprep.mubr.bf16.mxu1 %v7261_v0 }
 0x2bb   : > { %2846 = vmatmul.mubr.bf16.gmra.mrb[84].mxu1 %v6598_v4 }
 0x2bc   : > { %2855 = vmatprep.mubr.bf16.mxu1 %v7261_v0 }
 0x2c3   : > { %2856 = vmatmul.mubr.bf16.gmra.mrb[88].mxu1 %v6599_v1 }
 0x2c4   : > { %2865 = vmatprep.mubr.bf16.mxu1 %v7261_v0 }
 0x2cb   : > { %2866 = vmatmul.mubr.bf16.gmra.mrb[92].mxu1 %v6600_v35 }
 0x2cc   : > { %2875 = vmatprep.mubr.bf16.mxu1 %v7261_v0 }
 0x2d0   : > { %v2571_v36 = vpop.f32.mrb[36].mxu0 }
 0x2d1   : > { %v8572_v29 = vadd.f32 %v2571_v36, %v8566_v13  ;;  %v2573_v4 = vpop.f32.mrb[37].mxu0 }
 0x2d2   : > { %v8575_v1 = vadd.f32 %v2573_v4, %v8569_v62  ;;  %v2575_v35 = vpop.f32.mrb[38].mxu0 }
 0x2d3   : > { %10779 = vst [vmem:[#allocation42_spill] sm:$0xff] %v8572_v29  ;;  %2876 = vmatmul.mubr.bf16.gmra.mrb[96].mxu1 %v6601_v19  ;;  %v10498_v47 = vmax.f32 %v8572_v29, 0.0  ;;  %v8580_v6 = vadd.f32 %v2575_v35, %v8566_v13  ;;  %v2577_v60 = vpop.f32.mrb[39].mxu0 }
 0x2d4   : > { %10780 = vst [vmem:[#allocation43_spill] sm:$0xff] %v8575_v1  ;;  %2885 = vmatprep.mubr.bf16.mxu1 %v7261_v0  ;;  %v10500_v36 = vmax.f32 %v8575_v1, 0.0  ;;  %v8585_v25 = vadd.f32 %v2577_v60, %v8569_v62 }
 0x2d5   : > { %10781 = vst [vmem:[#allocation44_spill] sm:$0xff] %v8580_v6  ;;  %3054 = vst [vmem:[%s8215_s0 + $0x20] sm:$0xff] %v10498_v47  ;;  %v10503_v4 = vmax.f32 %v8580_v6, 0.0 }
 0x2d6   : > { %10782 = vst [vmem:[#allocation45_spill] sm:$0xff] %v8585_v25  ;;  %3055 = vst [vmem:[%s8215_s0 + $0x28] sm:$0xff] %v10500_v36  ;;  %v10504_v19 = vmax.f32 %v8585_v25, 0.0 }
 0x2d7   : > { %3062 = vst [vmem:[%s8215_s0 + $0x60] sm:$0xff] %v10503_v4 }
 0x2d8   : > { %3063 = vst [vmem:[%s8215_s0 + $0x68] sm:$0xff] %v10504_v19  ;;  %v2581_v35 = vpop.f32.mrb[40].mxu0 }
 0x2d9   : > { %v8602_v60 = vadd.f32 %v2581_v35, %v8566_v13  ;;  %v2583_v47 = vpop.f32.mrb[41].mxu0 }
 0x2da   : > { %v8605_v17 = vadd.f32 %v2583_v47, %v8569_v62  ;;  %v2585_v36 = vpop.f32.mrb[42].mxu0 }
 0x2db   : > { %10783 = vst [vmem:[#allocation46_spill] sm:$0xff] %v8602_v60  ;;  %2886 = vmatmul.mubr.bf16.gmra.mrb[100].mxu1 %v6602_v12  ;;  %v10506_v30 = vmax.f32 %v8602_v60, 0.0  ;;  %v8610_v4 = vadd.f32 %v2585_v36, %v8566_v13  ;;  %v2587_v19 = vpop.f32.mrb[43].mxu0  ;;  %v788_v36 = vsub.s32 2, %v8152_v53 }
 0x2dc   : > { %10784 = vst [vmem:[#allocation47_spill] sm:$0xff] %v8605_v17  ;;  %2895 = vmatprep.mubr.bf16.mxu1 %v7261_v0  ;;  %v10508_v35 = vmax.f32 %v8605_v17, 0.0  ;;  %v8615_v18 = vadd.f32 %v2587_v19, %v8569_v62  ;;  %v792_v0 = vsub.s32 3, %v8152_v53 }
 0x2dd   : > { %10785 = vst [vmem:[#allocation48_spill] sm:$0xff] %v8610_v4  ;;  %3070 = vst [vmem:[%s8215_s0 + $0xa0] sm:$0xff] %v10506_v30  ;;  %v10511_v47 = vmax.f32 %v8610_v4, 0.0 }
 0x2de   : > { %10786 = vst [vmem:[#allocation49_spill] sm:$0xff] %v8615_v18  ;;  %3071 = vst [vmem:[%s8215_s0 + $0xa8] sm:$0xff] %v10508_v35  ;;  %v10513_v12 = vmax.f32 %v8615_v18, 0.0  ;;  %v8648_v45 = vrot.slane %v8165_v40, %v792_v0 }
 0x2df   : > { %3078 = vst [vmem:[%s8215_s0 + $0xe0] sm:$0xff] %v10511_v47  ;;  %v8641_v47 = vrot.slane %v8165_v40, %v788_v36 }
 0x2e0   : > { %3079 = vst [vmem:[%s8215_s0 + $0xe8] sm:$0xff] %v10513_v12  ;;  %v2591_v19 = vpop.f32.mrb[44].mxu0 }
 0x2e1   : > { %v8634_v30 = vadd.f32 %v2591_v19, %v8566_v13  ;;  %v2593_v9 = vpop.f32.mrb[45].mxu0 }
 0x2e2   : > { %v8637_v35 = vadd.f32 %v2593_v9, %v8569_v62  ;;  %v2595_v49 = vpop.f32.mrb[46].mxu0 }
 0x2e3   : > { %10787 = vst [vmem:[#allocation50_spill] sm:$0xff] %v8634_v30  ;;  %2896 = vmatmul.mubr.bf16.gmra.mrb[104].mxu1 %v6603_v44  ;;  %v10517_v8 = vmax.f32 %v8634_v30, 0.0  ;;  %v8645_v12 = vadd.f32 %v2595_v49, %v8566_v13  ;;  %v2597_v19 = vpop.f32.mrb[47].mxu0 }
 0x2e4   : > { %10788 = vst [vmem:[#allocation51_spill] sm:$0xff] %v8637_v35  ;;  %v10518_v9 = vmax.f32 %v8637_v35, 0.0  ;;  %v8652_v56 = vadd.f32 %v2597_v19, %v8569_v62 }
 0x2e5   : > { %10789 = vst [vmem:[#allocation52_spill] sm:$0xff] %v8645_v12  ;;  %3086 = vst [vmem:[%s8215_s0 + $0x120] sm:$0xff] %v10517_v8  ;;  %v10521_v44 = vmax.f32 %v8645_v12, 0.0 }
 0x2e6   : > { %10790 = vst [vmem:[#allocation53_spill] sm:$0xff] %v8652_v56  ;;  %v2325_v36 = vpop.f32.mrb[36].mxu1  ;;  %3087 = vst [vmem:[%s8215_s0 + $0x128] sm:$0xff] %v10518_v9  ;;  %v10523_v49 = vmax.f32 %v8652_v56, 0.0 }
 0x2e7   : > { %v8663_v48 = vadd.f32 %v2325_v36, %v8641_v47  ;;  %v2327_v40 = vpop.f32.mrb[37].mxu1  ;;  %3094 = vst [vmem:[%s8215_s0 + $0x160] sm:$0xff] %v10521_v44 }
 0x2e8   : > { %v8669_v0 = vadd.f32 %v2327_v40, %v8648_v45  ;;  %v2329_v19 = vpop.f32.mrb[38].mxu1  ;;  %3095 = vst [vmem:[%s8215_s0 + $0x168] sm:$0xff] %v10523_v49  ;;  %v2601_v8 = vpop.f32.mrb[48].mxu0 }
 0x2e9   : > { %10791 = vst [vmem:[#allocation54_spill] sm:$0xff] %v8663_v48  ;;  %v8676_v61 = vadd.f32 %v2329_v19, %v8641_v47  ;;  %v2331_v36 = vpop.f32.mrb[39].mxu1  ;;  %v8679_v20 = vadd.f32 %v2601_v8, %v8566_v13  ;;  %v2603_v44 = vpop.f32.mrb[49].mxu0  ;;  %v10795_v19 = vmax.f32 %v8663_v48, 0.0 }
 0x2ea   : > { %v8683_v12 = vadd.f32 %v2331_v36, %v8648_v45  ;;  %v8686_v49 = vadd.f32 %v2603_v44, %v8569_v62  ;;  %v2605_v9 = vpop.f32.mrb[50].mxu0  ;;  %v10797_v36 = vmax.f32 %v8669_v0, 0.0 }
 0x2eb   : > { %10792 = vst [vmem:[#allocation55_spill] sm:$0xff] %v8676_v61  ;;  %10793 = vst [vmem:[#allocation56_spill] sm:$0xff] %v8679_v20  ;;  %v10530_v30 = vmax.f32 %v8676_v61, 0.0  ;;  %v10529_v8 = vmax.f32 %v8679_v20, 0.0  ;;  %v8694_v56 = vadd.f32 %v2605_v9, %v8566_v13  ;;  %v2607_v40 = vpop.f32.mrb[51].mxu0 }
 0x2ec   : > { %10794 = vst [vmem:[#allocation57_spill] sm:$0xff] %v8686_v49  ;;  %3052 = vst [vmem:[%s8215_s0 + $0x10] sm:$0xff] %v10795_v19  ;;  %v10531_v44 = vmax.f32 %v8683_v12, 0.0  ;;  %v10532_v35 = vmax.f32 %v8686_v49, 0.0  ;;  %v8702_v4 = vadd.f32 %v2607_v40, %v8569_v62 }
 0x2ed   : > { %10796 = vst [vmem:[#allocation58_spill] sm:$0xff] %v8694_v56  ;;  %3053 = vst [vmem:[%s8215_s0 + $0x18] sm:$0xff] %v10797_v36  ;;  %v10535_v9 = vmax.f32 %v8694_v56, 0.0 }
 0x2ee   : > { %10798 = vst [vmem:[#allocation59_spill] sm:$0xff] %v8702_v4  ;;  %3060 = vst [vmem:[%s8215_s0 + $0x50] sm:$0xff] %v10530_v30  ;;  %v2335_v19 = vpop.f32.mrb[40].mxu1  ;;  %v10537_v36 = vmax.f32 %v8702_v4, 0.0 }
 0x2ef   : > { %3102 = vst [vmem:[%s8215_s0 + $0x1a0] sm:$0xff] %v10529_v8  ;;  %3061 = vst [vmem:[%s8215_s0 + $0x58] sm:$0xff] %v10531_v44  ;;  %v8719_v40 = vadd.f32 %v2335_v19, %v8641_v47  ;;  %v2337_v60 = vpop.f32.mrb[41].mxu1 }
 0x2f0   : > { %3103 = vst [vmem:[%s8215_s0 + $0x1a8] sm:$0xff] %v10532_v35  ;;  %3110 = vst [vmem:[%s8215_s0 + $0x1e0] sm:$0xff] %v10535_v9  ;;  %v8725_v8 = vadd.f32 %v2337_v60, %v8648_v45  ;;  %v2339_v30 = vpop.f32.mrb[42].mxu1  ;;  %v2611_v44 = vpop.f32.mrb[52].mxu0 }
 0x2f1   : > { %10799 = vst [vmem:[#allocation60_spill] sm:$0xff] %v8719_v40  ;;  %3111 = vst [vmem:[%s8215_s0 + $0x1e8] sm:$0xff] %v10537_v36  ;;  %v8732_v20 = vadd.f32 %v2339_v30, %v8641_v47  ;;  %v2341_v19 = vpop.f32.mrb[43].mxu1  ;;  %v8735_v49 = vadd.f32 %v2611_v44, %v8566_v13  ;;  %v2613_v9 = vpop.f32.mrb[53].mxu0  ;;  %v10805_v30 = vmax.f32 %v8719_v40, 0.0 }
 0x2f2   : > { %10800 = vst [vmem:[#allocation61_spill] sm:$0xff] %v8725_v8  ;;  %v8739_v56 = vadd.f32 %v2341_v19, %v8648_v45  ;;  %v8742_v36 = vadd.f32 %v2613_v9, %v8569_v62  ;;  %v2615_v35 = vpop.f32.mrb[54].mxu0  ;;  %v10807_v19 = vmax.f32 %v8725_v8, 0.0 }
 0x2f3   : > { %10801 = vst [vmem:[#allocation62_spill] sm:$0xff] %v8732_v20  ;;  %10802 = vst [vmem:[#allocation63_spill] sm:$0xff] %v8735_v49  ;;  %v10544_v4 = vmax.f32 %v8732_v20, 0.0  ;;  %v10543_v44 = vmax.f32 %v8735_v49, 0.0  ;;  %v8750_v18 = vadd.f32 %v2615_v35, %v8566_v13  ;;  %v2617_v60 = vpop.f32.mrb[55].mxu0 }
 0x2f4   : > { %10803 = vst [vmem:[#allocation64_spill] sm:$0xff] %v8739_v56  ;;  %10804 = vst [vmem:[#allocation65_spill] sm:$0xff] %v8742_v36  ;;  %v10545_v9 = vmax.f32 %v8739_v56, 0.0  ;;  %v10546_v17 = vmax.f32 %v8742_v36, 0.0  ;;  %v8758_v6 = vadd.f32 %v2617_v60, %v8569_v62 }
 0x2f5   : > { %3068 = vst [vmem:[%s8215_s0 + $0x90] sm:$0xff] %v10805_v30  ;;  %10806 = vst [vmem:[#allocation66_spill] sm:$0xff] %v8750_v18  ;;  %v10549_v35 = vmax.f32 %v8750_v18, 0.0 }
 0x2f6   : > { %3069 = vst [vmem:[%s8215_s0 + $0x98] sm:$0xff] %v10807_v19  ;;  %10808 = vst [vmem:[#allocation67_spill] sm:$0xff] %v8758_v6  ;;  %v2345_v30 = vpop.f32.mrb[44].mxu1  ;;  %v10551_v19 = vmax.f32 %v8758_v6, 0.0 }
 0x2f7   : > { %3076 = vst [vmem:[%s8215_s0 + $0xd0] sm:$0xff] %v10544_v4  ;;  %3118 = vst [vmem:[%s8215_s0 + $0x220] sm:$0xff] %v10543_v44  ;;  %v8775_v60 = vadd.f32 %v2345_v30, %v8641_v47  ;;  %v2347_v29 = vpop.f32.mrb[45].mxu1 }
 0x2f8   : > { %3077 = vst [vmem:[%s8215_s0 + $0xd8] sm:$0xff] %v10545_v9  ;;  %3119 = vst [vmem:[%s8215_s0 + $0x228] sm:$0xff] %v10546_v17  ;;  %v8781_v44 = vadd.f32 %v2347_v29, %v8648_v45  ;;  %v2349_v4 = vpop.f32.mrb[46].mxu1  ;;  %v2621_v9 = vpop.f32.mrb[56].mxu0 }
 0x2f9   : > { %10809 = vst [vmem:[#allocation68_spill] sm:$0xff] %v8775_v60  ;;  %3126 = vst [vmem:[%s8215_s0 + $0x260] sm:$0xff] %v10549_v35  ;;  %v8788_v49 = vadd.f32 %v2349_v4, %v8641_v47  ;;  %v2351_v30 = vpop.f32.mrb[47].mxu1  ;;  %v8791_v36 = vadd.f32 %v2621_v9, %v8566_v13  ;;  %v2623_v35 = vpop.f32.mrb[57].mxu0  ;;  %v10815_v4 = vmax.f32 %v8775_v60, 0.0 }
 0x2fa   : > { %10810 = vst [vmem:[#allocation69_spill] sm:$0xff] %v8781_v44  ;;  %3127 = vst [vmem:[%s8215_s0 + $0x268] sm:$0xff] %v10551_v19  ;;  %v8795_v18 = vadd.f32 %v2351_v30, %v8648_v45  ;;  %v8798_v19 = vadd.f32 %v2623_v35, %v8569_v62  ;;  %v2625_v17 = vpop.f32.mrb[58].mxu0  ;;  %v10817_v30 = vmax.f32 %v8781_v44, 0.0 }
 0x2fb   : > { %10811 = vst [vmem:[#allocation70_spill] sm:$0xff] %v8788_v49  ;;  %10812 = vst [vmem:[#allocation71_spill] sm:$0xff] %v8791_v36  ;;  %v10558_v6 = vmax.f32 %v8788_v49, 0.0  ;;  %v10557_v9 = vmax.f32 %v8791_v36, 0.0  ;;  %v8806_v25 = vadd.f32 %v2625_v17, %v8566_v13  ;;  %v2627_v29 = vpop.f32.mrb[59].mxu0 }
 0x2fc   : > { %10813 = vst [vmem:[#allocation72_spill] sm:$0xff] %v8795_v18  ;;  %10814 = vst [vmem:[#allocation73_spill] sm:$0xff] %v8798_v19  ;;  %v10559_v35 = vmax.f32 %v8795_v18, 0.0  ;;  %v10560_v1 = vmax.f32 %v8798_v19, 0.0  ;;  %v8814_v60 = vadd.f32 %v2627_v29, %v8569_v62 }
 0x2fd   : > { %3084 = vst [vmem:[%s8215_s0 + $0x110] sm:$0xff] %v10815_v4  ;;  %10816 = vst [vmem:[#allocation74_spill] sm:$0xff] %v8806_v25  ;;  %v10563_v17 = vmax.f32 %v8806_v25, 0.0 }
 0x2fe   : > { %3085 = vst [vmem:[%s8215_s0 + $0x118] sm:$0xff] %v10817_v30  ;;  %10818 = vst [vmem:[#allocation75_spill] sm:$0xff] %v8814_v60  ;;  %v2355_v4 = vpop.f32.mrb[48].mxu1  ;;  %v10565_v30 = vmax.f32 %v8814_v60, 0.0 }
 0x2ff   : > { %3092 = vst [vmem:[%s8215_s0 + $0x150] sm:$0xff] %v10558_v6  ;;  %3134 = vst [vmem:[%s8215_s0 + $0x2a0] sm:$0xff] %v10557_v9  ;;  %v8831_v29 = vadd.f32 %v2355_v4, %v8641_v47  ;;  %v2357_v49 = vpop.f32.mrb[49].mxu1 }
 0x300   : > { %3093 = vst [vmem:[%s8215_s0 + $0x158] sm:$0xff] %v10559_v35  ;;  %3135 = vst [vmem:[%s8215_s0 + $0x2a8] sm:$0xff] %v10560_v1  ;;  %v8837_v9 = vadd.f32 %v2357_v49, %v8648_v45  ;;  %v2359_v6 = vpop.f32.mrb[50].mxu1  ;;  %v2631_v35 = vpop.f32.mrb[60].mxu0 }
 0x301   : > { %10819 = vst [vmem:[#allocation76_spill] sm:$0xff] %v8831_v29  ;;  %3142 = vst [vmem:[%s8215_s0 + $0x2e0] sm:$0xff] %v10563_v17  ;;  %v8844_v36 = vadd.f32 %v2359_v6, %v8641_v47  ;;  %v2361_v4 = vpop.f32.mrb[51].mxu1  ;;  %v8847_v19 = vadd.f32 %v2631_v35, %v8566_v13  ;;  %v2633_v17 = vpop.f32.mrb[61].mxu0  ;;  %v10825_v6 = vmax.f32 %v8831_v29, 0.0 }
 0x302   : > { %10820 = vst [vmem:[#allocation77_spill] sm:$0xff] %v8837_v9  ;;  %3143 = vst [vmem:[%s8215_s0 + $0x2e8] sm:$0xff] %v10565_v30  ;;  %v8851_v25 = vadd.f32 %v2361_v4, %v8648_v45  ;;  %v8854_v30 = vadd.f32 %v2633_v17, %v8569_v62  ;;  %v2635_v1 = vpop.f32.mrb[62].mxu0  ;;  %v10827_v4 = vmax.f32 %v8837_v9, 0.0 }
 0x303   : > { %10821 = vst [vmem:[#allocation78_spill] sm:$0xff] %v8844_v36  ;;  %10822 = vst [vmem:[#allocation79_spill] sm:$0xff] %v8847_v19  ;;  %v10572_v60 = vmax.f32 %v8844_v36, 0.0  ;;  %v10571_v35 = vmax.f32 %v8847_v19, 0.0  ;;  %v8862_v18 = vadd.f32 %v2635_v1, %v8566_v13  ;;  %v2637_v49 = vpop.f32.mrb[63].mxu0 }
 0x304   : > { %10823 = vst [vmem:[#allocation80_spill] sm:$0xff] %v8851_v25  ;;  %10824 = vst [vmem:[#allocation81_spill] sm:$0xff] %v8854_v30  ;;  %v10573_v17 = vmax.f32 %v8851_v25, 0.0  ;;  %v10574_v44 = vmax.f32 %v8854_v30, 0.0  ;;  %v8870_v29 = vadd.f32 %v2637_v49, %v8569_v62 }
 0x305   : > { %3100 = vst [vmem:[%s8215_s0 + $0x190] sm:$0xff] %v10825_v6  ;;  %10826 = vst [vmem:[#allocation82_spill] sm:$0xff] %v8862_v18  ;;  %v10577_v1 = vmax.f32 %v8862_v18, 0.0 }
 0x306   : > { %3101 = vst [vmem:[%s8215_s0 + $0x198] sm:$0xff] %v10827_v4  ;;  %10828 = vst [vmem:[#allocation83_spill] sm:$0xff] %v8870_v29  ;;  %v2365_v6 = vpop.f32.mrb[52].mxu1  ;;  %v10579_v4 = vmax.f32 %v8870_v29, 0.0 }
 0x307   : > { %3108 = vst [vmem:[%s8215_s0 + $0x1d0] sm:$0xff] %v10572_v60  ;;  %3150 = vst [vmem:[%s8215_s0 + $0x320] sm:$0xff] %v10571_v35  ;;  %v8887_v49 = vadd.f32 %v2365_v6, %v8641_v47  ;;  %v2367_v36 = vpop.f32.mrb[53].mxu1 }
 0x308   : > { %3109 = vst [vmem:[%s8215_s0 + $0x1d8] sm:$0xff] %v10573_v17  ;;  %3151 = vst [vmem:[%s8215_s0 + $0x328] sm:$0xff] %v10574_v44  ;;  %v8893_v35 = vadd.f32 %v2367_v36, %v8648_v45  ;;  %v2369_v60 = vpop.f32.mrb[54].mxu1  ;;  %v2641_v17 = vpop.f32.mrb[64].mxu0 }
 0x309   : > { %10829 = vst [vmem:[#allocation84_spill] sm:$0xff] %v8887_v49  ;;  %3158 = vst [vmem:[%s8215_s0 + $0x360] sm:$0xff] %v10577_v1  ;;  %v8900_v19 = vadd.f32 %v2369_v60, %v8641_v47  ;;  %v2371_v6 = vpop.f32.mrb[55].mxu1  ;;  %v8903_v30 = vadd.f32 %v2641_v17, %v8566_v13  ;;  %v2643_v1 = vpop.f32.mrb[65].mxu0  ;;  %v10835_v60 = vmax.f32 %v8887_v49, 0.0 }
 0x30a   : > { %10830 = vst [vmem:[#allocation85_spill] sm:$0xff] %v8893_v35  ;;  %3159 = vst [vmem:[%s8215_s0 + $0x368] sm:$0xff] %v10579_v4  ;;  %v8907_v18 = vadd.f32 %v2371_v6, %v8648_v45  ;;  %v8910_v4 = vadd.f32 %v2643_v1, %v8569_v62  ;;  %v2645_v44 = vpop.f32.mrb[66].mxu0  ;;  %v10837_v6 = vmax.f32 %v8893_v35, 0.0 }
 0x30b   : > { %10831 = vst [vmem:[#allocation86_spill] sm:$0xff] %v8900_v19  ;;  %10832 = vst [vmem:[#allocation87_spill] sm:$0xff] %v8903_v30  ;;  %v10586_v29 = vmax.f32 %v8900_v19, 0.0  ;;  %v10585_v17 = vmax.f32 %v8903_v30, 0.0  ;;  %v8918_v25 = vadd.f32 %v2645_v44, %v8566_v13  ;;  %v2647_v36 = vpop.f32.mrb[67].mxu0 }
 0x30c   : > { %10833 = vst [vmem:[#allocation88_spill] sm:$0xff] %v8907_v18  ;;  %10834 = vst [vmem:[#allocation89_spill] sm:$0xff] %v8910_v4  ;;  %v10587_v1 = vmax.f32 %v8907_v18, 0.0  ;;  %v10588_v9 = vmax.f32 %v8910_v4, 0.0  ;;  %v8926_v49 = vadd.f32 %v2647_v36, %v8569_v62 }
 0x30d   : > { %3116 = vst [vmem:[%s8215_s0 + $0x210] sm:$0xff] %v10835_v60  ;;  %10836 = vst [vmem:[#allocation90_spill] sm:$0xff] %v8918_v25  ;;  %v10591_v44 = vmax.f32 %v8918_v25, 0.0 }
 0x30e   : > { %3117 = vst [vmem:[%s8215_s0 + $0x218] sm:$0xff] %v10837_v6  ;;  %10838 = vst [vmem:[#allocation91_spill] sm:$0xff] %v8926_v49  ;;  %v2375_v60 = vpop.f32.mrb[56].mxu1  ;;  %v10593_v6 = vmax.f32 %v8926_v49, 0.0 }
 0x30f   : > { %3124 = vst [vmem:[%s8215_s0 + $0x250] sm:$0xff] %v10586_v29  ;;  %3166 = vst [vmem:[%s8215_s0 + $0x3a0] sm:$0xff] %v10585_v17  ;;  %v8943_v36 = vadd.f32 %v2375_v60, %v8641_v47  ;;  %v2377_v19 = vpop.f32.mrb[57].mxu1 }
 0x310   : > { %3125 = vst [vmem:[%s8215_s0 + $0x258] sm:$0xff] %v10587_v1  ;;  %3167 = vst [vmem:[%s8215_s0 + $0x3a8] sm:$0xff] %v10588_v9  ;;  %v8949_v17 = vadd.f32 %v2377_v19, %v8648_v45  ;;  %v2379_v29 = vpop.f32.mrb[58].mxu1  ;;  %v2651_v1 = vpop.f32.mrb[68].mxu0 }
 0x311   : > { %10839 = vst [vmem:[#allocation92_spill] sm:$0xff] %v8943_v36  ;;  %3174 = vst [vmem:[%s8215_s0 + $0x3e0] sm:$0xff] %v10591_v44  ;;  %v8956_v30 = vadd.f32 %v2379_v29, %v8641_v47  ;;  %v2381_v60 = vpop.f32.mrb[59].mxu1  ;;  %v8959_v4 = vadd.f32 %v2651_v1, %v8566_v13  ;;  %v2653_v44 = vpop.f32.mrb[69].mxu0  ;;  %v10845_v29 = vmax.f32 %v8943_v36, 0.0 }
 0x312   : > { %10840 = vst [vmem:[#allocation93_spill] sm:$0xff] %v8949_v17  ;;  %3175 = vst [vmem:[%s8215_s0 + $0x3e8] sm:$0xff] %v10593_v6  ;;  %v8963_v25 = vadd.f32 %v2381_v60, %v8648_v45  ;;  %v8966_v6 = vadd.f32 %v2653_v44, %v8569_v62  ;;  %v2655_v9 = vpop.f32.mrb[70].mxu0  ;;  %v10847_v60 = vmax.f32 %v8949_v17, 0.0 }
 0x313   : > { %10841 = vst [vmem:[#allocation94_spill] sm:$0xff] %v8956_v30  ;;  %10842 = vst [vmem:[#allocation95_spill] sm:$0xff] %v8959_v4  ;;  %v10600_v49 = vmax.f32 %v8956_v30, 0.0  ;;  %v10598_v1 = vmax.f32 %v8959_v4, 0.0  ;;  %v8974_v18 = vadd.f32 %v2655_v9, %v8566_v13  ;;  %v2657_v19 = vpop.f32.mrb[71].mxu0 }
 0x314   : > { %10843 = vst [vmem:[#allocation96_spill] sm:$0xff] %v8963_v25  ;;  %10844 = vst [vmem:[#allocation97_spill] sm:$0xff] %v8966_v6  ;;  %v10601_v44 = vmax.f32 %v8963_v25, 0.0  ;;  %v10599_v35 = vmax.f32 %v8966_v6, 0.0  ;;  %v8982_v36 = vadd.f32 %v2657_v19, %v8569_v62 }
 0x315   : > { %3132 = vst [vmem:[%s8215_s0 + $0x290] sm:$0xff] %v10845_v29  ;;  %10846 = vst [vmem:[#allocation98_spill] sm:$0xff] %v8974_v18  ;;  %v10603_v13 = vmax.f32 %v8974_v18, 0.0 }
 0x316   : > { %3133 = vst [vmem:[%s8215_s0 + $0x298] sm:$0xff] %v10847_v60  ;;  %10848 = vst [vmem:[#allocation99_spill] sm:$0xff] %v8982_v36  ;;  %v2385_v9 = vpop.f32.mrb[60].mxu1  ;;  %v10604_v62 = vmax.f32 %v8982_v36, 0.0 }
 0x317   : > { %3140 = vst [vmem:[%s8215_s0 + $0x2d0] sm:$0xff] %v10600_v49  ;;  %3182 = vst [vmem:[%s8215_s0 + $0x420] sm:$0xff] %v10598_v1  ;;  %v8999_v19 = vadd.f32 %v2385_v9, %v8641_v47  ;;  %v2387_v29 = vpop.f32.mrb[61].mxu1 }
 0x318   : > { %3141 = vst [vmem:[%s8215_s0 + $0x2d8] sm:$0xff] %v10601_v44  ;;  %3183 = vst [vmem:[%s8215_s0 + $0x428] sm:$0xff] %v10599_v35  ;;  %v9005_v60 = vadd.f32 %v2387_v29, %v8648_v45  ;;  %v2389_v1 = vpop.f32.mrb[62].mxu1 }
 0x319   : > { %10849 = vst [vmem:[#allocation100_spill] sm:$0xff] %v8999_v19  ;;  %3190 = vst [vmem:[%s8215_s0 + $0x460] sm:$0xff] %v10603_v13  ;;  %v10605_v35 = vmax.f32 %v8999_v19, 0.0  ;;  %v9012_v49 = vadd.f32 %v2389_v1, %v8641_v47  ;;  %v2391_v44 = vpop.f32.mrb[63].mxu1 }
 0x31a   : > { %10850 = vst [vmem:[#allocation101_spill] sm:$0xff] %v9005_v60  ;;  %3191 = vst [vmem:[%s8215_s0 + $0x468] sm:$0xff] %v10604_v62  ;;  %v10606_v9 = vmax.f32 %v9005_v60, 0.0  ;;  %v9016_v4 = vadd.f32 %v2391_v44, %v8648_v45 }
 0x31b   : > { %10851 = vst [vmem:[#allocation102_spill] sm:$0xff] %v9012_v49  ;;  %3148 = vst [vmem:[%s8215_s0 + $0x310] sm:$0xff] %v10605_v35  ;;  %v10609_v29 = vmax.f32 %v9012_v49, 0.0 }
 0x31c   : > { %10852 = vst [vmem:[#allocation103_spill] sm:$0xff] %v9016_v4  ;;  %3149 = vst [vmem:[%s8215_s0 + $0x318] sm:$0xff] %v10606_v9  ;;  %v10611_v13 = vmax.f32 %v9016_v4, 0.0 }
 0x31d   : > { %3156 = vst [vmem:[%s8215_s0 + $0x350] sm:$0xff] %v10609_v29 }
 0x31e   : > { %3157 = vst [vmem:[%s8215_s0 + $0x358] sm:$0xff] %v10611_v13  ;;  %v2395_v1 = vpop.f32.mrb[64].mxu1 }
 0x31f   : > { %v9033_v44 = vadd.f32 %v2395_v1, %v8641_v47  ;;  %v2397_v62 = vpop.f32.mrb[65].mxu1 }
 0x320   : > { %v9036_v35 = vadd.f32 %v2397_v62, %v8648_v45  ;;  %v2399_v9 = vpop.f32.mrb[66].mxu1 }
 0x321   : > { %10853 = vst [vmem:[#allocation104_spill] sm:$0xff] %v9033_v44  ;;  %v10612_v18 = vmax.f32 %v9033_v44, 0.0  ;;  %v9040_v36 = vadd.f32 %v2399_v9, %v8641_v47  ;;  %v2401_v29 = vpop.f32.mrb[67].mxu1 }
 0x322   : > { %10854 = vst [vmem:[#allocation105_spill] sm:$0xff] %v9036_v35  ;;  %v10614_v6 = vmax.f32 %v9036_v35, 0.0  ;;  %v9044_v13 = vadd.f32 %v2401_v29, %v8648_v45 }
 0x323   : > { %10855 = vst [vmem:[#allocation106_spill] sm:$0xff] %v9040_v36  ;;  %3164 = vst [vmem:[%s8215_s0 + $0x390] sm:$0xff] %v10612_v18  ;;  %v10617_v1 = vmax.f32 %v9040_v36, 0.0 }
 0x324   : > { %10856 = vst [vmem:[#allocation107_spill] sm:$0xff] %v9044_v13  ;;  %3165 = vst [vmem:[%s8215_s0 + $0x398] sm:$0xff] %v10614_v6  ;;  %v10619_v62 = vmax.f32 %v9044_v13, 0.0 }
 0x325   : > { %3172 = vst [vmem:[%s8215_s0 + $0x3d0] sm:$0xff] %v10617_v1 }
 0x326   : > { %3173 = vst [vmem:[%s8215_s0 + $0x3d8] sm:$0xff] %v10619_v62  ;;  %v2405_v9 = vpop.f32.mrb[68].mxu1 }
 0x327   : > { %v9061_v29 = vadd.f32 %v2405_v9, %v8641_v47  ;;  %v2407_v18 = vpop.f32.mrb[69].mxu1 }
 0x328   : > { %v9064_v44 = vadd.f32 %v2407_v18, %v8648_v45  ;;  %v2409_v6 = vpop.f32.mrb[70].mxu1 }
 0x329   : > { %10857 = vst [vmem:[#allocation108_spill] sm:$0xff] %v9061_v29  ;;  %v10620_v35 = vmax.f32 %v9061_v29, 0.0  ;;  %v9068_v36 = vadd.f32 %v2409_v6, %v8641_v47  ;;  %v2411_v1 = vpop.f32.mrb[71].mxu1  ;;  %v808_v47 = vsub.s32 7, %v8152_v53  ;;  %v6604_v6 = vld [vmem:[%s7752_s15] sm:$0xff] }
 0x32a   : > { %10858 = vst [vmem:[#allocation109_spill] sm:$0xff] %v9064_v44  ;;  %v10621_v13 = vmax.f32 %v9064_v44, 0.0  ;;  %v9072_v62 = vadd.f32 %v2411_v1, %v8648_v45  ;;  %v804_v45 = vsub.s32 6, %v8152_v53 }
 0x32b   : > { %10859 = vst [vmem:[#allocation110_spill] sm:$0xff] %v9068_v36  ;;  %3180 = vst [vmem:[%s8215_s0 + $0x410] sm:$0xff] %v10620_v35  ;;  %v10623_v9 = vmax.f32 %v9068_v36, 0.0  ;;  %v9093_v35 = vrot.slane %v6604_v6, %v808_v47 }
 0x32c   : > { %10860 = vst [vmem:[#allocation111_spill] sm:$0xff] %v9072_v62  ;;  %3181 = vst [vmem:[%s8215_s0 + $0x418] sm:$0xff] %v10621_v13  ;;  %v10624_v18 = vmax.f32 %v9072_v62, 0.0  ;;  %v9091_v1 = vrot.slane %v6604_v6, %v804_v45 }
 0x32d   : > { %3188 = vst [vmem:[%s8215_s0 + $0x450] sm:$0xff] %v10623_v9 }
 0x32e   : > { %3189 = vst [vmem:[%s8215_s0 + $0x458] sm:$0xff] %v10624_v18 }
 0x376   : > { %v2817_v13 = vpop.f32.mrb[72].mxu1 }
 0x377   : > { %v9096_v36 = vadd.f32 %v2817_v13, %v9091_v1  ;;  %v2819_v9 = vpop.f32.mrb[73].mxu1 }
 0x378   : > { %v9099_v18 = vadd.f32 %v2819_v9, %v9093_v35  ;;  %v2821_v29 = vpop.f32.mrb[74].mxu1 }
 0x379   : > { %10861 = vst [vmem:[#allocation112_spill] sm:$0xff] %v9096_v36  ;;  %v10630_v62 = vmax.f32 %v9096_v36, 0.0  ;;  %v9103_v53 = vadd.f32 %v2821_v29, %v9091_v1  ;;  %v2823_v45 = vpop.f32.mrb[75].mxu1 }
 0x37a   : > { %10862 = vst [vmem:[#allocation113_spill] sm:$0xff] %v9099_v18  ;;  %v10631_v44 = vmax.f32 %v9099_v18, 0.0  ;;  %v9107_v47 = vadd.f32 %v2823_v45, %v9093_v35 }
 0x37b   : > { %10863 = vst [vmem:[#allocation114_spill] sm:$0xff] %v9103_v53  ;;  %3056 = vst [vmem:[%s8215_s0 + $0x30] sm:$0xff] %v10630_v62  ;;  %v10634_v13 = vmax.f32 %v9103_v53, 0.0 }
 0x37c   : > { %10864 = vst [vmem:[#allocation115_spill] sm:$0xff] %v9107_v47  ;;  %3057 = vst [vmem:[%s8215_s0 + $0x38] sm:$0xff] %v10631_v44  ;;  %v10636_v9 = vmax.f32 %v9107_v47, 0.0 }
 0x37d   : > { %3064 = vst [vmem:[%s8215_s0 + $0x70] sm:$0xff] %v10634_v13 }
 0x37e   : > { %3065 = vst [vmem:[%s8215_s0 + $0x78] sm:$0xff] %v10636_v9  ;;  %v2827_v29 = vpop.f32.mrb[76].mxu1 }
 0x37f   : > { %v9124_v6 = vadd.f32 %v2827_v29, %v9091_v1  ;;  %v2829_v45 = vpop.f32.mrb[77].mxu1 }
 0x380   : > { %v9127_v62 = vadd.f32 %v2829_v45, %v9093_v35  ;;  %v2831_v44 = vpop.f32.mrb[78].mxu1 }
 0x381   : > { %10865 = vst [vmem:[#allocation116_spill] sm:$0xff] %v9124_v6  ;;  %v10637_v36 = vmax.f32 %v9124_v6, 0.0  ;;  %v9131_v18 = vadd.f32 %v2831_v44, %v9091_v1  ;;  %v2833_v13 = vpop.f32.mrb[79].mxu1 }
 0x382   : > { %10866 = vst [vmem:[#allocation117_spill] sm:$0xff] %v9127_v62  ;;  %v10639_v53 = vmax.f32 %v9127_v62, 0.0  ;;  %v9135_v9 = vadd.f32 %v2833_v13, %v9093_v35 }
 0x383   : > { %10867 = vst [vmem:[#allocation118_spill] sm:$0xff] %v9131_v18  ;;  %3072 = vst [vmem:[%s8215_s0 + $0xb0] sm:$0xff] %v10637_v36  ;;  %v10642_v29 = vmax.f32 %v9131_v18, 0.0 }
 0x384   : > { %10868 = vst [vmem:[#allocation119_spill] sm:$0xff] %v9135_v9  ;;  %3073 = vst [vmem:[%s8215_s0 + $0xb8] sm:$0xff] %v10639_v53  ;;  %v10644_v45 = vmax.f32 %v9135_v9, 0.0 }
 0x385   : > { %3080 = vst [vmem:[%s8215_s0 + $0xf0] sm:$0xff] %v10642_v29 }
 0x386   : > { %3081 = vst [vmem:[%s8215_s0 + $0xf8] sm:$0xff] %v10644_v45  ;;  %v2837_v44 = vpop.f32.mrb[80].mxu1 }
 0x387   : > { %v9152_v13 = vadd.f32 %v2837_v44, %v9091_v1  ;;  %v2839_v36 = vpop.f32.mrb[81].mxu1 }
 0x388   : > { %v9155_v6 = vadd.f32 %v2839_v36, %v9093_v35  ;;  %v2841_v53 = vpop.f32.mrb[82].mxu1 }
 0x389   : > { %v10645_v62 = vmax.f32 %v9152_v13, 0.0  ;;  %v9159_v47 = vadd.f32 %v2841_v53, %v9091_v1  ;;  %v2843_v29 = vpop.f32.mrb[83].mxu1 }
 0x38a   : > { %v10647_v18 = vmax.f32 %v9155_v6, 0.0  ;;  %v9163_v45 = vadd.f32 %v2843_v29, %v9093_v35 }
 0x38b   : > { %3088 = vst [vmem:[%s8215_s0 + $0x130] sm:$0xff] %v10645_v62  ;;  %v10650_v44 = vmax.f32 %v9159_v47, 0.0 }
 0x38c   : > { %3089 = vst [vmem:[%s8215_s0 + $0x138] sm:$0xff] %v10647_v18  ;;  %v10652_v36 = vmax.f32 %v9163_v45, 0.0 }
 0x38d   : > { %3096 = vst [vmem:[%s8215_s0 + $0x170] sm:$0xff] %v10650_v44 }
 0x38e   : > { %3097 = vst [vmem:[%s8215_s0 + $0x178] sm:$0xff] %v10652_v36  ;;  %v2847_v53 = vpop.f32.mrb[84].mxu1 }
 0x38f   : > { %v9180_v29 = vadd.f32 %v2847_v53, %v9091_v1  ;;  %v2849_v62 = vpop.f32.mrb[85].mxu1 }
 0x390   : > { %v9183_v9 = vadd.f32 %v2849_v62, %v9093_v35  ;;  %v2851_v18 = vpop.f32.mrb[86].mxu1 }
 0x391   : > { %v10653_v49 = vmax.f32 %v9180_v29, 0.0  ;;  %v9187_v19 = vadd.f32 %v2851_v18, %v9091_v1  ;;  %v2853_v44 = vpop.f32.mrb[87].mxu1 }
 0x392   : > { %v10655_v4 = vmax.f32 %v9183_v9, 0.0  ;;  %v9191_v36 = vadd.f32 %v2853_v44, %v9093_v35 }
 0x393   : > { %3104 = vst [vmem:[%s8215_s0 + $0x1b0] sm:$0xff] %v10653_v49  ;;  %v10658_v53 = vmax.f32 %v9187_v19, 0.0 }
 0x394   : > { %3105 = vst [vmem:[%s8215_s0 + $0x1b8] sm:$0xff] %v10655_v4  ;;  %v10660_v62 = vmax.f32 %v9191_v36, 0.0 }
 0x395   : > { %3112 = vst [vmem:[%s8215_s0 + $0x1f0] sm:$0xff] %v10658_v53 }
 0x396   : > { %3113 = vst [vmem:[%s8215_s0 + $0x1f8] sm:$0xff] %v10660_v62  ;;  %v2857_v18 = vpop.f32.mrb[88].mxu1 }
 0x397   : > { %v9208_v44 = vadd.f32 %v2857_v18, %v9091_v1  ;;  %v2859_v49 = vpop.f32.mrb[89].mxu1 }
 0x398   : > { %v9211_v60 = vadd.f32 %v2859_v49, %v9093_v35  ;;  %v2861_v4 = vpop.f32.mrb[90].mxu1 }
 0x399   : > { %v10661_v30 = vmax.f32 %v9208_v44, 0.0  ;;  %v9215_v25 = vadd.f32 %v2861_v4, %v9091_v1  ;;  %v2863_v53 = vpop.f32.mrb[91].mxu1 }
 0x39a   : > { %v10663_v17 = vmax.f32 %v9211_v60, 0.0  ;;  %v9219_v62 = vadd.f32 %v2863_v53, %v9093_v35 }
 0x39b   : > { %3120 = vst [vmem:[%s8215_s0 + $0x230] sm:$0xff] %v10661_v30  ;;  %v10666_v18 = vmax.f32 %v9215_v25, 0.0 }
 0x39c   : > { %3121 = vst [vmem:[%s8215_s0 + $0x238] sm:$0xff] %v10663_v17  ;;  %v10668_v49 = vmax.f32 %v9219_v62, 0.0 }
 0x39d   : > { %3128 = vst [vmem:[%s8215_s0 + $0x270] sm:$0xff] %v10666_v18 }
 0x39e   : > { %3129 = vst [vmem:[%s8215_s0 + $0x278] sm:$0xff] %v10668_v49  ;;  %v2867_v4 = vpop.f32.mrb[92].mxu1 }
 0x39f   : > { %v9236_v53 = vadd.f32 %v2867_v4, %v9091_v1  ;;  %v2869_v30 = vpop.f32.mrb[93].mxu1 }
 0x3a0   : > { %v9239_v20 = vadd.f32 %v2869_v30, %v9093_v35  ;;  %v2871_v17 = vpop.f32.mrb[94].mxu1 }
 0x3a1   : > { %10869 = vst [vmem:[#allocation120_spill] sm:$0xff] %v9236_v53  ;;  %v10669_v40 = vmax.f32 %v9236_v53, 0.0  ;;  %v9243_v56 = vadd.f32 %v2871_v17, %v9091_v1  ;;  %v2873_v18 = vpop.f32.mrb[95].mxu1 }
 0x3a2   : > { %v10671_v8 = vmax.f32 %v9239_v20, 0.0  ;;  %v9247_v49 = vadd.f32 %v2873_v18, %v9093_v35 }
 0x3a3   : > { %10870 = vst [vmem:[#allocation121_spill] sm:$0xff] %v9243_v56  ;;  %3136 = vst [vmem:[%s8215_s0 + $0x2b0] sm:$0xff] %v10669_v40  ;;  %v10674_v4 = vmax.f32 %v9243_v56, 0.0 }
 0x3a4   : > { %10871 = vst [vmem:[#allocation122_spill] sm:$0xff] %v9247_v49  ;;  %3137 = vst [vmem:[%s8215_s0 + $0x2b8] sm:$0xff] %v10671_v8  ;;  %v10676_v30 = vmax.f32 %v9247_v49, 0.0 }
 0x3a5   : > { %3144 = vst [vmem:[%s8215_s0 + $0x2f0] sm:$0xff] %v10674_v4 }
 0x3a6   : > { %3145 = vst [vmem:[%s8215_s0 + $0x2f8] sm:$0xff] %v10676_v30  ;;  %v2877_v17 = vpop.f32.mrb[96].mxu1 }
 0x3a7   : > { %v9264_v18 = vadd.f32 %v2877_v17, %v9091_v1  ;;  %v2879_v40 = vpop.f32.mrb[97].mxu1 }
 0x3a8   : > { %v9267_v53 = vadd.f32 %v2879_v40, %v9093_v35  ;;  %v2881_v8 = vpop.f32.mrb[98].mxu1 }
 0x3a9   : > { %10872 = vst [vmem:[#allocation123_spill] sm:$0xff] %v9264_v18  ;;  %v10677_v61 = vmax.f32 %v9264_v18, 0.0  ;;  %v9271_v48 = vadd.f32 %v2881_v8, %v9091_v1  ;;  %v2883_v4 = vpop.f32.mrb[99].mxu1 }
 0x3aa   : > { %10873 = vst [vmem:[#allocation124_spill] sm:$0xff] %v9267_v53  ;;  %v10679_v56 = vmax.f32 %v9267_v53, 0.0  ;;  %v9275_v30 = vadd.f32 %v2883_v4, %v9093_v35 }
 0x3ab   : > { %10874 = vst [vmem:[#allocation125_spill] sm:$0xff] %v9271_v48  ;;  %3152 = vst [vmem:[%s8215_s0 + $0x330] sm:$0xff] %v10677_v61  ;;  %v10682_v17 = vmax.f32 %v9271_v48, 0.0 }
 0x3ac   : > { %3153 = vst [vmem:[%s8215_s0 + $0x338] sm:$0xff] %v10679_v56  ;;  %v10684_v40 = vmax.f32 %v9275_v30, 0.0 }
 0x3ad   : > { %3160 = vst [vmem:[%s8215_s0 + $0x370] sm:$0xff] %v10682_v17 }
 0x3ae   : > { %3161 = vst [vmem:[%s8215_s0 + $0x378] sm:$0xff] %v10684_v40  ;;  %v2887_v8 = vpop.f32.mrb[100].mxu1 }
 0x3af   : > { %v9292_v4 = vadd.f32 %v2887_v8, %v9091_v1  ;;  %v2889_v61 = vpop.f32.mrb[101].mxu1 }
 0x3b0   : > { %v9295_v18 = vadd.f32 %v2889_v61, %v9093_v35  ;;  %v2891_v56 = vpop.f32.mrb[102].mxu1 }
 0x3b1   : > { %10875 = vst [vmem:[#allocation126_spill] sm:$0xff] %v9292_v4  ;;  %v10685_v53 = vmax.f32 %v9292_v4, 0.0  ;;  %v9299_v49 = vadd.f32 %v2891_v56, %v9091_v1  ;;  %v2893_v17 = vpop.f32.mrb[103].mxu1 }
 0x3b2   : > { %10876 = vst [vmem:[#allocation127_spill] sm:$0xff] %v9295_v18  ;;  %v10686_v48 = vmax.f32 %v9295_v18, 0.0  ;;  %v9303_v40 = vadd.f32 %v2893_v17, %v9093_v35 }
 0x3b3   : > { %10877 = vst [vmem:[#allocation128_spill] sm:$0xff] %v9299_v49  ;;  %3168 = vst [vmem:[%s8215_s0 + $0x3b0] sm:$0xff] %v10685_v53  ;;  %v10689_v8 = vmax.f32 %v9299_v49, 0.0 }
 0x3b4   : > { %10878 = vst [vmem:[#allocation129_spill] sm:$0xff] %v9303_v40  ;;  %3169 = vst [vmem:[%s8215_s0 + $0x3b8] sm:$0xff] %v10686_v48  ;;  %v10691_v61 = vmax.f32 %v9303_v40, 0.0 }
 0x3b5   : > { %3176 = vst [vmem:[%s8215_s0 + $0x3f0] sm:$0xff] %v10689_v8 }
 0x3b6   : > { %3177 = vst [vmem:[%s8215_s0 + $0x3f8] sm:$0xff] %v10691_v61  ;;  %v2897_v56 = vpop.f32.mrb[104].mxu1 }
 0x3b7   : > { %v9320_v17 = vadd.f32 %v2897_v56, %v9091_v1  ;;  %v2899_v53 = vpop.f32.mrb[105].mxu1 }
 0x3b8   : > { %v9323_v48 = vadd.f32 %v2899_v53, %v9093_v35  ;;  %v2901_v4 = vpop.f32.mrb[106].mxu1  ;;  %3197 = sbr.rel (%p5654_p7) target bundleno = 976 (0x3d0), region = 80 }
 0x3b9   : > { %10879 = vst [vmem:[#allocation130_spill] sm:$0xff] %v9320_v17  ;;  %v10694_v18 = vmax.f32 %v9320_v17, 0.0  ;;  %v9327_v8 = vadd.f32 %v2901_v4, %v9091_v1  ;;  %v2903_v49 = vpop.f32.mrb[107].mxu1 }
 0x3ba   : > { %v10696_v61 = vmax.f32 %v9323_v48, 0.0  ;;  %v9331_v40 = vadd.f32 %v2903_v49, %v9093_v35  ;;  %v7262_v35 = vmov (!%p5654_p7), 0.0  }
 0x3bb   : > { %10880 = vst [vmem:[#allocation131_spill] sm:$0xff] %v9327_v8  ;;  %3184 = vst [vmem:[%s8215_s0 + $0x430] sm:$0xff] %v10694_v18  ;;  %v10693_v56 = vmax.f32 %v9327_v8, 0.0 }
 0x3bc   : > { %3185 = vst [vmem:[%s8215_s0 + $0x438] sm:$0xff] %v10696_v61  ;;  %v10695_v53 = vmax.f32 %v9331_v40, 0.0  ;;  %3198 = vst [vmem:[%s9353_s26] sm:$0xff] (!%p5654_p7), %v7262_v35 }
 0x3bd   : > { %3192 = vst [vmem:[%s8215_s0 + $0x470] sm:$0xff] %v10693_v56  ;;  %3199 = vst [vmem:[%s9353_s26 + $0x8] sm:$0xff] (!%p5654_p7), %v7262_v35 }
 0x3be   : > { %3193 = vst [vmem:[%s8215_s0 + $0x478] sm:$0xff] %v10695_v53  ;;  %3200 = vst [vmem:[%s9353_s26 + $0x10] sm:$0xff] (!%p5654_p7), %v7262_v35 }
 0x3bf   : > { %3201 = vst [vmem:[%s9353_s26 + $0x18] sm:$0xff] %v7262_v35  ;;  %3202 = vst [vmem:[%s9353_s26 + $0x20] sm:$0xff] %v7262_v35 }
 0x3c0   : > { %3203 = vst [vmem:[%s9353_s26 + $0x28] sm:$0xff] %v7262_v35  ;;  %3204 = vst [vmem:[%s9353_s26 + $0x30] sm:$0xff] %v7262_v35 }
 0x3c1   : > { %3205 = vst [vmem:[%s9353_s26 + $0x38] sm:$0xff] %v7262_v35  ;;  %3206 = vst [vmem:[%s9353_s26 + $0x40] sm:$0xff] %v7262_v35 }
 0x3c2   : > { %3207 = vst [vmem:[%s9353_s26 + $0x48] sm:$0xff] %v7262_v35  ;;  %3208 = vst [vmem:[%s9353_s26 + $0x50] sm:$0xff] %v7262_v35 }
 0x3c3   : > { %3209 = vst [vmem:[%s9353_s26 + $0x58] sm:$0xff] %v7262_v35  ;;  %3210 = vst [vmem:[%s9353_s26 + $0x60] sm:$0xff] %v7262_v35 }
 0x3c4   : > { %3211 = vst [vmem:[%s9353_s26 + $0x68] sm:$0xff] %v7262_v35  ;;  %3212 = vst [vmem:[%s9353_s26 + $0x70] sm:$0xff] %v7262_v35 }
 0x3c5   : > { %3213 = vst [vmem:[%s9353_s26 + $0x78] sm:$0xff] %v7262_v35  ;;  %3214 = vst [vmem:[%s9353_s26 + $0x80] sm:$0xff] %v7262_v35 }
 0x3c6   : > { %3215 = vst [vmem:[%s9353_s26 + $0x88] sm:$0xff] %v7262_v35  ;;  %3216 = vst [vmem:[%s9353_s26 + $0x90] sm:$0xff] %v7262_v35 }
 0x3c7   : > { %3217 = vst [vmem:[%s9353_s26 + $0x98] sm:$0xff] %v7262_v35  ;;  %3218 = vst [vmem:[%s9353_s26 + $0xa0] sm:$0xff] %v7262_v35 }
 0x3c8   : > { %3219 = vst [vmem:[%s9353_s26 + $0xa8] sm:$0xff] %v7262_v35  ;;  %3220 = vst [vmem:[%s9353_s26 + $0xb0] sm:$0xff] %v7262_v35 }
 0x3c9   : > { %3221 = vst [vmem:[%s9353_s26 + $0xb8] sm:$0xff] %v7262_v35  ;;  %3222 = vst [vmem:[%s9353_s26 + $0xc0] sm:$0xff] %v7262_v35 }
 0x3ca   : > { %3223 = vst [vmem:[%s9353_s26 + $0xc8] sm:$0xff] %v7262_v35  ;;  %3224 = vst [vmem:[%s9353_s26 + $0xd0] sm:$0xff] %v7262_v35 }
 0x3cb   : > { %3225 = vst [vmem:[%s9353_s26 + $0xd8] sm:$0xff] %v7262_v35  ;;  %3226 = vst [vmem:[%s9353_s26 + $0xe0] sm:$0xff] %v7262_v35 }
 0x3cc   : > { %3227 = vst [vmem:[%s9353_s26 + $0xe8] sm:$0xff] %v7262_v35  ;;  %3228 = vst [vmem:[%s9353_s26 + $0xf0] sm:$0xff] %v7262_v35 }
 0x3cd   : > { %3229 = vst [vmem:[%s9353_s26 + $0xf8] sm:$0xff] %v7262_v35  ;;  %3230 = vst [vmem:[%s9353_s26 + $0x100] sm:$0xff] %v7262_v35 }
 0x3ce   : > { %3231 = vst [vmem:[%s9353_s26 + $0x108] sm:$0xff] %v7262_v35  ;;  %3232 = vst [vmem:[%s9353_s26 + $0x110] sm:$0xff] %v7262_v35 }
 0x3cf   : > { %3233 = vst [vmem:[%s9353_s26 + $0x118] sm:$0xff] %v7262_v35 }
 0x3d0 PF: > { %v6605_v1 = vld [vmem:[%s7755_s10 + $0x4] ss:$8 sps:$4 sm:$0xff]   ;;  %v10882_v49 = vmax.f32 %v8199_v43, 0.0  ;;  %v10883_v4 = vmax.f32 %v8210_v16, 0.0  ;;  %v6607_v18 = vld [vmem:[%s7755_s10] ss:$8 sps:$4 sm:$0xff]  }
 0x3d1   : > { %4110 = vmatprep.subr.bf16.mxu0 %v6605_v1  ;;  %v6608_v35 = vld [vmem:[%s7755_s10 + $0x14] ss:$8 sps:$4 sm:$0xff]   ;;  %v6610_v53 = vld [vmem:[%s7755_s10 + $0x10] ss:$8 sps:$4 sm:$0xff]   ;;  %v6611_v61 = vld [vmem:[%s7755_s10 + $0x24] ss:$8 sps:$4 sm:$0xff]  }
 0x3d2   : > { %v3271_v56 = vpack.c.bf16 %v10883_v4, %v10882_v49  ;;  %4111 = vmatpush1.bf16.msra.mxu0 %v6607_v18  ;;  %v6613_v8 = vld [vmem:[%s7755_s10 + $0x20] ss:$8 sps:$4 sm:$0xff]   ;;  %v6614_v43 = vld [vmem:[%s7755_s10 + $0x34] ss:$8 sps:$4 sm:$0xff]   ;;  %v6616_v16 = vld [vmem:[%s7755_s10 + $0x30] ss:$8 sps:$4 sm:$0xff]  }
 0x3d3   : > { %4112 = vmatprep.subr.bf16.mxu0 %v6608_v35  ;;  %v6617_v1 = vld [vmem:[%s7755_s10 + $0x44] ss:$8 sps:$4 sm:$0xff]   ;;  %v6620_v18 = vld [vmem:[%s7755_s10 + $0x54] ss:$8 sps:$4 sm:$0xff]   ;;  %v6622_v49 = vld [vmem:[%s7755_s10 + $0x50] ss:$8 sps:$4 sm:$0xff]  }
 0x3d4   : > { %4142 = vmatprep.mubr.bf16.mxu0 %v3271_v56  ;;  %v6619_v56 = vld [vmem:[%s7755_s10 + $0x40] ss:$8 sps:$4 sm:$0xff]   ;;  %v6628_v4 = vld [vmem:[%s7755_s10 + $0x70] ss:$8 sps:$4 sm:$0xff]   ;;  %v6629_v35 = vld [vmem:[%s7755_s10 + $0x84] ss:$8 sps:$4 sm:$0xff]  }
 0x3d5   : > { %v10893_v17 = vmax.f32 %v8258_v33, 0.0  ;;  %v9479_v33 = vld [vmem:[%s7755_s10 + $0x354] ss:$8 sps:$4 sm:$0xff]   ;;  %s11128_s12 = sld [smem:[#allocation30_spill]] }
 0x3d6   : > { %4113 = vmatpush1.bf16.msra.mxu0 %v6610_v53  ;;  %v6623_v53 = vld [vmem:[%s7755_s10 + $0x64] ss:$8 sps:$4 sm:$0xff]  }
 0x3d7   : > { %4114 = vmatprep.subr.bf16.mxu0 %v6611_v61  ;;  %v6625_v61 = vld [vmem:[%s7755_s10 + $0x60] ss:$8 sps:$4 sm:$0xff]  }
 0x3da   : > { %4115 = vmatpush1.bf16.msra.mxu0 %v6613_v8  ;;  %v6626_v8 = vld [vmem:[%s7755_s10 + $0x74] ss:$8 sps:$4 sm:$0xff]  }
 0x3db   : > { %4116 = vmatprep.subr.bf16.mxu0 %v6614_v43  ;;  %v6631_v43 = vld [vmem:[%s7755_s10 + $0x80] ss:$8 sps:$4 sm:$0xff]   ;;  %p5783_p8 = scmp.ne.s32.totalorder %s11128_s12, 1 }
 0x3de   : > { %4117 = vmatpush1.bf16.msra.mxu0 %v6616_v16  ;;  %v6632_v16 = vld [vmem:[%s7755_s10 + $0x94] ss:$8 sps:$4 sm:$0xff]  }
 0x3df   : > { %4118 = vmatprep.subr.bf16.mxu0 %v6617_v1  ;;  %v6634_v1 = vld [vmem:[%s7755_s10 + $0x90] ss:$8 sps:$4 sm:$0xff]  }
 0x3e2   : > { %4119 = vmatpush1.bf16.msra.mxu0 %v6619_v56  ;;  %v6635_v56 = vld [vmem:[%s7755_s10 + $0xa4] ss:$8 sps:$4 sm:$0xff]  }
 0x3e3   : > { %4120 = vmatprep.subr.bf16.mxu0 %v6620_v18  ;;  %v6637_v18 = vld [vmem:[%s7755_s10 + $0xa0] ss:$8 sps:$4 sm:$0xff]  }
 0x3e6   : > { %4121 = vmatpush1.bf16.msra.mxu0 %v6622_v49  ;;  %v6638_v49 = vld [vmem:[%s7755_s10 + $0xb4] ss:$8 sps:$4 sm:$0xff]  }
 0x3e7   : > { %4122 = vmatprep.subr.bf16.mxu0 %v6623_v53  ;;  %v6640_v53 = vld [vmem:[%s7755_s10 + $0xb0] ss:$8 sps:$4 sm:$0xff]  }
 0x3ea   : > { %4123 = vmatpush1.bf16.msra.mxu0 %v6625_v61  ;;  %v6641_v61 = vld [vmem:[%s7755_s10 + $0xc4] ss:$8 sps:$4 sm:$0xff]  }
 0x3eb   : > { %4124 = vmatprep.subr.bf16.mxu0 %v6626_v8  ;;  %v6643_v8 = vld [vmem:[%s7755_s10 + $0xc0] ss:$8 sps:$4 sm:$0xff]  }
 0x3ee   : > { %4125 = vmatpush1.bf16.msra.mxu0 %v6628_v4  ;;  %v6644_v4 = vld [vmem:[%s7755_s10 + $0xd4] ss:$8 sps:$4 sm:$0xff]  }
 0x3ef   : > { %4126 = vmatprep.subr.bf16.mxu0 %v6629_v35  ;;  %v6646_v35 = vld [vmem:[%s7755_s10 + $0xd0] ss:$8 sps:$4 sm:$0xff]  }
 0x3f2   : > { %4127 = vmatpush1.bf16.msra.mxu0 %v6631_v43  ;;  %v9425_v43 = vld [vmem:[%s7755_s10 + $0x304] ss:$8 sps:$4 sm:$0xff]  }
 0x3f3   : > { %4128 = vmatprep.subr.bf16.mxu0 %v6632_v16  ;;  %10884 = vst [vmem:[#allocation132_spill] sm:$0xff] %v9425_v43  ;;  %v9428_v16 = vld [vmem:[%s7755_s10 + $0x300] ss:$8 sps:$4 sm:$0xff]   ;;  %5888 = vmatprep.subr.bf16.mxu1 %v9425_v43 }
 0x3f4   : > { %10885 = vst [vmem:[#allocation133_spill] sm:$0xff] %v9428_v16  ;;  %5904 = vmatpush1.bf16.msra.mxu1 %v9428_v16  ;;  %v10890_v16 = vmax.f32 %v8205_v50, 0.0  ;;  %v9471_v50 = vld [vmem:[%s7755_s10 + $0x344] ss:$8 sps:$4 sm:$0xff]  }
 0x3f6   : > { %4129 = vmatpush1.bf16.msra.mxu0 %v6634_v1  ;;  %v6647_v1 = vld [vmem:[%s7755_s10 + $0xe4] ss:$8 sps:$4 sm:$0xff]  }
 0x3f7   : > { %4130 = vmatprep.subr.bf16.mxu0 %v6635_v56  ;;  %v9434_v56 = vld [vmem:[%s7755_s10 + $0x314] ss:$8 sps:$4 sm:$0xff]  }
 0x3f8   : > { %10886 = vst [vmem:[#allocation134_spill] sm:$0xff] %v9434_v56  ;;  %5889 = vmatprep.subr.bf16.mxu1 %v9434_v56  ;;  %v10889_v56 = vmax.f32 %v8195_v37, 0.0  ;;  %v6658_v37 = vld [vmem:[%s7755_s10 + $0x114] ss:$8 sps:$4 sm:$0xff]  }
 0x3fa   : > { %4131 = vmatpush1.bf16.msra.mxu0 %v6637_v18  ;;  %v9437_v18 = vld [vmem:[%s7755_s10 + $0x310] ss:$8 sps:$4 sm:$0xff]   ;;  %v3270_v43 = vpack.c.bf16 %v10890_v16, %v10889_v56  ;;  %v9475_v16 = vld [vmem:[%s7755_s10 + $0x340] ss:$8 sps:$4 sm:$0xff]   ;;  %v10894_v56 = vmax.f32 %v8243_v10, 0.0 }
 0x3fb   : > { %4132 = vmatprep.subr.bf16.mxu0 %v6638_v49  ;;  %10887 = vst [vmem:[#allocation135_spill] sm:$0xff] %v9437_v18  ;;  %v6649_v49 = vld [vmem:[%s7755_s10 + $0xe0] ss:$8 sps:$4 sm:$0xff]   ;;  %5905 = vmatpush1.bf16.msra.mxu1 %v9437_v18  ;;  %v9461_v18 = vld [vmem:[%s7755_s10 + $0x330] ss:$8 sps:$4 sm:$0xff]  }
 0x3fc   : > { %10891 = vst [vmem:[#allocation137_spill] sm:$0xff] %v9461_v18  ;;  %v9499_v10 = vld [vmem:[%s7755_s10 + $0x364] ss:$8 sps:$4 sm:$0xff]  }
 0x3fe   : > { %4133 = vmatpush1.bf16.msra.mxu0 %v6640_v53  ;;  %v6650_v53 = vld [vmem:[%s7755_s10 + $0xf4] ss:$8 sps:$4 sm:$0xff]  }
 0x3ff   : > { %4134 = vmatprep.subr.bf16.mxu0 %v6641_v61  ;;  %v9443_v61 = vld [vmem:[%s7755_s10 + $0x324] ss:$8 sps:$4 sm:$0xff]  }
 0x400   : > { %10888 = vst [vmem:[#allocation136_spill] sm:$0xff] %v9443_v61  ;;  %5890 = vmatprep.subr.bf16.mxu1 %v9443_v61  ;;  %v10892_v61 = vmax.f32 %v8247_v14, 0.0  ;;  %v6656_v14 = vld [vmem:[%s7755_s10 + $0x110] ss:$8 sps:$4 sm:$0xff]  }
 0x402   : > { %4135 = vmatpush1.bf16.msra.mxu0 %v6643_v8  ;;  %v9447_v8 = vld [vmem:[%s7755_s10 + $0x320] ss:$8 sps:$4 sm:$0xff]  }
 0x403   : > { %4136 = vmatprep.subr.bf16.mxu0 %v6644_v4  ;;  %v6652_v4 = vld [vmem:[%s7755_s10 + $0xf0] ss:$8 sps:$4 sm:$0xff]   ;;  %5906 = vmatpush1.bf16.msra.mxu1 %v9447_v8 }
 0x406   : > { %4137 = vmatpush1.bf16.msra.mxu0 %v6646_v35  ;;  %v9452_v35 = vld [vmem:[%s7755_s10 + $0x334] ss:$8 sps:$4 sm:$0xff]  }
 0x407   : > { %4138 = vmatprep.subr.bf16.mxu0 %v6647_v1  ;;  %v6655_v1 = vld [vmem:[%s7755_s10 + $0x104] ss:$8 sps:$4 sm:$0xff]   ;;  %5891 = vmatprep.subr.bf16.mxu1 %v9452_v35 }
 0x408   : > { %5907 = vmatpush1.bf16.msra.mxu1 %v9461_v18 }
 0x409   : > { %5892 = vmatprep.subr.bf16.mxu1 %v9471_v50 }
 0x40a   : > { %4139 = vmatpush1.bf16.msra.mxu0 %v6649_v49  ;;  %v6653_v49 = vld [vmem:[%s7755_s10 + $0x100] ss:$8 sps:$4 sm:$0xff]  }
 0x40b   : > { %4140 = vmatprep.subr.bf16.mxu0 %v6650_v53  ;;  %v3279_v53 = vpack.c.bf16 %v10893_v17, %v10892_v61  ;;  %v6661_v17 = vld [vmem:[%s7755_s10 + $0x124] ss:$8 sps:$4 sm:$0xff]  }
 0x40c   : > { %5908 = vmatpush1.bf16.msra.mxu1 %v9475_v16 }
 0x40d   : > { %5893 = vmatprep.subr.bf16.mxu1 %v9479_v33 }
 0x40e   : > { %4141 = vmatpush1.bf16.msra.mxu0 %v6652_v4  ;;  %v9489_v4 = vld [vmem:[%s7755_s10 + $0x350] ss:$8 sps:$4 sm:$0xff]  }
 0x40f   : > { %4233 = vmatprep.subr.bf16.mxu0 %v6655_v1  ;;  %v6659_v1 = vld [vmem:[%s7755_s10 + $0x120] ss:$8 sps:$4 sm:$0xff]  }
 0x410   : > { %5909 = vmatpush1.bf16.msra.mxu1 %v9489_v4 }
 0x411   : > { %4143 = vmatmul.mubr.bf16.vlgmr.msra.gmra.mrb[72].mxu0 %v3270_v43  ;;  %v10895_v43 = vmax.f32 %v8253_v27, 0.0  ;;  %v9503_v27 = vld [vmem:[%s7755_s10 + $0x360] ss:$8 sps:$4 sm:$0xff]   ;;  %5894 = vmatprep.subr.bf16.mxu1 %v9499_v10 }
 0x412   : > { %4234 = vmatpush1.bf16.msra.mxu0 %v6653_v49  ;;  %4152 = vmatprep.mubr.bf16.mxu0 %v3279_v53  ;;  %v6664_v49 = vld [vmem:[%s7755_s10 + $0x134] ss:$8 sps:$4 sm:$0xff]   ;;  %v10896_v53 = vmax.f32 %v8293_v28, 0.0 }
 0x413   : > { %4235 = vmatprep.subr.bf16.mxu0 %v6658_v37  ;;  %v3278_v61 = vpack.c.bf16 %v10895_v43, %v10894_v56  ;;  %v10897_v37 = vmax.f32 %v8304_v24, 0.0  ;;  %v9507_v28 = vld [vmem:[%s7755_s10 + $0x374] ss:$8 sps:$4 sm:$0xff]   ;;  %v6667_v24 = vld [vmem:[%s7755_s10 + $0x144] ss:$8 sps:$4 sm:$0xff]   ;;  %v10899_v56 = vmax.f32 %v8299_v31, 0.0 }
 0x414   : > { %5910 = vmatpush1.bf16.msra.mxu1 %v9503_v27  ;;  %v9530_v31 = vld [vmem:[%s7755_s10 + $0x380] ss:$8 sps:$4 sm:$0xff]  }
 0x415   : > { %v3287_v18 = vpack.c.bf16 %v10897_v37, %v10896_v53  ;;  %v6670_v37 = vld [vmem:[%s7755_s10 + $0x154] ss:$8 sps:$4 sm:$0xff]   ;;  %5895 = vmatprep.subr.bf16.mxu1 %v9507_v28 }
 0x416   : > { %4236 = vmatpush1.bf16.msra.mxu0 %v6656_v14  ;;  %v6662_v14 = vld [vmem:[%s7755_s10 + $0x130] ss:$8 sps:$4 sm:$0xff]  }
 0x417   : > { %4237 = vmatprep.subr.bf16.mxu0 %v6661_v17  ;;  %v10898_v17 = vmax.f32 %v8289_v2, 0.0  ;;  %v9527_v2 = vld [vmem:[%s7755_s10 + $0x384] ss:$8 sps:$4 sm:$0xff]  }
 0x419   : > { %4153 = vmatmul.mubr.bf16.gmra.mrb[76].mxu0 %v3278_v61  ;;  %v3286_v43 = vpack.c.bf16 %v10899_v56, %v10898_v17  ;;  %v9517_v61 = vld [vmem:[%s7755_s10 + $0x370] ss:$8 sps:$4 sm:$0xff]   ;;  %v10903_v17 = vmax.f32 %v8343_v32, 0.0  ;;  %v9555_v32 = vld [vmem:[%s7755_s10 + $0x3a4] ss:$8 sps:$4 sm:$0xff]  }
 0x41a   : > { %4238 = vmatpush1.bf16.msra.mxu0 %v6659_v1  ;;  %4162 = vmatprep.mubr.bf16.mxu0 %v3287_v18  ;;  %v6665_v18 = vld [vmem:[%s7755_s10 + $0x140] ss:$8 sps:$4 sm:$0xff]   ;;  %v10900_v1 = vmax.f32 %v8339_v34, 0.0  ;;  %v6668_v34 = vld [vmem:[%s7755_s10 + $0x150] ss:$8 sps:$4 sm:$0xff]  }
 0x41b   : > { %4239 = vmatprep.subr.bf16.mxu0 %v6664_v49  ;;  %v10901_v49 = vmax.f32 %v8348_v57, 0.0  ;;  %5911 = vmatpush1.bf16.msra.mxu1 %v9517_v61  ;;  %v9535_v57 = vld [vmem:[%s7755_s10 + $0x394] ss:$8 sps:$4 sm:$0xff]  }
 0x41c   : > { %5896 = vmatprep.subr.bf16.mxu1 %v9527_v2 }
 0x41d   : > { %v3295_v53 = vpack.c.bf16 %v10901_v49, %v10900_v1  ;;  %v10904_v1 = vmax.f32 %v8381_v15, 0.0  ;;  %v10905_v49 = vmax.f32 %v8390_v55, 0.0  ;;  %v6674_v15 = vld [vmem:[%s7755_s10 + $0x170] ss:$8 sps:$4 sm:$0xff]   ;;  %v9563_v55 = vld [vmem:[%s7755_s10 + $0x3b4] ss:$8 sps:$4 sm:$0xff]  }
 0x41e   : > { %4240 = vmatpush1.bf16.msra.mxu0 %v6662_v14  ;;  %v6673_v14 = vld [vmem:[%s7755_s10 + $0x164] ss:$8 sps:$4 sm:$0xff]  }
 0x41f   : > { %4241 = vmatprep.subr.bf16.mxu0 %v6667_v24  ;;  %v10902_v24 = vmax.f32 %v8335_v41, 0.0  ;;  %5912 = vmatpush1.bf16.msra.mxu1 %v9530_v31  ;;  %v6676_v41 = vld [vmem:[%s7755_s10 + $0x174] ss:$8 sps:$4 sm:$0xff]  }
 0x420   : > { %5897 = vmatprep.subr.bf16.mxu1 %v9535_v57 }
 0x421   : > { %4163 = vmatmul.mubr.bf16.gmra.mrb[80].mxu0 %v3286_v43  ;;  %v3294_v56 = vpack.c.bf16 %v10903_v17, %v10902_v24  ;;  %v9545_v43 = vld [vmem:[%s7755_s10 + $0x390] ss:$8 sps:$4 sm:$0xff]   ;;  %v10907_v24 = vmax.f32 %v8385_v59, 0.0  ;;  %v10911_v59 = vmax.f32 %v9163_v45, 0.0  ;;  %v6685_v45 = vld [vmem:[%s7755_s10 + $0x1a4] ss:$8 sps:$4 sm:$0xff]  }
 0x422   : > { %4242 = vmatpush1.bf16.msra.mxu0 %v6665_v18  ;;  %4172 = vmatprep.mubr.bf16.mxu0 %v3295_v53  ;;  %v6671_v18 = vld [vmem:[%s7755_s10 + $0x160] ss:$8 sps:$4 sm:$0xff]   ;;  %v3303_v53 = vpack.c.bf16 %v10905_v49, %v10904_v1  ;;  %v10908_v1 = vmax.f32 %v8423_v42, 0.0  ;;  %v10909_v49 = vmax.f32 %v8432_v3, 0.0  ;;  %v6680_v3 = vld [vmem:[%s7755_s10 + $0x190] ss:$8 sps:$4 sm:$0xff]  }
 0x423   : > { %4243 = vmatprep.subr.bf16.mxu0 %v6670_v37  ;;  %5913 = vmatpush1.bf16.msra.mxu1 %v9545_v43  ;;  %v9559_v37 = vld [vmem:[%s7755_s10 + $0x3a0] ss:$8 sps:$4 sm:$0xff]  }
 0x424   : > { %5898 = vmatprep.subr.bf16.mxu1 %v9555_v32  ;;  %v9591_v42 = vld [vmem:[%s7755_s10 + $0x3c0] ss:$8 sps:$4 sm:$0xff]  }
 0x426   : > { %4244 = vmatpush1.bf16.msra.mxu0 %v6668_v34  ;;  %v6679_v34 = vld [vmem:[%s7755_s10 + $0x184] ss:$8 sps:$4 sm:$0xff]  }
 0x427   : > { %4245 = vmatprep.subr.bf16.mxu0 %v6673_v14  ;;  %v10906_v14 = vmax.f32 %v8377_v52, 0.0  ;;  %5914 = vmatpush1.bf16.msra.mxu1 %v9559_v37  ;;  %v10910_v52 = vmax.f32 %v9155_v6, 0.0  ;;  %v9595_v6 = vld [vmem:[%s7755_s10 + $0x3d4] ss:$8 sps:$4 sm:$0xff]  }
 0x428   : > { %5899 = vmatprep.subr.bf16.mxu1 %v9563_v55 }
 0x429   : > { %4173 = vmatmul.mubr.bf16.gmra.mrb[84].mxu0 %v3294_v56  ;;  %v3302_v17 = vpack.c.bf16 %v10907_v24, %v10906_v14  ;;  %v9573_v56 = vld [vmem:[%s7755_s10 + $0x3b0] ss:$8 sps:$4 sm:$0xff]   ;;  %v6682_v14 = vld [vmem:[%s7755_s10 + $0x194] ss:$8 sps:$4 sm:$0xff]   ;;  %v9587_v24 = vld [vmem:[%s7755_s10 + $0x3c4] ss:$8 sps:$4 sm:$0xff]  }
 0x42a   : > { %4246 = vmatpush1.bf16.msra.mxu0 %v6671_v18  ;;  %4182 = vmatprep.mubr.bf16.mxu0 %v3303_v53  ;;  %v6677_v18 = vld [vmem:[%s7755_s10 + $0x180] ss:$8 sps:$4 sm:$0xff]   ;;  %v3311_v53 = vpack.c.bf16 %v10909_v49, %v10908_v1  ;;  %v10914_v49 = vmax.f32 %v8457_v22, 0.0  ;;  %v6686_v22 = vld [vmem:[%s7755_s10 + $0x1b0] ss:$8 sps:$4 sm:$0xff]  }
 0x42b   : > { %4247 = vmatprep.subr.bf16.mxu0 %v6676_v41  ;;  %v3293_v41 = vpack.c.bf16 %v10911_v59, %v10910_v52  ;;  %5915 = vmatpush1.bf16.msra.mxu1 %v9573_v56  ;;  %v6683_v1 = vld [vmem:[%s7755_s10 + $0x1a0] ss:$8 sps:$4 sm:$0xff]  }
 0x42c   : > { %5900 = vmatprep.subr.bf16.mxu1 %v9587_v24  ;;  %v9619_v59 = vld [vmem:[%s7755_s10 + $0x3e0] ss:$8 sps:$4 sm:$0xff]  }
 0x42d   : > { %4531 = vmatprep.mubr.bf16.mxu1 %v3293_v41  ;;  %v9623_v41 = vld [vmem:[%s7755_s10 + $0x3f4] ss:$8 sps:$4 sm:$0xff]  }
 0x42e   : > { %4248 = vmatpush1.bf16.msra.mxu0 %v6674_v15  ;;  %v10912_v15 = vmax.f32 %v8419_v51, 0.0  ;;  %v6688_v51 = vld [vmem:[%s7755_s10 + $0x1b4] ss:$8 sps:$4 sm:$0xff]  }
 0x42f   : > { %4249 = vmatprep.subr.bf16.mxu0 %v6679_v34  ;;  %v10913_v34 = vmax.f32 %v8427_v5, 0.0  ;;  %5916 = vmatpush1.bf16.msra.mxu1 %v9591_v42  ;;  %v9615_v5 = vld [vmem:[%s7755_s10 + $0x3e4] ss:$8 sps:$4 sm:$0xff]  }
 0x430   : > { %5901 = vmatprep.subr.bf16.mxu1 %v9595_v6 }
 0x431   : > { %4183 = vmatmul.mubr.bf16.gmra.mrb[88].mxu0 %v3302_v17  ;;  %v3310_v17 = vpack.c.bf16 %v10913_v34, %v10912_v15  ;;  %v9633_v15 = vld [vmem:[%s7755_s10 + $0x3f0] ss:$8 sps:$4 sm:$0xff]   ;;  %v6689_v34 = vld [vmem:[%s7755_s10 + $0x1c0] ss:$8 sps:$4 sm:$0xff]  }
 0x432   : > { %4250 = vmatpush1.bf16.msra.mxu0 %v6677_v18  ;;  %4192 = vmatprep.mubr.bf16.mxu0 %v3311_v53  ;;  %v9605_v18 = vld [vmem:[%s7755_s10 + $0x3d0] ss:$8 sps:$4 sm:$0xff]   ;;  %v10915_v53 = vmax.f32 %v8466_v11, 0.0  ;;  %v6691_v11 = vld [vmem:[%s7755_s10 + $0x1c4] ss:$8 sps:$4 sm:$0xff]  }
 0x433   : > { %4251 = vmatprep.subr.bf16.mxu0 %v6682_v14  ;;  %5917 = vmatpush1.bf16.msra.mxu1 %v9605_v18  ;;  %v10916_v14 = vmax.f32 %v8453_v26, 0.0  ;;  %v6694_v26 = vld [vmem:[%s7755_s10 + $0x1d4] ss:$8 sps:$4 sm:$0xff]  }
 0x434   : > { %v3319_v52 = vpack.c.bf16 %v10915_v53, %v10914_v49  ;;  %5902 = vmatprep.subr.bf16.mxu1 %v9615_v5  ;;  %v10921_v53 = vmax.f32 %v9159_v47, 0.0  ;;  %v10924_v47 = vmax.f32 %v8487_v54, 0.0  ;;  %v10930_v54 = vmax.f32 %v9211_v60, 0.0 }
 0x435   : > { %v10934_v60 = vmax.f32 %v8669_v0, 0.0  ;;  %v10941_v0 = vld [vmem:[#allocation54_spill] sm:$0xff] }
 0x436   : > { %4252 = vmatpush1.bf16.msra.mxu0 %v6680_v3  ;;  %v10917_v3 = vmax.f32 %v8461_v39, 0.0  ;;  %v10920_v39 = vmax.f32 %v9152_v13, 0.0  ;;  %v10925_v13 = vmax.f32 %v8495_v38, 0.0  ;;  %v10931_v38 = vmax.f32 %v9219_v62, 0.0 }
 0x437   : > { %4253 = vmatprep.subr.bf16.mxu0 %v6685_v45  ;;  %5918 = vmatpush1.bf16.msra.mxu1 %v9619_v59  ;;  %v10935_v62 = vmax.f32 %v8683_v12, 0.0  ;;  %v10943_v12 = vld [vmem:[#allocation55_spill] sm:$0xff] }
 0x438   : > { %v3318_v45 = vpack.c.bf16 %v10917_v3, %v10916_v14  ;;  %5903 = vmatprep.subr.bf16.mxu1 %v9623_v41  ;;  %v3326_v14 = vpack.c.bf16 %v10925_v13, %v10924_v47  ;;  %v10944_v47 = vmax.f32 %v10943_v12, 0.0 }
 0x439   : > { %4193 = vmatmul.mubr.bf16.gmra.mrb[92].mxu0 %v3310_v17  ;;  %v10918_v17 = vmax.f32 %v8491_v21, 0.0  ;;  %v10923_v21 = vmax.f32 %v9191_v36, 0.0  ;;  %v10927_v36 = vmax.f32 %v8534_v7, 0.0  ;;  %v6703_v7 = vld [vmem:[%s7755_s10 + $0x204] ss:$8 sps:$4 sm:$0xff]  }
 0x43a   : > { %4254 = vmatpush1.bf16.msra.mxu0 %v6683_v1  ;;  %4202 = vmatprep.mubr.bf16.mxu0 %v3319_v52  ;;  %v10919_v1 = vmax.f32 %v8500_v46, 0.0  ;;  %v3292_v52 = vpack.c.bf16 %v10921_v53, %v10920_v39  ;;  %v10932_v39 = vmax.f32 %v8521_v23, 0.0  ;;  %v3273_v53 = vpack.c.bf16 %v10935_v62, %v10934_v60  ;;  %v10958_v60 = vld [vmem:[#allocation62_spill] sm:$0xff] }
 0x43b   : > { %4255 = vmatprep.subr.bf16.mxu0 %v6688_v51  ;;  %5919 = vmatpush1.bf16.msra.mxu1 %v9633_v15  ;;  %v10922_v51 = vmax.f32 %v9183_v9, 0.0  ;;  %v10926_v9 = vmax.f32 %v8525_v58, 0.0  ;;  %v6698_v58 = vld [vmem:[%s7755_s10 + $0x1f0] ss:$8 sps:$4 sm:$0xff]   ;;  %v10938_v23 = vmax.f32 %v9239_v20, 0.0  ;;  %v10959_v62 = vmax.f32 %v10958_v60, 0.0 }
 0x43c   : > { %v3327_v49 = vpack.c.bf16 %v10919_v1, %v10918_v17  ;;  %v10928_v17 = vmax.f32 %v9180_v29, 0.0  ;;  %v10929_v1 = vmax.f32 %v9187_v19, 0.0  ;;  %v10933_v29 = vmax.f32 %v8529_v63, 0.0  ;;  %v6706_v20 = vld [vmem:[%s7755_s10 + $0x214] ss:$8 sps:$4 sm:$0xff]  }
 0x43d   : > { %v3301_v46 = vpack.c.bf16 %v10923_v21, %v10922_v51  ;;  %v3335_v3 = vpack.c.bf16 %v10927_v36, %v10926_v9  ;;  %v10937_v51 = vmax.f32 %v9215_v25, 0.0  ;;  %v10947_v9 = vld [vmem:[#allocation64_spill] sm:$0xff] }
 0x43e   : > { %4256 = vmatpush1.bf16.msra.mxu0 %v6686_v22  ;;  %v6692_v22 = vld [vmem:[%s7755_s10 + $0x1d0] ss:$8 sps:$4 sm:$0xff]   ;;  %4532 = vmatmul.mubr.bf16.vlgmr.msra.gmra.mrb[108].mxu1 %v3292_v52  ;;  %v3334_v19 = vpack.c.bf16 %v10933_v29, %v10932_v39  ;;  %v10936_v52 = vmax.f32 %v9208_v44, 0.0  ;;  %v6701_v44 = vld [vmem:[%s7755_s10 + $0x200] ss:$8 sps:$4 sm:$0xff]   ;;  %v10948_v36 = vmax.f32 %v10947_v9, 0.0 }
 0x43f   : > { %4257 = vmatprep.subr.bf16.mxu0 %v6691_v11  ;;  %v6697_v11 = vld [vmem:[%s7755_s10 + $0x1e4] ss:$8 sps:$4 sm:$0xff]   ;;  %4541 = vmatprep.mubr.bf16.mxu1 %v3301_v46  ;;  %v10956_v29 = vld [vmem:[#allocation60_spill] sm:$0xff] }
 0x440   : > { %v3308_v21 = vpack.c.bf16 %v10937_v51, %v10936_v52  ;;  %v10939_v46 = vld [vmem:[#allocation122_spill] sm:$0xff]  ;;  %v6707_v52 = vld [vmem:[%s7755_s10 + $0x220] ss:$8 sps:$4 sm:$0xff]  }
 0x441   : > { %4203 = vmatmul.mubr.bf16.gmra.mrb[96].mxu0 %v3318_v45  ;;  %v6695_v45 = vld [vmem:[%s7755_s10 + $0x1e0] ss:$8 sps:$4 sm:$0xff]   ;;  %v10940_v63 = vmax.f32 %v10939_v46, 0.0  ;;  %v6709_v39 = vld [vmem:[%s7755_s10 + $0x224] ss:$8 sps:$4 sm:$0xff]  }
 0x442   : > { %4212 = vmatprep.mubr.bf16.mxu0 %v3327_v49  ;;  %4258 = vmatpush1.bf16.msra.mxu0 %v6689_v34  ;;  %v6700_v34 = vld [vmem:[%s7755_s10 + $0x1f4] ss:$8 sps:$4 sm:$0xff]   ;;  %v3300_v49 = vpack.c.bf16 %v10929_v1, %v10928_v17  ;;  %v10951_v17 = vld [vmem:[#allocation121_spill] sm:$0xff] }
 0x443   : > { %4259 = vmatprep.subr.bf16.mxu0 %v6694_v26  ;;  %v3309_v26 = vpack.c.bf16 %v10931_v38, %v10930_v54  ;;  %v10952_v1 = vmax.f32 %v10951_v17, 0.0  ;;  %v10953_v54 = vld [vmem:[#allocation124_spill] sm:$0xff]  ;;  %v10960_v51 = vld [vmem:[#allocation69_spill] sm:$0xff] }
 0x444   : > { %v10954_v38 = vmax.f32 %v10953_v54, 0.0  ;;  %v10976_v54 = vld [vmem:[#allocation77_spill] sm:$0xff]  ;;  %v10982_v60 = vld [vmem:[#allocation128_spill] sm:$0xff] }
 0x446   : > { %4260 = vmatpush1.bf16.msra.mxu0 %v6692_v22  ;;  %4542 = vmatmul.mubr.bf16.gmra.mrb[112].mxu1 %v3300_v49  ;;  %v3317_v22 = vpack.c.bf16 %v10940_v63, %v10938_v23  ;;  %v6712_v63 = vld [vmem:[%s7755_s10 + $0x234] ss:$8 sps:$4 sm:$0xff]  }
 0x447   : > { %4261 = vmatprep.subr.bf16.mxu0 %v6697_v11  ;;  %4551 = vmatprep.mubr.bf16.mxu1 %v3309_v26  ;;  %v10942_v11 = vmax.f32 %v10941_v0, 0.0  ;;  %v10955_v26 = vmax.f32 %v9275_v30, 0.0  ;;  %v10962_v30 = vld [vmem:[#allocation72_spill] sm:$0xff] }
 0x448   : > { %v10963_v23 = vmax.f32 %v10962_v30, 0.0  ;;  %v6716_v30 = vld [vmem:[%s7755_s10 + $0x250] ss:$8 sps:$4 sm:$0xff]  }
 0x449   : > { %4213 = vmatmul.mubr.bf16.gmra.mrb[100].mxu0 %v3326_v14  ;;  %v3272_v13 = vpack.c.bf16 %v10944_v47, %v10942_v11  ;;  %v10945_v14 = vld [vmem:[#allocation61_spill] sm:$0xff] }
 0x44a   : > { %4222 = vmatprep.mubr.bf16.mxu0 %v3335_v3  ;;  %4262 = vmatpush1.bf16.msra.mxu0 %v6695_v45  ;;  %v10946_v25 = vmax.f32 %v10945_v14, 0.0  ;;  %v10949_v45 = vld [vmem:[#allocation120_spill] sm:$0xff]  ;;  %v10966_v11 = vld [vmem:[#allocation125_spill] sm:$0xff] }
 0x44b   : > { %4263 = vmatprep.subr.bf16.mxu0 %v6700_v34  ;;  %v10950_v34 = vmax.f32 %v10949_v45, 0.0  ;;  %v10967_v12 = vmax.f32 %v10966_v11, 0.0  ;;  %v10970_v14 = vld [vmem:[#allocation129_spill] sm:$0xff] }
 0x44c   : > { %v3281_v3 = vpack.c.bf16 %v10948_v36, %v10946_v25  ;;  %v10971_v25 = vmax.f32 %v10970_v14, 0.0  ;;  %v6710_v36 = vld [vmem:[%s7755_s10 + $0x230] ss:$8 sps:$4 sm:$0xff]   ;;  %v6730_v14 = vld [vmem:[%s7755_s10 + $0x274] ss:$8 sps:$4 sm:$0xff]  }
 0x44d   : > { %v3316_v49 = vpack.c.bf16 %v10952_v1, %v10950_v34  ;;  %v10974_v34 = vld [vmem:[#allocation70_spill] sm:$0xff] }
 0x44e   : > { %4264 = vmatpush1.bf16.msra.mxu0 %v6698_v58  ;;  %4552 = vmatmul.mubr.bf16.gmra.mrb[116].mxu1 %v3308_v21  ;;  %v3325_v58 = vpack.c.bf16 %v10955_v26, %v10954_v38  ;;  %v10961_v21 = vmax.f32 %v10960_v51, 0.0  ;;  %v10975_v17 = vmax.f32 %v10974_v34, 0.0  ;;  %v10977_v38 = vmax.f32 %v10976_v54, 0.0  ;;  %v10978_v26 = vld [vmem:[#allocation80_spill] sm:$0xff]  ;;  %v6736_v34 = vld [vmem:[%s7755_s10 + $0x284] ss:$8 sps:$4 sm:$0xff]  }
 0x44f   : > { %4356 = vmatprep.subr.bf16.mxu0 %v6703_v7  ;;  %4561 = vmatprep.mubr.bf16.mxu1 %v3317_v22  ;;  %v6704_v7 = vld [vmem:[%s7755_s10 + $0x210] ss:$8 sps:$4 sm:$0xff]   ;;  %v10985_v51 = vmax.f32 %v9331_v40, 0.0 }
 0x450   : > { %v3289_v46 = vpack.c.bf16 %v10963_v23, %v10961_v21  ;;  %v10964_v22 = vld [vmem:[#allocation123_spill] sm:$0xff]  ;;  %v6724_v23 = vld [vmem:[%s7755_s10 + $0x264] ss:$8 sps:$4 sm:$0xff]  }
 0x451   : > { %4223 = vmatmul.mubr.bf16.gmra.mrb[104].mxu0 %v3334_v19  ;;  %v10957_v19 = vmax.f32 %v10956_v29, 0.0  ;;  %v10965_v0 = vmax.f32 %v10964_v22, 0.0  ;;  %v10980_v29 = vld [vmem:[#allocation126_spill] sm:$0xff] }
 0x452   : > { %4265 = vmatprep.mubr.bf16.mxu0 %v3273_v53  ;;  %v10988_v22 = vld [vmem:[#allocation78_spill] sm:$0xff] }
 0x453   : > { %v3280_v53 = vpack.c.bf16 %v10959_v62, %v10957_v19  ;;  %v3324_v47 = vpack.c.bf16 %v10967_v12, %v10965_v0  ;;  %v10981_v19 = vmax.f32 %v10980_v29, 0.0  ;;  %v10983_v62 = vmax.f32 %v10982_v60, 0.0  ;;  %v10990_v12 = vld [vmem:[#allocation85_spill] sm:$0xff]  ;;  %v6744_v60 = vld [vmem:[%s7755_s10 + $0x294] ss:$8 sps:$4 sm:$0xff]  }
 0x454   : > { %v10989_v0 = vmax.f32 %v10988_v22, 0.0  ;;  %v10991_v40 = vmax.f32 %v10990_v12, 0.0  ;;  %v6757_v12 = vld [vmem:[%s7755_s10 + $0x2b4] ss:$8 sps:$4 sm:$0xff]  }
 0x456   : > { %4562 = vmatmul.mubr.bf16.gmra.mrb[120].mxu1 %v3316_v49  ;;  %v6713_v49 = vld [vmem:[%s7755_s10 + $0x240] ss:$8 sps:$4 sm:$0xff]  }
 0x457   : > { %4571 = vmatprep.mubr.bf16.mxu1 %v3325_v58  ;;  %v10979_v58 = vmax.f32 %v10978_v26, 0.0  ;;  %v6734_v26 = vld [vmem:[%s7755_s10 + $0x280] ss:$8 sps:$4 sm:$0xff]  }
 0x459   : > { %4266 = vmatmul.mubr.bf16.vlgmr.msra.gmra.mrb[72].mxu0 %v3272_v13  ;;  %v10968_v13 = vld [vmem:[#allocation127_spill] sm:$0xff] }
 0x45a   : > { %4357 = vmatpush1.bf16.msra.mxu0 %v6701_v44  ;;  %4275 = vmatprep.mubr.bf16.mxu0 %v3281_v3  ;;  %v10969_v44 = vmax.f32 %v10968_v13, 0.0  ;;  %v6715_v3 = vld [vmem:[%s7755_s10 + $0x244] ss:$8 sps:$4 sm:$0xff]  }
 0x45b   : > { %4358 = vmatprep.subr.bf16.mxu0 %v6706_v20  ;;  %v10972_v20 = vld [vmem:[#allocation68_spill] sm:$0xff] }
 0x45c   : > { %v3333_v9 = vpack.c.bf16 %v10971_v25, %v10969_v44  ;;  %v10973_v45 = vmax.f32 %v10972_v20, 0.0  ;;  %v10994_v25 = vld [vmem:[#allocation130_spill] sm:$0xff] }
 0x45e   : > { %4359 = vmatpush1.bf16.msra.mxu0 %v6704_v7  ;;  %4572 = vmatmul.mubr.bf16.gmra.mrb[124].mxu1 %v3324_v47  ;;  %v3288_v1 = vpack.c.bf16 %v10975_v17, %v10973_v45  ;;  %v3297_v7 = vpack.c.bf16 %v10979_v58, %v10977_v38  ;;  %v10992_v47 = vld [vmem:[#allocation88_spill] sm:$0xff]  ;;  %v6728_v45 = vld [vmem:[%s7755_s10 + $0x270] ss:$8 sps:$4 sm:$0xff]   ;;  %v11002_v58 = vld [vmem:[#allocation93_spill] sm:$0xff] }
 0x45f   : > { %4360 = vmatprep.subr.bf16.mxu0 %v6709_v39  ;;  %4581 = vmatprep.mubr.bf16.mxu1 %v3333_v9  ;;  %v6718_v39 = vld [vmem:[%s7755_s10 + $0x254] ss:$8 sps:$4 sm:$0xff]   ;;  %v10993_v13 = vmax.f32 %v10992_v47, 0.0  ;;  %v10995_v9 = vmax.f32 %v10994_v25, 0.0  ;;  %v6763_v47 = vld [vmem:[%s7755_s10 + $0x2c4] ss:$8 sps:$4 sm:$0xff]  }
 0x460   : > { %v10998_v17 = vld [vmem:[#allocation84_spill] sm:$0xff] }
 0x461   : > { %4276 = vmatmul.mubr.bf16.gmra.mrb[76].mxu0 %v3280_v53  ;;  %v3332_v53 = vpack.c.bf16 %v10983_v62, %v10981_v19  ;;  %v3305_v44 = vpack.c.bf16 %v10993_v13, %v10991_v40  ;;  %v6742_v62 = vld [vmem:[%s7755_s10 + $0x290] ss:$8 sps:$4 sm:$0xff]   ;;  %v11014_v13 = vld [vmem:[#allocation100_spill] sm:$0xff] }
 0x462   : > { %4361 = vmatpush1.bf16.msra.mxu0 %v6707_v52  ;;  %4285 = vmatprep.mubr.bf16.mxu0 %v3289_v46  ;;  %v10984_v52 = vmax.f32 %v9323_v48, 0.0  ;;  %v10986_v46 = vld [vmem:[#allocation76_spill] sm:$0xff]  ;;  %v6755_v40 = vld [vmem:[%s7755_s10 + $0x2b0] ss:$8 sps:$4 sm:$0xff]  }
 0x463   : > { %4362 = vmatprep.subr.bf16.mxu0 %v6712_v63  ;;  %v10987_v63 = vmax.f32 %v10986_v46, 0.0  ;;  %v6722_v48 = vld [vmem:[%s7755_s10 + $0x260] ss:$8 sps:$4 sm:$0xff]  }
 0x464   : > { %v3341_v21 = vpack.c.bf16 %v10985_v51, %v10984_v52  ;;  %v11006_v52 = vld [vmem:[#allocation92_spill] sm:$0xff] }
 0x465   : > { %v3296_v11 = vpack.c.bf16 %v10989_v0, %v10987_v63  ;;  %v11007_v51 = vmax.f32 %v11006_v52, 0.0  ;;  %v6748_v46 = vld [vmem:[%s7755_s10 + $0x2a0] ss:$8 sps:$4 sm:$0xff]   ;;  %v11012_v0 = vld [vmem:[#allocation103_spill] sm:$0xff] }
 0x466   : > { %4363 = vmatpush1.bf16.msra.mxu0 %v6710_v36  ;;  %4582 = vmatmul.mubr.bf16.gmra.mrb[128].mxu1 %v3332_v53  ;;  %v10996_v36 = vld [vmem:[#allocation131_spill] sm:$0xff]  ;;  %v6750_v53 = vld [vmem:[%s7755_s10 + $0x2a4] ss:$8 sps:$4 sm:$0xff]   ;;  %v6773_v52 = vld [vmem:[%s7755_s10 + $0x2e0] ss:$8 sps:$4 sm:$0xff]  }
 0x467   : > { %4364 = vmatprep.subr.bf16.mxu0 %v6715_v3  ;;  %4591 = vmatprep.mubr.bf16.mxu1 %v3341_v21  ;;  %v10997_v3 = vmax.f32 %v10996_v36, 0.0  ;;  %v11008_v21 = vld [vmem:[#allocation94_spill] sm:$0xff]  ;;  %v11010_v63 = vld [vmem:[#allocation101_spill] sm:$0xff] }
 0x468   : > { %v11011_v22 = vmax.f32 %v11010_v63, 0.0  ;;  %v6761_v36 = vld [vmem:[%s7755_s10 + $0x2c0] ss:$8 sps:$4 sm:$0xff]  }
 0x469   : > { %4286 = vmatmul.mubr.bf16.gmra.mrb[80].mxu0 %v3288_v1  ;;  %v3340_v20 = vpack.c.bf16 %v10997_v3, %v10995_v9  ;;  %v10999_v1 = vmax.f32 %v10998_v17, 0.0  ;;  %v11018_v3 = vld [vmem:[#allocation105_spill] sm:$0xff] }
 0x46a   : > { %4365 = vmatpush1.bf16.msra.mxu0 %v6713_v49  ;;  %4295 = vmatprep.mubr.bf16.mxu0 %v3297_v7  ;;  %v11000_v49 = vld [vmem:[#allocation86_spill] sm:$0xff]  ;;  %v11003_v7 = vmax.f32 %v11002_v58, 0.0 }
 0x46b   : > { %4366 = vmatprep.subr.bf16.mxu0 %v6718_v39  ;;  %v11001_v54 = vmax.f32 %v11000_v49, 0.0  ;;  %v11004_v39 = vld [vmem:[#allocation96_spill] sm:$0xff]  ;;  %v6767_v49 = vld [vmem:[%s7755_s10 + $0x2d0] ss:$8 sps:$4 sm:$0xff]  }
 0x46c   : > { %v11005_v29 = vmax.f32 %v11004_v39, 0.0  ;;  %v11024_v58 = vld [vmem:[#allocation106_spill] sm:$0xff] }
 0x46d   : > { %v3304_v38 = vpack.c.bf16 %v11001_v54, %v10999_v1  ;;  %v6769_v1 = vld [vmem:[%s7755_s10 + $0x2d4] ss:$8 sps:$4 sm:$0xff]   ;;  %v6775_v54 = vld [vmem:[%s7755_s10 + $0x2e4] ss:$8 sps:$4 sm:$0xff]  }
 0x46e   : > { %4367 = vmatpush1.bf16.msra.mxu0 %v6716_v30  ;;  %4592 = vmatmul.mubr.bf16.gmra.mrb[132].mxu1 %v3340_v20  ;;  %v3313_v19 = vpack.c.bf16 %v11005_v29, %v11003_v7  ;;  %v11009_v30 = vmax.f32 %v11008_v21, 0.0  ;;  %v11019_v20 = vmax.f32 %v11018_v3, 0.0  ;;  %v11025_v7 = vmax.f32 %v11024_v58, 0.0  ;;  %v11026_v29 = vld [vmem:[#allocation109_spill] sm:$0xff]  ;;  %v6779_v21 = vld [vmem:[%s7755_s10 + $0x2f0] ss:$8 sps:$4 sm:$0xff]  }
 0x46f   : > { %4368 = vmatprep.subr.bf16.mxu0 %v6724_v23 }
 0x470   : > { %v3312_v23 = vpack.c.bf16 %v11009_v30, %v11007_v51  ;;  %v6781_v51 = vld [vmem:[%s7755_s10 + $0x2f4] ss:$8 sps:$4 sm:$0xff]  }
 0x471   : > { %4296 = vmatmul.mubr.bf16.gmra.mrb[84].mxu0 %v3296_v11  ;;  %v11013_v11 = vmax.f32 %v11012_v0, 0.0  ;;  %v11030_v30 = vld [vmem:[#allocation108_spill] sm:$0xff]  ;;  %v11034_v0 = vld [vmem:[#allocation43_spill] sm:$0xff] }
 0x472   : > { %4369 = vmatpush1.bf16.msra.mxu0 %v6722_v48  ;;  %4305 = vmatprep.mubr.bf16.mxu0 %v3305_v44  ;;  %v11015_v44 = vmax.f32 %v11014_v13, 0.0  ;;  %v11039_v13 = vld [vmem:[#allocation42_spill] sm:$0xff] }
 0x473   : > { %4370 = vmatprep.subr.bf16.mxu0 %v6730_v14  ;;  %v3321_v48 = vpack.c.bf16 %v11013_v11, %v11011_v22  ;;  %v11016_v14 = vld [vmem:[#allocation102_spill] sm:$0xff]  ;;  %v11035_v11 = vmax.f32 %v11034_v0, 0.0  ;;  %v11066_v0 = vld [vmem:[#allocation59_spill] sm:$0xff] }
 0x474   : > { %v11017_v25 = vmax.f32 %v11016_v14, 0.0  ;;  %v11041_v14 = vld [vmem:[#allocation44_spill] sm:$0xff] }
 0x476   : > { %4371 = vmatpush1.bf16.msra.mxu0 %v6728_v45  ;;  %v3320_v9 = vpack.c.bf16 %v11017_v25, %v11015_v44  ;;  %v11020_v45 = vld [vmem:[#allocation107_spill] sm:$0xff]  ;;  %v11040_v44 = vmax.f32 %v11039_v13, 0.0  ;;  %v11042_v25 = vmax.f32 %v11041_v14, 0.0  ;;  %v11072_v13 = vld [vmem:[#allocation65_spill] sm:$0xff] }
 0x477   : > { %4372 = vmatprep.subr.bf16.mxu0 %v6736_v34  ;;  %v11021_v34 = vmax.f32 %v11020_v45, 0.0  ;;  %v11074_v14 = vld [vmem:[#allocation67_spill] sm:$0xff] }
 0x479   : > { %4306 = vmatmul.mubr.bf16.gmra.mrb[88].mxu0 %v3304_v38  ;;  %v3329_v17 = vpack.c.bf16 %v11021_v34, %v11019_v20  ;;  %v11022_v38 = vld [vmem:[#allocation104_spill] sm:$0xff]  ;;  %v11045_v20 = vld [vmem:[#allocation49_spill] sm:$0xff] }
 0x47a   : > { %4373 = vmatpush1.bf16.msra.mxu0 %v6734_v26  ;;  %4315 = vmatprep.mubr.bf16.mxu0 %v3313_v19  ;;  %v11023_v26 = vmax.f32 %v11022_v38, 0.0  ;;  %v11027_v19 = vmax.f32 %v11026_v29, 0.0  ;;  %v11046_v45 = vmax.f32 %v11045_v20, 0.0  ;;  %v11051_v38 = vld [vmem:[#allocation48_spill] sm:$0xff] }
 0x47b   : > { %4374 = vmatprep.subr.bf16.mxu0 %v6744_v60  ;;  %v11028_v60 = vld [vmem:[#allocation111_spill] sm:$0xff] }
 0x47c   : > { %v3328_v39 = vpack.c.bf16 %v11025_v7, %v11023_v26  ;;  %v11052_v26 = vmax.f32 %v11051_v38, 0.0  ;;  %v11053_v7 = vld [vmem:[#allocation135_spill] sm:$0xff] }
 0x47d   : > { %v11090_v38 = vld [vmem:[#allocation83_spill] sm:$0xff] }
 0x47e   : > { %4375 = vmatpush1.bf16.msra.mxu0 %v6742_v62  ;;  %v11029_v62 = vmax.f32 %v11028_v60, 0.0 }
 0x47f   : > { %4376 = vmatprep.subr.bf16.mxu0 %v6750_v53 }
 0x480   : > { %v3337_v53 = vpack.c.bf16 %v11029_v62, %v11027_v19  ;;  %v11056_v19 = vld [vmem:[#allocation53_spill] sm:$0xff] }
 0x481   : > { %4316 = vmatmul.mubr.bf16.gmra.mrb[92].mxu0 %v3312_v23  ;;  %v11031_v23 = vmax.f32 %v11030_v30, 0.0  ;;  %v11057_v60 = vmax.f32 %v11056_v19, 0.0  ;;  %v11098_v19 = vld [vmem:[#allocation91_spill] sm:$0xff] }
 0x482   : > { %4377 = vmatpush1.bf16.msra.mxu0 %v6748_v46  ;;  %4325 = vmatprep.mubr.bf16.mxu0 %v3321_v48  ;;  %v11032_v46 = vld [vmem:[#allocation110_spill] sm:$0xff]  ;;  %v11036_v48 = vld [vmem:[#allocation45_spill] sm:$0xff] }
 0x483   : > { %4378 = vmatprep.subr.bf16.mxu0 %v6757_v12  ;;  %v11033_v63 = vmax.f32 %v11032_v46, 0.0  ;;  %v11037_v12 = vmax.f32 %v11036_v48, 0.0  ;;  %v11063_v46 = vld [vmem:[#allocation137_spill] sm:$0xff] }
 0x485   : > { %v3336_v22 = vpack.c.bf16 %v11033_v63, %v11031_v23  ;;  %v11064_v63 = vld [vmem:[#allocation57_spill] sm:$0xff] }
 0x486   : > { %4379 = vmatpush1.bf16.msra.mxu0 %v6755_v40  ;;  %v3275_v40 = vpack.c.bf16 %v11037_v12, %v11035_v11  ;;  %v11067_v11 = vmax.f32 %v11066_v0, 0.0  ;;  %v11070_v12 = vld [vmem:[#allocation58_spill] sm:$0xff]  ;;  %v11114_v0 = vld [vmem:[#allocation115_spill] sm:$0xff] }
 0x487   : > { %4380 = vmatprep.subr.bf16.mxu0 %v6763_v47  ;;  %v11038_v47 = vld [vmem:[#allocation132_spill] sm:$0xff] }
 0x489   : > { %4326 = vmatmul.mubr.bf16.gmra.mrb[96].mxu0 %v3320_v9  ;;  %v3274_v9 = vpack.c.bf16 %v11042_v25, %v11040_v44  ;;  %v11073_v44 = vmax.f32 %v11072_v13, 0.0  ;;  %v11075_v25 = vmax.f32 %v11074_v14, 0.0 }
 0x48a   : > { %4335 = vmatprep.mubr.bf16.mxu0 %v3329_v17  ;;  %4381 = vmatpush1.bf16.msra.mxu0 %v6761_v36  ;;  %v11043_v36 = vld [vmem:[#allocation47_spill] sm:$0xff]  ;;  %v11047_v17 = vld [vmem:[#allocation133_spill] sm:$0xff] }
 0x48b   : > { %4382 = vmatprep.subr.bf16.mxu0 %v6769_v1  ;;  %v11044_v3 = vmax.f32 %v11043_v36, 0.0  ;;  %v11048_v1 = vld [vmem:[#allocation134_spill] sm:$0xff] }
 0x48d   : > { %v3283_v34 = vpack.c.bf16 %v11046_v45, %v11044_v3  ;;  %v11082_v45 = vld [vmem:[#allocation75_spill] sm:$0xff] }
 0x48e   : > { %4383 = vmatpush1.bf16.msra.mxu0 %v6767_v49  ;;  %v11049_v49 = vld [vmem:[#allocation46_spill] sm:$0xff] }
 0x48f   : > { %4384 = vmatprep.subr.bf16.mxu0 %v6775_v54  ;;  %v11050_v54 = vmax.f32 %v11049_v49, 0.0 }
 0x491   : > { %4336 = vmatmul.mubr.bf16.gmra.mrb[100].mxu0 %v3328_v39  ;;  %v3282_v58 = vpack.c.bf16 %v11052_v26, %v11050_v54  ;;  %v11054_v39 = vld [vmem:[#allocation51_spill] sm:$0xff]  ;;  %v11091_v26 = vmax.f32 %v11090_v38, 0.0 }
 0x492   : > { %4345 = vmatprep.mubr.bf16.mxu0 %v3337_v53  ;;  %4385 = vmatpush1.bf16.msra.mxu0 %v6773_v52  ;;  %v11055_v29 = vmax.f32 %v11054_v39, 0.0  ;;  %v11058_v53 = vld [vmem:[#allocation136_spill] sm:$0xff]  ;;  %v11059_v52 = vld [vmem:[#allocation50_spill] sm:$0xff] }
 0x493   : > { %4386 = vmatprep.subr.bf16.mxu0 %v6781_v51  ;;  %v11060_v51 = vmax.f32 %v11059_v52, 0.0 }
 0x494   : > { %v3291_v62 = vpack.c.bf16 %v11057_v60, %v11055_v29  ;;  %v11099_v60 = vmax.f32 %v11098_v19, 0.0 }
 0x496   : > { %4387 = vmatpush1.bf16.msra.mxu0 %v6779_v21  ;;  %v11061_v21 = vld [vmem:[#allocation52_spill] sm:$0xff] }
 0x497   : > { %4479 = vmatprep.subr.bf16.mxu0 %v11038_v47  ;;  %v11062_v30 = vmax.f32 %v11061_v21, 0.0  ;;  %v11106_v21 = vld [vmem:[#allocation99_spill] sm:$0xff] }
 0x499   : > { %4346 = vmatmul.mubr.bf16.gmra.mrb[104].mxu0 %v3336_v22  ;;  %v3290_v23 = vpack.c.bf16 %v11062_v30, %v11060_v51  ;;  %v11065_v22 = vmax.f32 %v11064_v63, 0.0  ;;  %v11107_v30 = vmax.f32 %v11106_v21, 0.0 }
 0x49a   : > { %4388 = vmatprep.mubr.bf16.mxu0 %v3275_v40  ;;  %v11071_v40 = vmax.f32 %v11070_v12, 0.0 }
 0x49b   : > { %v3299_v48 = vpack.c.bf16 %v11067_v11, %v11065_v22  ;;  %v11115_v11 = vmax.f32 %v11114_v0, 0.0 }
 0x4a1   : > { %4389 = vmatmul.mubr.bf16.vlgmr.msra.gmra.mrb[72].mxu0 %v3274_v9  ;;  %v3307_v9 = vpack.c.bf16 %v11075_v25, %v11073_v44  ;;  %v11126_v25 = vld [vmem:[#allocation118_spill] sm:$0xff] }
 0x4a2   : > { %4480 = vmatpush1.bf16.msra.mxu0 %v11047_v17  ;;  %4398 = vmatprep.mubr.bf16.mxu0 %v3283_v34  ;;  %v11083_v34 = vmax.f32 %v11082_v45, 0.0 }
 0x4a3   : > { %4481 = vmatprep.subr.bf16.mxu0 %v11048_v1 }
 0x4a6   : > { %4482 = vmatpush1.bf16.msra.mxu0 %v11053_v7 }
 0x4a7   : > { %4483 = vmatprep.subr.bf16.mxu0 %v11058_v53 }
 0x4a9   : > { %4399 = vmatmul.mubr.bf16.gmra.mrb[76].mxu0 %v3282_v58 }
 0x4aa   : > { %4484 = vmatpush1.bf16.msra.mxu0 %v9447_v8  ;;  %4408 = vmatprep.mubr.bf16.mxu0 %v3291_v62  ;;  %v11068_v8 = vld [vmem:[#allocation56_spill] sm:$0xff] }
 0x4ab   : > { %4485 = vmatprep.subr.bf16.mxu0 %v9452_v35  ;;  %v11069_v35 = vmax.f32 %v11068_v8, 0.0 }
 0x4ad   : > { %v3298_v47 = vpack.c.bf16 %v11071_v40, %v11069_v35  ;;  %v11118_v35 = vld [vmem:[#allocation114_spill] sm:$0xff] }
 0x4ae   : > { %4486 = vmatpush1.bf16.msra.mxu0 %v11063_v46 }
 0x4af   : > { %4487 = vmatprep.subr.bf16.mxu0 %v9471_v50  ;;  %v11076_v50 = vld [vmem:[#allocation63_spill] sm:$0xff] }
 0x4b1   : > { %4409 = vmatmul.mubr.bf16.gmra.mrb[80].mxu0 %v3290_v23 }
 0x4b2   : > { %4488 = vmatpush1.bf16.msra.mxu0 %v9475_v16  ;;  %4418 = vmatprep.mubr.bf16.mxu0 %v3299_v48  ;;  %v11077_v16 = vmax.f32 %v11076_v50, 0.0 }
 0x4b3   : > { %4489 = vmatprep.subr.bf16.mxu0 %v9479_v33  ;;  %v11078_v33 = vld [vmem:[#allocation66_spill] sm:$0xff] }
 0x4b4   : > { %v11079_v36 = vmax.f32 %v11078_v33, 0.0 }
 0x4b6   : > { %4490 = vmatpush1.bf16.msra.mxu0 %v9489_v4  ;;  %v3306_v3 = vpack.c.bf16 %v11079_v36, %v11077_v16  ;;  %v11080_v4 = vld [vmem:[#allocation73_spill] sm:$0xff] }
 0x4b7   : > { %4491 = vmatprep.subr.bf16.mxu0 %v9499_v10  ;;  %v11081_v20 = vmax.f32 %v11080_v4, 0.0  ;;  %v11084_v10 = vld [vmem:[#allocation71_spill] sm:$0xff] }
 0x4b9   : > { %4419 = vmatmul.mubr.bf16.gmra.mrb[84].mxu0 %v3298_v47  ;;  %v3315_v17 = vpack.c.bf16 %v11083_v34, %v11081_v20  ;;  %v11122_v47 = vld [vmem:[#allocation119_spill] sm:$0xff] }
 0x4ba   : > { %4492 = vmatpush1.bf16.msra.mxu0 %v9503_v27  ;;  %4428 = vmatprep.mubr.bf16.mxu0 %v3307_v9  ;;  %v11085_v27 = vmax.f32 %v11084_v10, 0.0  ;;  %v11123_v13 = vmax.f32 %v11122_v47, 0.0  ;;  %v11127_v9 = vmax.f32 %v11126_v25, 0.0  ;;  %v3250_v25 = vld [vmem:[%s9353_s26 + $0x80] sm:$0xff] }
 0x4bb   : > { %4493 = vmatprep.subr.bf16.mxu0 %v9507_v28  ;;  %v11086_v28 = vld [vmem:[#allocation74_spill] sm:$0xff] }
 0x4bc   : > { %v11087_v1 = vmax.f32 %v11086_v28, 0.0 }
 0x4be   : > { %4494 = vmatpush1.bf16.msra.mxu0 %v9517_v61  ;;  %v3314_v49 = vpack.c.bf16 %v11087_v1, %v11085_v27  ;;  %v11088_v61 = vld [vmem:[#allocation81_spill] sm:$0xff] }
 0x4bf   : > { %4495 = vmatprep.subr.bf16.mxu0 %v9527_v2  ;;  %v11089_v54 = vmax.f32 %v11088_v61, 0.0  ;;  %v11092_v2 = vld [vmem:[#allocation79_spill] sm:$0xff] }
 0x4c1   : > { %4429 = vmatmul.mubr.bf16.gmra.mrb[88].mxu0 %v3306_v3  ;;  %v3323_v58 = vpack.c.bf16 %v11091_v26, %v11089_v54 }
 0x4c2   : > { %4496 = vmatpush1.bf16.msra.mxu0 %v9530_v31  ;;  %4438 = vmatprep.mubr.bf16.mxu0 %v3315_v17  ;;  %v11093_v31 = vmax.f32 %v11092_v2, 0.0 }
 0x4c3   : > { %4497 = vmatprep.subr.bf16.mxu0 %v9535_v57  ;;  %v11094_v57 = vld [vmem:[#allocation82_spill] sm:$0xff] }
 0x4c4   : > { %v11095_v7 = vmax.f32 %v11094_v57, 0.0 }
 0x4c6   : > { %4498 = vmatpush1.bf16.msra.mxu0 %v9545_v43  ;;  %v3322_v39 = vpack.c.bf16 %v11095_v7, %v11093_v31  ;;  %v11096_v43 = vld [vmem:[#allocation89_spill] sm:$0xff] }
 0x4c7   : > { %4499 = vmatprep.subr.bf16.mxu0 %v9555_v32  ;;  %v11097_v29 = vmax.f32 %v11096_v43, 0.0  ;;  %v11100_v32 = vld [vmem:[#allocation87_spill] sm:$0xff] }
 0x4c9   : > { %4439 = vmatmul.mubr.bf16.gmra.mrb[92].mxu0 %v3314_v49  ;;  %v3331_v62 = vpack.c.bf16 %v11099_v60, %v11097_v29 }
 0x4ca   : > { %4500 = vmatpush1.bf16.msra.mxu0 %v9559_v37  ;;  %4448 = vmatprep.mubr.bf16.mxu0 %v3323_v58  ;;  %v11101_v37 = vmax.f32 %v11100_v32, 0.0  ;;  %v3242_v32 = vld [vmem:[%s9353_s26 + $0x40] sm:$0xff] }
 0x4cb   : > { %4501 = vmatprep.subr.bf16.mxu0 %v9563_v55  ;;  %v11102_v55 = vld [vmem:[#allocation90_spill] sm:$0xff] }
 0x4cc   : > { %v11103_v53 = vmax.f32 %v11102_v55, 0.0 }
 0x4ce   : > { %4502 = vmatpush1.bf16.msra.mxu0 %v9573_v56  ;;  %v3330_v52 = vpack.c.bf16 %v11103_v53, %v11101_v37  ;;  %v11104_v56 = vld [vmem:[#allocation97_spill] sm:$0xff]  ;;  %v3243_v53 = vld [vmem:[%s9353_s26 + $0x48] sm:$0xff] }
 0x4cf   : > { %4503 = vmatprep.subr.bf16.mxu0 %v9587_v24  ;;  %v11105_v51 = vmax.f32 %v11104_v56, 0.0  ;;  %v11108_v24 = vld [vmem:[#allocation95_spill] sm:$0xff] }
 0x4d1   : > { %4449 = vmatmul.mubr.bf16.gmra.mrb[96].mxu0 %v3322_v39  ;;  %v3339_v23 = vpack.c.bf16 %v11107_v30, %v11105_v51  ;;  %v3244_v51 = vld [vmem:[%s9353_s26 + $0x50] sm:$0xff] }
 0x4d2   : > { %4458 = vmatprep.mubr.bf16.mxu0 %v3331_v62  ;;  %4504 = vmatpush1.bf16.msra.mxu0 %v9591_v42  ;;  %v11109_v42 = vmax.f32 %v11108_v24, 0.0  ;;  %v3245_v24 = vld [vmem:[%s9353_s26 + $0x58] sm:$0xff] }
 0x4d3   : > { %4505 = vmatprep.subr.bf16.mxu0 %v9595_v6  ;;  %v11110_v6 = vld [vmem:[#allocation98_spill] sm:$0xff] }
 0x4d4   : > { %v11111_v46 = vmax.f32 %v11110_v6, 0.0 }
 0x4d6   : > { %4506 = vmatpush1.bf16.msra.mxu0 %v9605_v18  ;;  %v3338_v63 = vpack.c.bf16 %v11111_v46, %v11109_v42  ;;  %v11112_v18 = vld [vmem:[#allocation113_spill] sm:$0xff] }
 0x4d7   : > { %4507 = vmatprep.subr.bf16.mxu0 %v9615_v5  ;;  %v11113_v22 = vmax.f32 %v11112_v18, 0.0  ;;  %v11116_v5 = vld [vmem:[#allocation112_spill] sm:$0xff] }
 0x4d8   : > { %v11117_v8 = vmax.f32 %v11116_v5, 0.0 }
 0x4d9   : > { %4459 = vmatmul.mubr.bf16.gmra.mrb[100].mxu0 %v3330_v52  ;;  %v3277_v48 = vpack.c.bf16 %v11115_v11, %v11113_v22  ;;  %v3246_v22 = vld [vmem:[%s9353_s26 + $0x60] sm:$0xff] }
 0x4da   : > { %4468 = vmatprep.mubr.bf16.mxu0 %v3339_v23  ;;  %4508 = vmatpush1.bf16.msra.mxu0 %v9619_v59  ;;  %v11119_v59 = vmax.f32 %v11118_v35, 0.0  ;;  %v3248_v35 = vld [vmem:[%s9353_s26 + $0x70] sm:$0xff] }
 0x4db   : > { %4509 = vmatprep.subr.bf16.mxu0 %v9623_v41  ;;  %v11120_v41 = vld [vmem:[#allocation117_spill] sm:$0xff] }
 0x4dc   : > { %v3276_v12 = vpack.c.bf16 %v11119_v59, %v11117_v8  ;;  %v11121_v40 = vmax.f32 %v11120_v41, 0.0 }
 0x4de   : > { %4510 = vmatpush1.bf16.msra.mxu0 %v9633_v15  ;;  %v3285_v44 = vpack.c.bf16 %v11123_v13, %v11121_v40  ;;  %v11124_v15 = vld [vmem:[#allocation116_spill] sm:$0xff] }
 0x4df   : > { %v11125_v14 = vmax.f32 %v11124_v15, 0.0  ;;  %v3249_v40 = vld [vmem:[%s9353_s26 + $0x78] sm:$0xff] }
 0x4e1   : > { %4469 = vmatmul.mubr.bf16.gmra.mrb[104].mxu0 %v3338_v63  ;;  %v3284_v50 = vpack.c.bf16 %v11127_v9, %v11125_v14 }
 0x4e2   : > { %4511 = vmatprep.mubr.bf16.mxu0 %v3277_v48  ;;  %v3247_v48 = vld [vmem:[%s9353_s26 + $0x68] sm:$0xff] }
 0x4e9   : > { %4512 = vmatmul.mubr.bf16.vlgmr.msra.gmra.mrb[72].mxu0 %v3276_v12 }
 0x4ea   : > { %4521 = vmatprep.mubr.bf16.mxu0 %v3285_v44 }
 0x4f1   : > { %4522 = vmatmul.mubr.bf16.gmra.mrb[76].mxu0 %v3284_v50 }
 0x511   : > { %v4533_v16 = vpop.f32.mrb[108].mxu1 }
 0x512   : > { %v4535_v33 = vpop.f32.mrb[109].mxu1 }
 0x513   : > { %v4537_v36 = vpop.f32.mrb[110].mxu1 }
 0x514   : > { %v4539_v3 = vpop.f32.mrb[111].mxu1 }
 0x519   : > { %v4543_v4 = vpop.f32.mrb[112].mxu1 }
 0x51a   : > { %v4545_v20 = vpop.f32.mrb[113].mxu1 }
 0x51b   : > { %v4547_v45 = vpop.f32.mrb[114].mxu1 }
 0x51c   : > { %v4549_v34 = vpop.f32.mrb[115].mxu1 }
 0x521   : > { %v4553_v17 = vpop.f32.mrb[116].mxu1 }
 0x522   : > { %v9936_v10 = vpop.f32.mrb[117].mxu1 }
 0x523   : > { %v9938_v27 = vpop.f32.mrb[118].mxu1 }
 0x524   : > { %v9940_v28 = vpop.f32.mrb[119].mxu1 }
 0x529   : > { %v9942_v1 = vpop.f32.mrb[120].mxu1 }
 0x52a   : > { %v9944_v49 = vpop.f32.mrb[121].mxu1 }
 0x52b   : > { %v9946_v61 = vpop.f32.mrb[122].mxu1 }
 0x52c   : > { %v9948_v54 = vpop.f32.mrb[123].mxu1 }
 0x531   : > { %v9950_v38 = vpop.f32.mrb[124].mxu1 }
 0x532   : > { %v9952_v26 = vpop.f32.mrb[125].mxu1 }
 0x533   : > { %v9954_v58 = vpop.f32.mrb[126].mxu1 }
 0x534   : > { %v9956_v2 = vpop.f32.mrb[127].mxu1 }
 0x539   : > { %v9958_v31 = vpop.f32.mrb[128].mxu1 }
 0x53a   : > { %v9960_v57 = vpop.f32.mrb[129].mxu1 }
 0x53b   : > { %v9962_v7 = vpop.f32.mrb[130].mxu1 }
 0x53c   : > { %v9964_v39 = vpop.f32.mrb[131].mxu1 }
 0x541   : > { %v9966_v43 = vpop.f32.mrb[132].mxu1 }
 0x542   : > { %v9968_v29 = vpop.f32.mrb[133].mxu1 }
 0x543   : > { %v9970_v19 = vpop.f32.mrb[134].mxu1 }
 0x544   : > { %v9972_v60 = vpop.f32.mrb[135].mxu1 }
 0x584   : > { %v4410_v62 = vpop.f32.mrb[80].mxu0 }
 0x585   : > { %v6100_v37 = vadd.f32 %v4533_v16, %v4410_v62  ;;  %v4412_v55 = vpop.f32.mrb[81].mxu0  ;;  %v3251_v16 = vld [vmem:[%s9353_s26 + $0x88] sm:$0xff] }
 0x586   : > { %v6101_v52 = vadd.f32 %v4535_v33, %v4412_v55  ;;  %v4414_v56 = vpop.f32.mrb[82].mxu0  ;;  %v3254_v55 = vld [vmem:[%s9353_s26 + $0xa0] sm:$0xff] }
 0x587   : > { %v4610_v21 = vadd.f32 %v6100_v37, %v3242_v32  ;;  %v6102_v30 = vadd.f32 %v4537_v36, %v4414_v56  ;;  %v4416_v23 = vpop.f32.mrb[83].mxu0 }
 0x588   : > { %v4611_v42 = vadd.f32 %v6101_v52, %v3243_v53  ;;  %v6103_v6 = vadd.f32 %v4539_v3, %v4416_v23  ;;  %v3252_v3 = vld [vmem:[%s9353_s26 + $0x90] sm:$0xff]  ;;  %v3255_v52 = vld [vmem:[%s9353_s26 + $0xa8] sm:$0xff] }
 0x589   : > { %4646 = vst [vmem:[%s9353_s26 + $0x40] sm:$0xff] %v4610_v21  ;;  %v4612_v46 = vadd.f32 %v6102_v30, %v3244_v51  ;;  %v3256_v51 = vld [vmem:[%s9353_s26 + $0xb0] sm:$0xff] }
 0x58a   : > { %4647 = vst [vmem:[%s9353_s26 + $0x48] sm:$0xff] %v4611_v42  ;;  %v4613_v63 = vadd.f32 %v6103_v6, %v3245_v24  ;;  %v3257_v24 = vld [vmem:[%s9353_s26 + $0xb8] sm:$0xff] }
 0x58b   : > { %4648 = vst [vmem:[%s9353_s26 + $0x50] sm:$0xff] %v4612_v46 }
 0x58c   : > { %4649 = vst [vmem:[%s9353_s26 + $0x58] sm:$0xff] %v4613_v63  ;;  %v4420_v18 = vpop.f32.mrb[84].mxu0  ;;  %v3258_v63 = vld [vmem:[%s9353_s26 + $0xc0] sm:$0xff] }
 0x58d   : > { %v6104_v0 = vadd.f32 %v4543_v4, %v4420_v18  ;;  %v4422_v11 = vpop.f32.mrb[85].mxu0 }
 0x58e   : > { %v6105_v5 = vadd.f32 %v4545_v20, %v4422_v11  ;;  %v4424_v8 = vpop.f32.mrb[86].mxu0  ;;  %v3260_v11 = vld [vmem:[%s9353_s26 + $0xd0] sm:$0xff] }
 0x58f   : > { %v4614_v59 = vadd.f32 %v6104_v0, %v3246_v22  ;;  %v6106_v12 = vadd.f32 %v4547_v45, %v4424_v8  ;;  %v4426_v41 = vpop.f32.mrb[87].mxu0  ;;  %v3259_v22 = vld [vmem:[%s9353_s26 + $0xc8] sm:$0xff] }
 0x590   : > { %v4615_v47 = vadd.f32 %v6105_v5, %v3247_v48  ;;  %v6107_v13 = vadd.f32 %v4549_v34, %v4426_v41  ;;  %v3253_v34 = vld [vmem:[%s9353_s26 + $0x98] sm:$0xff] }
 0x591   : > { %4650 = vst [vmem:[%s9353_s26 + $0x60] sm:$0xff] %v4614_v59  ;;  %v4616_v44 = vadd.f32 %v6106_v12, %v3248_v35  ;;  %v3261_v35 = vld [vmem:[%s9353_s26 + $0xd8] sm:$0xff] }
 0x592   : > { %4651 = vst [vmem:[%s9353_s26 + $0x68] sm:$0xff] %v4615_v47  ;;  %v4617_v15 = vadd.f32 %v6107_v13, %v3249_v40  ;;  %v3262_v40 = vld [vmem:[%s9353_s26 + $0xe0] sm:$0xff]  ;;  %v3263_v13 = vld [vmem:[%s9353_s26 + $0xe8] sm:$0xff] }
 0x593   : > { %4652 = vst [vmem:[%s9353_s26 + $0x70] sm:$0xff] %v4616_v44 }
 0x594   : > { %4653 = vst [vmem:[%s9353_s26 + $0x78] sm:$0xff] %v4617_v15  ;;  %v4430_v14 = vpop.f32.mrb[88].mxu0  ;;  %v3264_v15 = vld [vmem:[%s9353_s26 + $0xf0] sm:$0xff] }
 0x595   : > { %v6108_v9 = vadd.f32 %v4553_v17, %v4430_v14  ;;  %v4432_v50 = vpop.f32.mrb[89].mxu0 }
 0x596   : > { %v6109_v33 = vadd.f32 %v9936_v10, %v4432_v50  ;;  %v4434_v36 = vpop.f32.mrb[90].mxu0  ;;  %v3265_v50 = vld [vmem:[%s9353_s26 + $0xf8] sm:$0xff] }
 0x597   : > { %v4618_v4 = vadd.f32 %v6108_v9, %v3250_v25  ;;  %v6110_v20 = vadd.f32 %v9938_v27, %v4434_v36  ;;  %v4436_v45 = vpop.f32.mrb[91].mxu0 }
 0x598   : > { %v4619_v62 = vadd.f32 %v6109_v33, %v3251_v16  ;;  %v6111_v32 = vadd.f32 %v9940_v28, %v4436_v45 }
 0x599   : > { %4654 = vst [vmem:[%s9353_s26 + $0x80] sm:$0xff] %v4618_v4  ;;  %v4620_v17 = vadd.f32 %v6110_v20, %v3252_v3  ;;  %v3266_v3 = vld [vmem:[%s9353_s26 + $0x100] sm:$0xff]  ;;  %v3267_v20 = vld [vmem:[%s9353_s26 + $0x108] sm:$0xff] }
 0x59a   : > { %4655 = vst [vmem:[%s9353_s26 + $0x88] sm:$0xff] %v4619_v62  ;;  %v4621_v37 = vadd.f32 %v6111_v32, %v3253_v34  ;;  %v3268_v34 = vld [vmem:[%s9353_s26 + $0x110] sm:$0xff] }
 0x59b   : > { %4656 = vst [vmem:[%s9353_s26 + $0x90] sm:$0xff] %v4620_v17 }
 0x59c   : > { %4657 = vst [vmem:[%s9353_s26 + $0x98] sm:$0xff] %v4621_v37  ;;  %v4440_v10 = vpop.f32.mrb[92].mxu0  ;;  %v3269_v37 = vld [vmem:[%s9353_s26 + $0x118] sm:$0xff] }
 0x59d   : > { %v6112_v53 = vadd.f32 %v9942_v1, %v4440_v10  ;;  %v4442_v27 = vpop.f32.mrb[93].mxu0 }
 0x59e   : > { %v6113_v56 = vadd.f32 %v9944_v49, %v4442_v27  ;;  %v4444_v28 = vpop.f32.mrb[94].mxu0  ;;  %v3235_v27 = vld [vmem:[%s9353_s26 + $0x8] sm:$0xff] }
 0x59f   : > { %v4622_v21 = vadd.f32 %v6112_v53, %v3254_v55  ;;  %v6114_v30 = vadd.f32 %v9946_v61, %v4444_v28  ;;  %v4446_v23 = vpop.f32.mrb[95].mxu0 }
 0x5a0   : > { %v4623_v42 = vadd.f32 %v6113_v56, %v3255_v52  ;;  %v6115_v6 = vadd.f32 %v9948_v54, %v4446_v23  ;;  %v3236_v52 = vld [vmem:[%s9353_s26 + $0x10] sm:$0xff] }
 0x5a1   : > { %4658 = vst [vmem:[%s9353_s26 + $0xa0] sm:$0xff] %v4622_v21  ;;  %v4624_v1 = vadd.f32 %v6114_v30, %v3256_v51 }
 0x5a2   : > { %4659 = vst [vmem:[%s9353_s26 + $0xa8] sm:$0xff] %v4623_v42  ;;  %v4625_v46 = vadd.f32 %v6115_v6, %v3257_v24  ;;  %v3238_v42 = vld [vmem:[%s9353_s26 + $0x20] sm:$0xff]  ;;  %v3239_v6 = vld [vmem:[%s9353_s26 + $0x28] sm:$0xff] }
 0x5a3   : > { %4660 = vst [vmem:[%s9353_s26 + $0xb0] sm:$0xff] %v4624_v1 }
 0x5a4   : > { %4661 = vst [vmem:[%s9353_s26 + $0xb8] sm:$0xff] %v4625_v46  ;;  %v4450_v49 = vpop.f32.mrb[96].mxu0  ;;  %v3240_v46 = vld [vmem:[%s9353_s26 + $0x30] sm:$0xff] }
 0x5a5   : > { %v6116_v18 = vadd.f32 %v9950_v38, %v4450_v49  ;;  %v4452_v61 = vpop.f32.mrb[97].mxu0 }
 0x5a6   : > { %v6117_v0 = vadd.f32 %v9952_v26, %v4452_v61  ;;  %v4454_v54 = vpop.f32.mrb[98].mxu0 }
 0x5a7   : > { %v4626_v48 = vadd.f32 %v6116_v18, %v3258_v63  ;;  %v6118_v5 = vadd.f32 %v9954_v58, %v4454_v54  ;;  %v4456_v8 = vpop.f32.mrb[99].mxu0  ;;  %v3241_v18 = vld [vmem:[%s9353_s26 + $0x38] sm:$0xff] }
 0x5a8   : > { %v4627_v59 = vadd.f32 %v6117_v0, %v3259_v22  ;;  %v6119_v12 = vadd.f32 %v9956_v2, %v4456_v8  ;;  %v6799_v8 = vld [vmem:[#allocation11 + $0x48] sm:$0xff] (!%p5783_p8)  }
 0x5a9   : > { %4662 = vst [vmem:[%s9353_s26 + $0xc0] sm:$0xff] %v4626_v48  ;;  %v4628_v38 = vadd.f32 %v6118_v5, %v3260_v11  ;;  %v6797_v48 = vld [vmem:[#allocation11 + $0x40] sm:$0xff] (!%p5783_p8)  }
 0x5aa   : > { %4663 = vst [vmem:[%s9353_s26 + $0xc8] sm:$0xff] %v4627_v59  ;;  %v4629_v41 = vadd.f32 %v6119_v12, %v3261_v35  ;;  %v6798_v5 = vld [vmem:[#allocation11] sm:$0xff] (!%p5783_p8)   ;;  %5818 = vmatprep.subr.bf16.mxu0 (!%p5783_p8), %v6797_v48  ;;  %6316 = vmatprep.subr.bf16.mxu1 (!%p5783_p8), %v6797_v48  ;;  %v6800_v35 = vld [vmem:[#allocation11 + $0x8] sm:$0xff] (!%p5783_p8)   ;;  %v6801_v59 = vld [vmem:[#allocation11 + $0x50] sm:$0xff] (!%p5783_p8)  }
 0x5ab   : > { %4664 = vst [vmem:[%s9353_s26 + $0xd0] sm:$0xff] %v4628_v38  ;;  %5819 = vmatpush3.bf16.msra.mxu0 (!%p5783_p8), %v6798_v5  ;;  %6324 = vmatpush3.bf16.msra.mxu1 (!%p5783_p8), %v6798_v5  ;;  %v6802_v12 = vld [vmem:[#allocation11 + $0x10] sm:$0xff] (!%p5783_p8)   ;;  %v6803_v38 = vld [vmem:[#allocation11 + $0x58] sm:$0xff] (!%p5783_p8)  }
 0x5ac   : > { %4665 = vst [vmem:[%s9353_s26 + $0xd8] sm:$0xff] %v4629_v41  ;;  %v4460_v26 = vpop.f32.mrb[100].mxu0  ;;  %5820 = vmatprep.subr.bf16.mxu0 (!%p5783_p8), %v6799_v8  ;;  %6317 = vmatprep.subr.bf16.mxu1 (!%p5783_p8), %v6799_v8  ;;  %v6804_v41 = vld [vmem:[#allocation11 + $0x18] sm:$0xff] (!%p5783_p8)  }
 0x5ad   : > { %v6120_v47 = vadd.f32 %v9958_v31, %v4460_v26  ;;  %v4462_v58 = vpop.f32.mrb[101].mxu0  ;;  %v6805_v26 = vld [vmem:[#allocation11 + $0x60] sm:$0xff] (!%p5783_p8)  }
 0x5ae   : > { %v6121_v44 = vadd.f32 %v9960_v57, %v4462_v58  ;;  %v4464_v2 = vpop.f32.mrb[102].mxu0 }
 0x5af   : > { %v4630_v14 = vadd.f32 %v6120_v47, %v3262_v40  ;;  %v6122_v25 = vadd.f32 %v9962_v7, %v4464_v2  ;;  %v4466_v9 = vpop.f32.mrb[103].mxu0  ;;  %5821 = vmatpush3.bf16.msra.mxu0 (!%p5783_p8), %v6800_v35  ;;  %6325 = vmatpush3.bf16.msra.mxu1 (!%p5783_p8), %v6800_v35  ;;  %v6806_v40 = vld [vmem:[#allocation11 + $0x20] sm:$0xff] (!%p5783_p8)   ;;  %v6807_v47 = vld [vmem:[#allocation11 + $0x68] sm:$0xff] (!%p5783_p8)  }
 0x5b0   : > { %v4631_v16 = vadd.f32 %v6121_v44, %v3263_v13  ;;  %v6123_v33 = vadd.f32 %v9964_v39, %v4466_v9  ;;  %5822 = vmatprep.subr.bf16.mxu0 (!%p5783_p8), %v6801_v59  ;;  %6318 = vmatprep.subr.bf16.mxu1 (!%p5783_p8), %v6801_v59  ;;  %v4714_v44 = vld [vmem:[#allocation10] sm:$0x3] (!%p5783_p8)  ;;  %v11129_v2 = vld [vmem:[#allocation41_spill] sm:$0xff] (!%p5783_p8)  ;;  %v4688_v59 = vld [vmem:[%s9353_s26 + $0x50] sm:$0xff] (!%p5783_p8) }
 0x5b1   : > { %4666 = vst [vmem:[%s9353_s26 + $0xe0] sm:$0xff] %v4630_v14  ;;  %v4632_v31 = vadd.f32 %v6122_v25, %v3264_v15  ;;  %v11130_v15 = vsub.s32 (!%p5783_p8), 0, %v11129_v2  ;;  %v11131_v25 = vsub.s32 (!%p5783_p8), 1, %v11129_v2  ;;  %v4686_v35 = vld [vmem:[%s9353_s26 + $0x40] sm:$0xff] (!%p5783_p8) }
 0x5b2   : > { %4667 = vst [vmem:[%s9353_s26 + $0xe8] sm:$0xff] %v4631_v16  ;;  %v4633_v36 = vadd.f32 %v6123_v33, %v3265_v50  ;;  %v4699_v33 = vld [vmem:[%s9353_s26 + $0xa8] sm:$0xff] (!%p5783_p8) }
 0x5b3   : > { %4668 = vst [vmem:[%s9353_s26 + $0xf0] sm:$0xff] %v4632_v31  ;;  %5823 = vmatpush3.bf16.msra.mxu0 (!%p5783_p8), %v6802_v12  ;;  %6326 = vmatpush3.bf16.msra.mxu1 (!%p5783_p8), %v6802_v12  ;;  %v10070_v14 = vrot.slane (!%p5783_p8), %v4714_v44, %v11130_v15  ;;  %v10074_v9 = vrot.slane (!%p5783_p8), %v4714_v44, %v11131_v25  ;;  %v4701_v31 = vld [vmem:[%s9353_s26 + $0xb8] sm:$0xff] (!%p5783_p8) }
 0x5b4   : > { %4669 = vst [vmem:[%s9353_s26 + $0xf8] sm:$0xff] %v4633_v36  ;;  %v4470_v57 = vpop.f32.mrb[104].mxu0  ;;  %5824 = vmatprep.subr.bf16.mxu0 (!%p5783_p8), %v6803_v38  ;;  %6319 = vmatprep.subr.bf16.mxu1 (!%p5783_p8), %v6803_v38  ;;  %v4698_v36 = vld [vmem:[%s9353_s26 + $0xa0] sm:$0xff] (!%p5783_p8)  ;;  %v6812_v12 = vld [vmem:[#allocation11 + $0x38] sm:$0xff] (!%p5783_p8)  }
 0x5b5   : > { %v6124_v4 = vadd.f32 %v9966_v43, %v4470_v57  ;;  %v4472_v7 = vpop.f32.mrb[105].mxu0  ;;  %v6808_v57 = vld [vmem:[#allocation11 + $0x28] sm:$0xff] (!%p5783_p8)  }
 0x5b6   : > { %v6125_v39 = vadd.f32 %v9968_v29, %v4472_v7  ;;  %v4474_v45 = vpop.f32.mrb[106].mxu0  ;;  %v3234_v29 = vld [vmem:[%s9353_s26] sm:$0xff] }
 0x5b7   : > { %v4634_v62 = vadd.f32 %v6124_v4, %v3266_v3  ;;  %v6126_v32 = vadd.f32 %v9970_v19, %v4474_v45  ;;  %v4476_v17 = vpop.f32.mrb[107].mxu0  ;;  %5825 = vmatpush3.bf16.msra.mxu0 (!%p5783_p8), %v6804_v41  ;;  %6327 = vmatpush3.bf16.msra.mxu1 (!%p5783_p8), %v6804_v41 }
 0x5b8   : > { %v4635_v10 = vadd.f32 %v6125_v39, %v3267_v20  ;;  %v6127_v43 = vadd.f32 %v9972_v60, %v4476_v17  ;;  %v3237_v60 = vld [vmem:[%s9353_s26 + $0x18] sm:$0xff]  ;;  %5826 = vmatprep.subr.bf16.mxu0 (!%p5783_p8), %v6805_v26  ;;  %6320 = vmatprep.subr.bf16.mxu1 (!%p5783_p8), %v6805_v26  ;;  %v4700_v20 = vld [vmem:[%s9353_s26 + $0xb0] sm:$0xff] (!%p5783_p8) }
 0x5b9   : > { %4670 = vst [vmem:[%s9353_s26 + $0x100] sm:$0xff] %v4634_v62  ;;  %v4636_v55 = vadd.f32 %v6126_v32, %v3268_v34  ;;  %v6809_v39 = vld [vmem:[#allocation11 + $0x70] sm:$0xff] (!%p5783_p8)   ;;  %v4747_v34 = vadd.f32 (!%p5783_p8), %v10074_v9, %v4699_v33  ;;  %v4749_v62 = vadd.f32 (!%p5783_p8), %v10074_v9, %v4701_v31  ;;  %v10152_v33 = vadd.f32 (!%p5783_p8), %v10070_v14, %v4688_v59  ;;  %v4706_v31 = vld [vmem:[%s9353_s26 + $0xe0] sm:$0xff] (!%p5783_p8) }
 0x5ba   : > { %4671 = vst [vmem:[%s9353_s26 + $0x108] sm:$0xff] %v4635_v10  ;;  %v4637_v53 = vadd.f32 %v6127_v43, %v3269_v37 }
 0x5bb   : > { %4672 = vst [vmem:[%s9353_s26 + $0x110] sm:$0xff] %v4636_v55  ;;  %5827 = vmatpush3.bf16.msra.mxu0 (!%p5783_p8), %v6806_v40  ;;  %6328 = vmatpush3.bf16.msra.mxu1 (!%p5783_p8), %v6806_v40  ;;  %v10091_v55 = vadd.f32 (!%p5783_p8), %v10070_v14, %v4698_v36  ;;  %v4709_v15 = vld [vmem:[%s9353_s26 + $0xf8] sm:$0xff] (!%p5783_p8)  ;;  %v4708_v36 = vld [vmem:[%s9353_s26 + $0xf0] sm:$0xff] (!%p5783_p8) }
 0x5bc   : > { %4673 = vst [vmem:[%s9353_s26 + $0x118] sm:$0xff] %v4637_v53  ;;  %v4513_v19 = vpop.f32.mrb[72].mxu0  ;;  %5828 = vmatprep.subr.bf16.mxu0 (!%p5783_p8), %v6807_v47  ;;  %6321 = vmatprep.subr.bf16.mxu1 (!%p5783_p8), %v6807_v47  ;;  %v4707_v47 = vld [vmem:[%s9353_s26 + $0xe8] sm:$0xff] (!%p5783_p8) }
 0x5bd   : > { %v4602_v56 = vadd.f32 %v4513_v19, %v3234_v29  ;;  %v4515_v28 = vpop.f32.mrb[73].mxu0  ;;  %v4785_v19 = vmax.f32 (!%p5783_p8), %v4749_v62, 0.0  ;;  %v4772_v62 = vmax.f32 (!%p5783_p8), %v10152_v33, 0.0  ;;  %v10233_v33 = vld [vmem:[#allocation13] ss:$0 sm:$0xff] (!%p5783_p8) }
 0x5be   : > { %v4603_v51 = vadd.f32 %v4515_v28, %v3235_v27  ;;  %v4517_v21 = vpop.f32.mrb[74].mxu0  ;;  %v4783_v27 = vmax.f32 (!%p5783_p8), %v4747_v34, 0.0  ;;  %v4703_v28 = vld [vmem:[%s9353_s26 + $0xc8] sm:$0xff] (!%p5783_p8) }
 0x5bf   : > { %4638 = vst [vmem:[%s9353_s26] sm:$0xff] %v4602_v56  ;;  %v4604_v30 = vadd.f32 %v4517_v21, %v3236_v52  ;;  %v4519_v23 = vpop.f32.mrb[75].mxu0  ;;  %v4748_v52 = vadd.f32 (!%p5783_p8), %v10070_v14, %v4700_v20  ;;  %5829 = vmatpush3.bf16.msra.mxu0 (!%p5783_p8), %v6808_v57  ;;  %6329 = vmatpush3.bf16.msra.mxu1 (!%p5783_p8), %v6808_v57  ;;  %v4782_v21 = vmax.f32 (!%p5783_p8), %v10091_v55, 0.0  ;;  %4821 = vst [vmem:[%s9353_s26 + $0xb8] sm:$0xff] (!%p5783_p8), %v4785_v19  ;;  %v4691_v20 = vld [vmem:[%s9353_s26 + $0x68] sm:$0xff] (!%p5783_p8) }
 0x5c0   : > { %4639 = vst [vmem:[%s9353_s26 + $0x8] sm:$0xff] %v4603_v51  ;;  %v4605_v24 = vadd.f32 %v4519_v23, %v3237_v60  ;;  %v6810_v60 = vld [vmem:[#allocation11 + $0x30] sm:$0xff] (!%p5783_p8)   ;;  %5830 = vmatprep.subr.bf16.mxu0 (!%p5783_p8), %v6809_v39  ;;  %6322 = vmatprep.subr.bf16.mxu1 (!%p5783_p8), %v6809_v39  ;;  %4819 = vst [vmem:[%s9353_s26 + $0xa8] sm:$0xff] (!%p5783_p8), %v4783_v27  ;;  %v4693_v39 = vld [vmem:[%s9353_s26 + $0x78] sm:$0xff] (!%p5783_p8)  ;;  %v10175_v55 = vadd.f32 (!%p5783_p8), %v10070_v14, %v4708_v36 }
 0x5c1   : > { %4640 = vst [vmem:[%s9353_s26 + $0x10] sm:$0xff] %v4604_v30  ;;  %4818 = vst [vmem:[%s9353_s26 + $0xa0] sm:$0xff] (!%p5783_p8), %v4782_v21 }
 0x5c2   : > { %4641 = vst [vmem:[%s9353_s26 + $0x18] sm:$0xff] %v4605_v24  ;;  %v4705_v24 = vld [vmem:[%s9353_s26 + $0xd8] sm:$0xff] (!%p5783_p8)  ;;  %4808 = vst [vmem:[%s9353_s26 + $0x50] sm:$0xff] (!%p5783_p8), %v4772_v62 }
 0x5c3   : > { %v4753_v5 = vadd.f32 (!%p5783_p8), %v10074_v9, %v4705_v24  ;;  %5831 = vmatpush3.bf16.msra.mxu0 (!%p5783_p8), %v6810_v60  ;;  %6330 = vmatpush3.bf16.msra.mxu1 (!%p5783_p8), %v6810_v60 }
 0x5c4   : > { %v4523_v1 = vpop.f32.mrb[76].mxu0  ;;  %4677 = sbr.rel (%p5783_p8) target bundleno = 1741 (0x6cd), region = 84 }
 0x5c5   : > { %v4606_v49 = vadd.f32 %v4523_v1, %v3238_v42  ;;  %v4525_v63 = vpop.f32.mrb[77].mxu0  ;;  %v4702_v42 = vld [vmem:[%s9353_s26 + $0xc0] sm:$0xff] (!%p5783_p8)  ;;  %v4845_v1 = vpack.c.bf16 (!%p5783_p8), %v4785_v19, %v4783_v27  ;;  %v10185_v27 = vadd.f32 (!%p5783_p8), %v10074_v9, %v4691_v20  ;;  %v10188_v19 = vadd.f32 (!%p5783_p8), %v10074_v9, %v4693_v39 }
 0x5c6   : > { %v4607_v61 = vadd.f32 %v4525_v63, %v3239_v6  ;;  %v4527_v22 = vpop.f32.mrb[78].mxu0  ;;  %v4678_v50 = vld [vmem:[%s9353_s26] sm:$0xff] (!%p5783_p8)  ;;  %v6811_v6 = vld [vmem:[#allocation11 + $0x78] sm:$0xff] (!%p5783_p8)   ;;  %v10123_v8 = vadd.f32 (!%p5783_p8), %v10070_v14, %v4702_v42 }
 0x5c7   : > { %4642 = vst [vmem:[%s9353_s26 + $0x20] sm:$0xff] %v4606_v49  ;;  %v4608_v0 = vadd.f32 %v4527_v22, %v3240_v46  ;;  %v4529_v54 = vpop.f32.mrb[79].mxu0  ;;  %v4679_v58 = vld [vmem:[%s9353_s26 + $0x8] sm:$0xff] (!%p5783_p8)  ;;  %v4726_v7 = vadd.f32 (!%p5783_p8), %v10070_v14, %v4678_v50  ;;  %v4784_v46 = vmax.f32 (!%p5783_p8), %v4748_v52, 0.0  ;;  %v4704_v63 = vld [vmem:[%s9353_s26 + $0xd0] sm:$0xff] (!%p5783_p8)  ;;  %5059 = vmatprep.mubr.bf16.mxu1 (!%p5783_p8), %v4845_v1  ;;  %5832 = vmatprep.subr.bf16.mxu0 (!%p5783_p8), %v6811_v6  ;;  %v4713_v52 = vld [vmem:[%s9353_s26 + $0x118] sm:$0xff] (!%p5783_p8) }
 0x5c8   : > { %4643 = vst [vmem:[%s9353_s26 + $0x28] sm:$0xff] %v4607_v61  ;;  %v4609_v11 = vadd.f32 %v4529_v54, %v3241_v18  ;;  %v4680_v16 = vld [vmem:[%s9353_s26 + $0x10] sm:$0xff] (!%p5783_p8)  ;;  %v4727_v3 = vadd.f32 (!%p5783_p8), %v10074_v9, %v4679_v58  ;;  %v4687_v54 = vld [vmem:[%s9353_s26 + $0x48] sm:$0xff] (!%p5783_p8)  ;;  %v10131_v40 = vadd.f32 (!%p5783_p8), %v10070_v14, %v4704_v63  ;;  %6323 = vmatprep.subr.bf16.mxu1 (!%p5783_p8), %v6811_v6  ;;  %v4789_v58 = vmax.f32 (!%p5783_p8), %v4753_v5, 0.0 }
 0x5c9   : > { %4644 = vst [vmem:[%s9353_s26 + $0x30] sm:$0xff] %v4608_v0  ;;  %v4681_v13 = vld [vmem:[%s9353_s26 + $0x18] sm:$0xff] (!%p5783_p8)  ;;  %v4728_v45 = vadd.f32 (!%p5783_p8), %v10070_v14, %v4680_v16  ;;  %v4762_v43 = vmax.f32 (!%p5783_p8), %v4726_v7, 0.0  ;;  %v4751_v0 = vadd.f32 (!%p5783_p8), %v10074_v9, %v4703_v28  ;;  %4820 = vst [vmem:[%s9353_s26 + $0xb0] sm:$0xff] (!%p5783_p8), %v4784_v46  ;;  %v10139_v44 = vadd.f32 (!%p5783_p8), %v10074_v9, %v4687_v54  ;;  %v4695_v1 = vld [vmem:[%s9353_s26 + $0x88] sm:$0xff] (!%p5783_p8) }
 0x5ca   : > { %4645 = vst [vmem:[%s9353_s26 + $0x38] sm:$0xff] %v4609_v11  ;;  %v4729_v4 = vadd.f32 (!%p5783_p8), %v10074_v9, %v4681_v13  ;;  %v4763_v37 = vmax.f32 (!%p5783_p8), %v4727_v3, 0.0  ;;  %v4689_v11 = vld [vmem:[%s9353_s26 + $0x58] sm:$0xff] (!%p5783_p8)  ;;  %v4786_v13 = vmax.f32 (!%p5783_p8), %v10123_v8, 0.0  ;;  %v4844_v25 = vpack.c.bf16 (!%p5783_p8), %v4784_v46, %v4782_v21  ;;  %4825 = vst [vmem:[%s9353_s26 + $0xd8] sm:$0xff] (!%p5783_p8), %v4789_v58  ;;  %5833 = vmatpush3.bf16.msra.mxu0 (!%p5783_p8), %v6812_v12  ;;  %v4710_v21 = vld [vmem:[%s9353_s26 + $0x100] sm:$0xff] (!%p5783_p8) }
 0x5cb   : > { %v4764_v29 = vmax.f32 %v4728_v45, 0.0  ;;  %4798 = vst [vmem:[%s9353_s26] sm:$0xff] %v4762_v43  ;;  %v4787_v26 = vmax.f32 %v4751_v0, 0.0  ;;  %v10142_v2 = vadd.f32 %v10074_v9, %v4689_v11  ;;  %v4788_v50 = vmax.f32 %v10131_v40, 0.0  ;;  %6331 = vmatpush3.bf16.msra.mxu1 %v6812_v12  ;;  %v4697_v46 = vld [vmem:[%s9353_s26 + $0x98] sm:$0xff]  ;;  %v4696_v0 = vld [vmem:[%s9353_s26 + $0x90] sm:$0xff] }
 0x5cc   : > { %v4765_v10 = vmax.f32 %v4729_v4, 0.0  ;;  %4799 = vst [vmem:[%s9353_s26 + $0x8] sm:$0xff] %v4763_v37  ;;  %v10149_v16 = vadd.f32 %v10070_v14, %v4686_v35  ;;  %4822 = vst [vmem:[%s9353_s26 + $0xc0] sm:$0xff] %v4786_v13  ;;  %v4771_v3 = vmax.f32 %v10139_v44, 0.0  ;;  %v4755_v7 = vadd.f32 %v10074_v9, %v4707_v47 }
 0x5cd   : > { %4800 = vst [vmem:[%s9353_s26 + $0x10] sm:$0xff] %v4764_v29  ;;  %v4834_v38 = vpack.c.bf16 %v4764_v29, %v4762_v43  ;;  %4823 = vst [vmem:[%s9353_s26 + $0xc8] sm:$0xff] %v4787_v26  ;;  %v4773_v4 = vmax.f32 %v10142_v2, 0.0  ;;  %v4847_v45 = vpack.c.bf16 %v4789_v58, %v4787_v26  ;;  %v10172_v43 = vadd.f32 %v10070_v14, %v4706_v31 }
 0x5ce   : > { %v4682_v53 = vld [vmem:[%s9353_s26 + $0x20] sm:$0xff]  ;;  %4801 = vst [vmem:[%s9353_s26 + $0x18] sm:$0xff] %v4765_v10  ;;  %v4835_v51 = vpack.c.bf16 %v4765_v10, %v4763_v37  ;;  %4824 = vst [vmem:[%s9353_s26 + $0xd0] sm:$0xff] %v4788_v50  ;;  %v4770_v34 = vmax.f32 %v10149_v16, 0.0  ;;  %v4692_v37 = vld [vmem:[%s9353_s26 + $0x70] sm:$0xff]  ;;  %v4791_v10 = vmax.f32 %v4755_v7, 0.0  ;;  %5060 = vmatmul.mubr.bf16.vlgmr.msra.gmra.mrb[0].mxu1 %v4844_v25  ;;  %v4846_v63 = vpack.c.bf16 %v4788_v50, %v4786_v13 }
 0x5cf   : > { %v4683_v32 = vld [vmem:[%s9353_s26 + $0x28] sm:$0xff]  ;;  %v10109_v49 = vadd.f32 %v10070_v14, %v4682_v53  ;;  %4807 = vst [vmem:[%s9353_s26 + $0x48] sm:$0xff] %v4771_v3  ;;  %4809 = vst [vmem:[%s9353_s26 + $0x58] sm:$0xff] %v4773_v4  ;;  %v4792_v28 = vmax.f32 %v10175_v55, 0.0  ;;  %5067 = vmatprep.mubr.bf16.mxu1 %v4847_v45  ;;  %v4775_v24 = vmax.f32 %v10185_v27, 0.0  ;;  %v4777_v42 = vmax.f32 %v10188_v19, 0.0 }
 0x5d0   : > { %v4684_v56 = vld [vmem:[%s9353_s26 + $0x30] sm:$0xff]  ;;  %v4731_v30 = vadd.f32 %v10074_v9, %v4683_v32  ;;  %5019 = vmatprep.mubr.bf16.mxu0 %v4835_v51  ;;  %v4757_v32 = vadd.f32 %v10074_v9, %v4709_v15  ;;  %v4711_v53 = vld [vmem:[%s9353_s26 + $0x108] sm:$0xff]  ;;  %4806 = vst [vmem:[%s9353_s26 + $0x40] sm:$0xff] %v4770_v34  ;;  %4827 = vst [vmem:[%s9353_s26 + $0xe8] sm:$0xff] %v4791_v10  ;;  %v4740_v51 = vadd.f32 %v10070_v14, %v4692_v37 }
 0x5d1   : > { %v4685_v17 = vld [vmem:[%s9353_s26 + $0x38] sm:$0xff]  ;;  %v10114_v22 = vadd.f32 %v10070_v14, %v4684_v56  ;;  %v4766_v48 = vmax.f32 %v10109_v49, 0.0  ;;  %5020 = vmatmul.mubr.bf16.vlgmr.msra.gmra.mrb[0].mxu0 %v4834_v38  ;;  %v4790_v56 = vmax.f32 %v10172_v43, 0.0  ;;  %v4759_v6 = vadd.f32 %v10074_v9, %v4711_v53  ;;  %4828 = vst [vmem:[%s9353_s26 + $0xf0] sm:$0xff] %v4792_v28  ;;  %4811 = vst [vmem:[%s9353_s26 + $0x68] sm:$0xff] %v4775_v24 }
 0x5d2   : > { %v4733_v23 = vadd.f32 %v10074_v9, %v4685_v17  ;;  %v4767_v18 = vmax.f32 %v4731_v30, 0.0  ;;  %v4690_v17 = vld [vmem:[%s9353_s26 + $0x60] sm:$0xff]  ;;  %v4793_v29 = vmax.f32 %v4757_v32, 0.0  ;;  %v4712_v30 = vld [vmem:[%s9353_s26 + $0x110] sm:$0xff]  ;;  %v4839_v54 = vpack.c.bf16 %v4773_v4, %v4771_v3  ;;  %4813 = vst [vmem:[%s9353_s26 + $0x78] sm:$0xff] %v4777_v42 }
 0x5d3   : > { %v4768_v41 = vmax.f32 %v10114_v22, 0.0  ;;  %4802 = vst [vmem:[%s9353_s26 + $0x20] sm:$0xff] %v4766_v48  ;;  %v4738_v60 = vadd.f32 %v10070_v14, %v4690_v17  ;;  %4826 = vst [vmem:[%s9353_s26 + $0xe0] sm:$0xff] %v4790_v56  ;;  %v4694_v22 = vld [vmem:[%s9353_s26 + $0x80] sm:$0xff]  ;;  %v4795_v11 = vmax.f32 %v4759_v6, 0.0  ;;  %v4760_v5 = vadd.f32 %v10070_v14, %v4712_v30 }
 0x5d4   : > { %v4769_v61 = vmax.f32 %v4733_v23, 0.0  ;;  %4803 = vst [vmem:[%s9353_s26 + $0x28] sm:$0xff] %v4767_v18  ;;  %4829 = vst [vmem:[%s9353_s26 + $0xf8] sm:$0xff] %v4793_v29  ;;  %v4849_v8 = vpack.c.bf16 %v4793_v29, %v4791_v10  ;;  %v4743_v59 = vadd.f32 %v10074_v9, %v4695_v1  ;;  %v4745_v12 = vadd.f32 %v10074_v9, %v4697_v46 }
 0x5d5   : > { %4804 = vst [vmem:[%s9353_s26 + $0x30] sm:$0xff] %v4768_v41  ;;  %v4836_v23 = vpack.c.bf16 %v4768_v41, %v4766_v48  ;;  %v4774_v49 = vmax.f32 %v4738_v60, 0.0  ;;  %v4758_v48 = vadd.f32 %v10070_v14, %v4710_v21  ;;  %4831 = vst [vmem:[%s9353_s26 + $0x108] sm:$0xff] %v4795_v11  ;;  %v4796_v41 = vmax.f32 %v4760_v5, 0.0 }
 0x5d6   : > { %4805 = vst [vmem:[%s9353_s26 + $0x38] sm:$0xff] %v4769_v61  ;;  %v4837_v57 = vpack.c.bf16 %v4769_v61, %v4767_v18  ;;  %v4776_v18 = vmax.f32 %v4740_v51, 0.0  ;;  %v4761_v61 = vadd.f32 %v10074_v9, %v4713_v52  ;;  %v4742_v26 = vadd.f32 %v10070_v14, %v4694_v22  ;;  %5068 = vmatmul.mubr.bf16.gmra.mrb[4].mxu1 %v4846_v63 }
 0x5d7   : > { %4810 = vst [vmem:[%s9353_s26 + $0x60] sm:$0xff] %v4774_v49  ;;  %v4794_v38 = vmax.f32 %v4758_v48, 0.0  ;;  %v4744_v40 = vadd.f32 %v10070_v14, %v4696_v0  ;;  %v4779_v47 = vmax.f32 %v4743_v59, 0.0  ;;  %v4781_v58 = vmax.f32 %v4745_v12, 0.0  ;;  %4832 = vst [vmem:[%s9353_s26 + $0x110] sm:$0xff] %v4796_v41  ;;  %5075 = vmatprep.mubr.bf16.mxu1 %v4849_v8 }
 0x5d8   : > { %5027 = vmatprep.mubr.bf16.mxu0 %v4837_v57  ;;  %4812 = vst [vmem:[%s9353_s26 + $0x70] sm:$0xff] %v4776_v18  ;;  %v4797_v35 = vmax.f32 %v4761_v61, 0.0  ;;  %v4778_v13 = vmax.f32 %v4742_v26, 0.0  ;;  %v4838_v14 = vpack.c.bf16 %v4772_v62, %v4770_v34  ;;  %v4848_v9 = vpack.c.bf16 %v4792_v28, %v4790_v56 }
 0x5d9   : > { %4830 = vst [vmem:[%s9353_s26 + $0x100] sm:$0xff] %v4794_v38  ;;  %v4780_v44 = vmax.f32 %v4744_v40, 0.0  ;;  %5028 = vmatmul.mubr.bf16.gmra.mrb[4].mxu0 %v4836_v23  ;;  %4815 = vst [vmem:[%s9353_s26 + $0x88] sm:$0xff] %v4779_v47  ;;  %v4841_v2 = vpack.c.bf16 %v4777_v42, %v4775_v24  ;;  %v4840_v25 = vpack.c.bf16 %v4776_v18, %v4774_v49 }
 0x5da   : > { %4833 = vst [vmem:[%s9353_s26 + $0x118] sm:$0xff] %v4797_v35  ;;  %4817 = vst [vmem:[%s9353_s26 + $0x98] sm:$0xff] %v4781_v58  ;;  %5035 = vmatprep.mubr.bf16.mxu0 %v4839_v54  ;;  %v4851_v15 = vpack.c.bf16 %v4797_v35, %v4795_v11  ;;  %v4850_v50 = vpack.c.bf16 %v4796_v41, %v4794_v38  ;;  %v4843_v31 = vpack.c.bf16 %v4781_v58, %v4779_v47 }
 0x5db   : > { %4814 = vst [vmem:[%s9353_s26 + $0x80] sm:$0xff] %v4778_v13  ;;  %4816 = vst [vmem:[%s9353_s26 + $0x90] sm:$0xff] %v4780_v44  ;;  %v4842_v36 = vpack.c.bf16 %v4780_v44, %v4778_v13 }
 0x5de   : > { %5076 = vmatmul.mubr.bf16.gmra.mrb[8].mxu1 %v4848_v9 }
 0x5df   : > { %5083 = vmatprep.mubr.bf16.mxu1 %v4851_v15 }
 0x5e1   : > { %5036 = vmatmul.mubr.bf16.gmra.mrb[8].mxu0 %v4838_v14 }
 0x5e2   : > { %5043 = vmatprep.mubr.bf16.mxu0 %v4841_v2 }
 0x5e6   : > { %5084 = vmatmul.mubr.bf16.gmra.mrb[12].mxu1 %v4850_v50 }
 0x5e9   : > { %5044 = vmatmul.mubr.bf16.gmra.mrb[12].mxu0 %v4840_v25 }
 0x5ea   : > { %5051 = vmatprep.mubr.bf16.mxu0 %v4843_v31 }
 0x5f1   : > { %5052 = vmatmul.mubr.bf16.gmra.mrb[16].mxu0 %v4842_v36 }
 0x6a1   : > { %v5864_v57 = vpop.f32.mrb[0].mxu1 }
 0x6a2   : > { %v5865_v4 = vpop.f32.mrb[1].mxu1 }
 0x6a3   : > { %v5866_v39 = vadd.f32 %v5865_v4, %v5864_v57  ;;  %v5867_v45 = vpop.f32.mrb[2].mxu1 }
 0x6a4   : > { %v5834_v16 = vpop.f32.mrb[0].mxu0  ;;  %v5868_v62 = vpop.f32.mrb[3].mxu1 }
 0x6a5   : > { %v5835_v3 = vpop.f32.mrb[1].mxu0  ;;  %v5062_v37 = vadd.f32 %v5866_v39, %v10233_v33  ;;  %v5869_v10 = vadd.f32 %v5868_v62, %v5867_v45 }
 0x6a6   : > { %v5836_v7 = vadd.f32 %v5835_v3, %v5834_v16  ;;  %v5837_v20 = vpop.f32.mrb[2].mxu0 }
 0x6a7   : > { %v5838_v34 = vpop.f32.mrb[3].mxu0  ;;  %5102 = vst [vmem:[%s9349_s25 + $0x50] sm:$0xff] %v5062_v37  ;;  %v5065_v55 = vadd.f32 %v5869_v10, %v10233_v33 }
 0x6a8   : > { %v5022_v32 = vadd.f32 %v5836_v7, %v10233_v33  ;;  %v5839_v17 = vadd.f32 %v5838_v34, %v5837_v20 }
 0x6a9   : > { %5103 = vst [vmem:[%s9349_s25 + $0x58] sm:$0xff] %v5065_v55  ;;  %v5870_v29 = vpop.f32.mrb[4].mxu1 }
 0x6aa   : > { %5092 = vst [vmem:[%s9349_s25] sm:$0xff] %v5022_v32  ;;  %v5025_v43 = vadd.f32 %v5839_v17, %v10233_v33  ;;  %v5871_v19 = vpop.f32.mrb[5].mxu1 }
 0x6ab   : > { %v5872_v28 = vadd.f32 %v5871_v19, %v5870_v29  ;;  %v5873_v60 = vpop.f32.mrb[6].mxu1 }
 0x6ac   : > { %5093 = vst [vmem:[%s9349_s25 + $0x8] sm:$0xff] %v5025_v43  ;;  %v5840_v53 = vpop.f32.mrb[4].mxu0  ;;  %v5874_v21 = vpop.f32.mrb[7].mxu1 }
 0x6ad   : > { %v5841_v27 = vpop.f32.mrb[5].mxu0  ;;  %v5070_v24 = vadd.f32 %v5872_v28, %v10233_v33  ;;  %v5875_v42 = vadd.f32 %v5874_v21, %v5873_v60 }
 0x6ae   : > { %v5842_v52 = vadd.f32 %v5841_v27, %v5840_v53  ;;  %v5843_v56 = vpop.f32.mrb[6].mxu0 }
 0x6af   : > { %v5844_v51 = vpop.f32.mrb[7].mxu0  ;;  %5104 = vst [vmem:[%s9349_s25 + $0x60] sm:$0xff] %v5070_v24  ;;  %v5073_v1 = vadd.f32 %v5875_v42, %v10233_v33 }
 0x6b0   : > { %v5030_v30 = vadd.f32 %v5842_v52, %v10233_v33  ;;  %v5845_v23 = vadd.f32 %v5844_v51, %v5843_v56 }
 0x6b1   : > { %5105 = vst [vmem:[%s9349_s25 + $0x68] sm:$0xff] %v5073_v1  ;;  %v5876_v63 = vpop.f32.mrb[8].mxu1 }
 0x6b2   : > { %5094 = vst [vmem:[%s9349_s25 + $0x10] sm:$0xff] %v5030_v30  ;;  %v5033_v6 = vadd.f32 %v5845_v23, %v10233_v33  ;;  %v5877_v18 = vpop.f32.mrb[9].mxu1 }
 0x6b3   : > { %v5878_v0 = vadd.f32 %v5877_v18, %v5876_v63  ;;  %v5879_v54 = vpop.f32.mrb[10].mxu1 }
 0x6b4   : > { %5095 = vst [vmem:[%s9349_s25 + $0x18] sm:$0xff] %v5033_v6  ;;  %v5846_v46 = vpop.f32.mrb[8].mxu0  ;;  %v5880_v48 = vpop.f32.mrb[11].mxu1 }
 0x6b5   : > { %v5847_v49 = vpop.f32.mrb[9].mxu0  ;;  %v5078_v35 = vadd.f32 %v5878_v0, %v10233_v33  ;;  %v5881_v59 = vadd.f32 %v5880_v48, %v5879_v54 }
 0x6b6   : > { %v5848_v61 = vadd.f32 %v5847_v49, %v5846_v46  ;;  %v5849_v22 = vpop.f32.mrb[10].mxu0 }
 0x6b7   : > { %v5850_v11 = vpop.f32.mrb[11].mxu0  ;;  %5106 = vst [vmem:[%s9349_s25 + $0x70] sm:$0xff] %v5078_v35  ;;  %v5081_v38 = vadd.f32 %v5881_v59, %v10233_v33 }
 0x6b8   : > { %v5038_v5 = vadd.f32 %v5848_v61, %v10233_v33  ;;  %v5851_v8 = vadd.f32 %v5850_v11, %v5849_v22 }
 0x6b9   : > { %5107 = vst [vmem:[%s9349_s25 + $0x78] sm:$0xff] %v5081_v38  ;;  %v5882_v26 = vpop.f32.mrb[12].mxu1 }
 0x6ba   : > { %5096 = vst [vmem:[%s9349_s25 + $0x20] sm:$0xff] %v5038_v5  ;;  %v5041_v12 = vadd.f32 %v5851_v8, %v10233_v33  ;;  %v5883_v47 = vpop.f32.mrb[13].mxu1 }
 0x6bb   : > { %v5884_v44 = vadd.f32 %v5883_v47, %v5882_v26  ;;  %v5885_v14 = vpop.f32.mrb[14].mxu1 }
 0x6bc   : > { %5097 = vst [vmem:[%s9349_s25 + $0x28] sm:$0xff] %v5041_v12  ;;  %v5852_v41 = vpop.f32.mrb[12].mxu0  ;;  %v5886_v2 = vpop.f32.mrb[15].mxu1 }
 0x6bd   : > { %v5853_v40 = vpop.f32.mrb[13].mxu0  ;;  %v5086_v50 = vadd.f32 %v5884_v44, %v10233_v33  ;;  %v5887_v31 = vadd.f32 %v5886_v2, %v5885_v14 }
 0x6be   : > { %v5854_v58 = vadd.f32 %v5853_v40, %v5852_v41  ;;  %v5855_v13 = vpop.f32.mrb[14].mxu0 }
 0x6bf   : > { %v5856_v9 = vpop.f32.mrb[15].mxu0  ;;  %5108 = vst [vmem:[%s9349_s25 + $0x80] sm:$0xff] %v5086_v50  ;;  %v5089_v16 = vadd.f32 %v5887_v31, %v10233_v33 }
 0x6c0   : > { %v5046_v15 = vadd.f32 %v5854_v58, %v10233_v33  ;;  %v5857_v25 = vadd.f32 %v5856_v9, %v5855_v13 }
 0x6c1   : > { %5109 = vst [vmem:[%s9349_s25 + $0x88] sm:$0xff] %v5089_v16 }
 0x6c2   : > { %5098 = vst [vmem:[%s9349_s25 + $0x30] sm:$0xff] %v5046_v15  ;;  %v5049_v36 = vadd.f32 %v5857_v25, %v10233_v33 }
 0x6c4   : > { %5099 = vst [vmem:[%s9349_s25 + $0x38] sm:$0xff] %v5049_v36  ;;  %v5858_v57 = vpop.f32.mrb[16].mxu0 }
 0x6c5   : > { %v5859_v3 = vpop.f32.mrb[17].mxu0 }
 0x6c6   : > { %v5860_v4 = vadd.f32 %v5859_v3, %v5858_v57  ;;  %v5861_v7 = vpop.f32.mrb[18].mxu0 }
 0x6c7   : > { %v5862_v20 = vpop.f32.mrb[19].mxu0 }
 0x6c8   : > { %v5054_v39 = vadd.f32 %v5860_v4, %v10233_v33  ;;  %v5863_v45 = vadd.f32 %v5862_v20, %v5861_v7 }
 0x6ca   : > { %5100 = vst [vmem:[%s9349_s25 + $0x40] sm:$0xff] %v5054_v39  ;;  %v5057_v34 = vadd.f32 %v5863_v45, %v10233_v33 }
 0x6cc   : > { %5101 = vst [vmem:[%s9349_s25 + $0x48] sm:$0xff] %v5057_v34 }
 0x6cd PF: > { %s11132_s29 = sld [smem:[#allocation31_spill]]  ;;  %s5151_s24 = sshll.u32 %s9353_s26, 4  ;;  %s10278_s24 = int_to_ptr.vmem [resolvable:$true] %s5151_s24 }
 0x6ce   : > { %s11133_s15 = sld [smem:[#allocation146_spill]]  ;;  %s10705_s30 = scalar_lea.sflag [#allocation16], %s7742_s9 }
 0x6cf   : > { %s7017_s18 = scalar_lea.vmem %s10278_s24, 4608  ;;  %p11135_p0 = scmp.ne.s32.totalorder %s10755_s8, 0 }
 0x6d0   : > { %p7018_p9 = scmp.ne.s32.totalorder %s10278_s24, %s7017_s18  ;;  %s7263_s23 = smov [#allocation15]  }
 0x6d1   : > { %s7021_s1 = sshll.u32 %s7263_s23, 4  ;;  %s7022_s1 = int_to_ptr.vmem [resolvable:$false] %s7021_s1 }
 0x6d2   : > { %p7019_p11 = pnand %p7018_p9, %p11135_p0  ;;  %s7023_s27 = scalar_lea.vmem %s7022_s1, 9216 }
 0x6d3   : > { %s5817_s14 = smul.u32 4608, %s11132_s29  ;;  %p7024_p6 = scmp.lt.s32.totalorder %s10278_s24, %s7022_s1 }
 0x6d4   : > { %s11134_s2 = smov %s11133_s15  ;;  %p7020_p10 = pneg %p7019_p11 }
 0x6d5   : > { %s10276_s10 = scalar_lea.hbm %s11133_s15, %s5817_s14  ;;  %p7025_p5 = scmp.lt.s32.totalorder %s7023_s27, %s7017_s18 }
 0x6d7   : > { %p7026_p2 = por %p7025_p5, %p7024_p6 }
 0x6d9   : > { %p7027_p12 = pnand %p7026_p2, %p7020_p10 }
 0x6db   : > { %7030 = shalt.err (!%p7027_p12)
}
 0x6dc   : > { %s7031_s26 = scalar_lea.hbm %s10276_s10, 4608  ;;  %s7035_s14 = scalar_lea.hbm %s11134_s2, 9216 }
 0x6dd   : > { %p7032_p13 = scmp.ne.s32.totalorder %s10276_s10, %s7031_s26  ;;  %p7036_p4 = scmp.lt.u32.totalorder %s10276_s10, %s11134_s2 }
 0x6de   : > { %p7037_p7 = scmp.lt.u32.totalorder %s7035_s14, %s7031_s26  ;;  %p7039_p9 = scmp.lt.u32.totalorder %s7031_s26, %s10276_s10 }
 0x6df   : > { %p7033_p1 = pnand %p7032_p13, %p11135_p0 }
 0x6e0   : > { %p7038_p8 = por %p7037_p7, %p7036_p4 }
 0x6e1   : > { %p7034_p3 = pneg %p7033_p1 }
 0x6e2   : > { %p7040_p11 = por %p7039_p9, %p7038_p8 }
 0x6e4   : > { %p7041_p10 = pnand %p7040_p11, %p7034_p3 }
 0x6e6   : > { %7044 = shalt.err (!%p7041_p10)
}
 0x6e7   : > { %s7264_s15 = smov 256   ;;  %s7265_s18 = smov 16  }
 0x6e8   : > { %6361 = dma.vmem_to_hbm [thread:$0]  (%p11135_p0), %s10278_s24, 4608, %s10276_s10, %s10705_s30, %s7264_s15, %s7264_s15, %s7265_s18  }
 0x6e9   : > { %s5813_s23 = smul.u32 2304, %s11132_s29  ;;  %s5134_s1 = sshll.u32 %s9349_s25, 4  ;;  %s10306_s1 = int_to_ptr.vmem [resolvable:$true] %s5134_s1 }
 0x6ea   : > { %s11136_s4 = sld [smem:[#allocation145_spill]]  ;;  %s5111_s14 = scalar_lea.sflag [#allocation4], %s7731_s3 }
 0x6eb   : > { %s7045_s6 = scalar_lea.vmem %s10306_s1, 2304  ;;  %s7266_s5 = smov [#allocation14]  }
 0x6ec   : > { %p7046_p6 = scmp.ne.s32.totalorder %s10306_s1, %s7045_s6  ;;  %s7049_s24 = sshll.u32 %s7266_s5, 4  ;;  %s7050_s24 = int_to_ptr.vmem [resolvable:$false] %s7049_s24 }
 0x6ed   : > { %s7051_s25 = scalar_lea.vmem %s7050_s24, 4608  ;;  %p7052_p12 = scmp.lt.s32.totalorder %s10306_s1, %s7050_s24 }
 0x6ee   : > { %p7047_p5 = pnand %p7046_p6, %p11135_p0  ;;  %p7053_p13 = scmp.lt.s32.totalorder %s7051_s25, %s7045_s6 }
 0x6f0   : > { %s10311_s12 = scalar_lea.hbm %s11136_s4, %s5813_s23  ;;  %p7048_p2 = pneg %p7047_p5 }
 0x6f1   : > { %p7054_p1 = por %p7053_p13, %p7052_p12 }
 0x6f3   : > { %p7055_p3 = pnand %p7054_p1, %p7048_p2 }
 0x6f5   : > { %7058 = shalt.err (!%p7055_p3)
}
 0x6f6   : > { %s7059_s10 = scalar_lea.hbm %s10311_s12, 2304  ;;  %s7063_s23 = scalar_lea.hbm %s11136_s4, 4608 }
 0x6f7   : > { %p7060_p4 = scmp.ne.s32.totalorder %s10311_s12, %s7059_s10  ;;  %p7064_p9 = scmp.lt.u32.totalorder %s10311_s12, %s11136_s4 }
 0x6f8   : > { %p7065_p11 = scmp.lt.u32.totalorder %s7063_s23, %s7059_s10  ;;  %p7067_p6 = scmp.lt.u32.totalorder %s7059_s10, %s10311_s12 }
 0x6f9   : > { %p7061_p7 = pnand %p7060_p4, %p11135_p0 }
 0x6fa   : > { %p7066_p10 = por %p7065_p11, %p7064_p9 }
 0x6fb   : > { %p7062_p8 = pneg %p7061_p7 }
 0x6fc   : > { %p7068_p5 = por %p7067_p6, %p7066_p10 }
 0x6fe   : > { %p7069_p2 = pnand %p7068_p5, %p7062_p8 }
 0x700   : > { %7072 = shalt.err (!%p7069_p2)
}
 0x701   : > { %s7267_s6 = smov 128   ;;  %s11137_s5 = sld [smem:[#allocation30_spill]] }
 0x702   : > { %s11138_s24 = sld [smem:[#allocation35_spill]]  ;;  %s7268_s25 = smov 8  }
 0x703   : > { %6360 = dma.vmem_to_hbm [thread:$0]  (%p11135_p0), %s10306_s1, 2304, %s10311_s12, %s5111_s14, %s7267_s6, %s7267_s6, %s7268_s25  }
 0x704   : > { %s5816_s18 = smul.u32 288, %s11132_s29  ;;  %s5170_s23 = sshll.u32 %s8215_s0, 4  ;;  %s10340_s23 = int_to_ptr.vmem [resolvable:$true] %s5170_s23 }
 0x705   : > { %s11139_s2 = sld [smem:[#allocation147_spill]]  ;;  %s7073_s7 = scalar_lea.vmem %s10340_s23, 18432 }
 0x706   : > { %p7074_p12 = scmp.ne.s32.totalorder %s10340_s23, %s7073_s7  ;;  %s7269_s8 = smov [#allocation17]  }
 0x707   : > { %s5804_s15 = sshll.u32 %s11137_s5, 3  ;;  %s7077_s3 = sshll.u32 %s7269_s8, 4  ;;  %s7078_s3 = int_to_ptr.vmem [resolvable:$false] %s7077_s3 }
 0x708   : > { %s5167_s10 = sadd.s32 %s5816_s18, %s5804_s15  ;;  %p11140_p13 = scmp.ne.s32.totalorder %s11138_s24, 0 }
 0x709   : > { %s5806_s27 = sshll.u32 %s5167_s10, 7  ;;  %s7079_s0 = scalar_lea.vmem %s7078_s3, 36864 }
 0x70a   : > { %p7075_p1 = pnand %p7074_p12, %p11140_p13  ;;  %p7080_p3 = scmp.lt.s32.totalorder %s10340_s23, %s7078_s3 }
 0x70b   : > { %s10345_s4 = scalar_lea.hbm %s11139_s2, %s5806_s27  ;;  %p7081_p4 = scmp.lt.s32.totalorder %s7079_s0, %s7073_s7 }
 0x70c   : > { %p7076_p0 = pneg %p7075_p1 }
 0x70d   : > { %p7082_p7 = por %p7081_p4, %p7080_p3 }
 0x70f   : > { %p7083_p8 = pnand %p7082_p7, %p7076_p0 }
 0x711   : > { %7086 = shalt.err (!%p7083_p8)
}
 0x712   : > { %s7087_s29 = scalar_lea.hbm %s10345_s4, 18432  ;;  %s7091_s12 = scalar_lea.hbm %s11139_s2, 73728 }
 0x713   : > { %p7088_p9 = scmp.ne.s32.totalorder %s10345_s4, %s7087_s29  ;;  %p7092_p6 = scmp.lt.u32.totalorder %s10345_s4, %s11139_s2 }
 0x714   : > { %p7093_p5 = scmp.lt.u32.totalorder %s7091_s12, %s7087_s29  ;;  %p7095_p12 = scmp.lt.u32.totalorder %s7087_s29, %s10345_s4 }
 0x715   : > { %p7089_p11 = pnand %p7088_p9, %p11140_p13 }
 0x716   : > { %p7094_p2 = por %p7093_p5, %p7092_p6 }
 0x717   : > { %p7090_p10 = pneg %p7089_p11 }
 0x718   : > { %p7096_p1 = por %p7095_p12, %p7094_p2 }
 0x71a   : > { %p7097_p0 = pnand %p7096_p1, %p7090_p10 }
 0x71c   : > { %7100 = shalt.err (!%p7097_p0)
}
 0x71d   : > { %s7270_s7 = smov 1024   ;;  %s7271_s5 = smov 2048  }
 0x71e   : > { %s7272_s25 = smov 64   ;;  %s11141_s15 = scalar_lea.sflag [#allocation16], %s7742_s9 }
 0x71f   : > { %6362 = dma.vmem_to_hbm [thread:$0]  (%p11140_p13), %s10340_s23, 18432, %s10345_s4, %s11141_s15, %s7270_s7, %s7271_s5, %s7272_s25  }
 0x720 PF: > { %s11142_s18 = sld [smem:[#allocation29_spill]]  ;;  %s11143_s10 = sld [smem:[#allocation34_spill]] }
 0x721   : > { %p6407_p3 = scmp.ge.s32.totalorder %s7243_s22, 2 }
 0x726   : > { %s5185_s27 = sand.u32 1, %s11142_s18   ;;  %p11144_p4 = scmp.ne.s32.totalorder %s11143_s10, 0 }
 0x727   : > { %s5186_s26 = scalar_lea.sflag [#allocation4], %s5185_s27 }
 0x728   : > { %p6390_p7 = pnand %p6407_p3, %p11144_p4 }
 0x72a   : > { %7178 = dma.done.wait (!%p6390_p7), %s5186_s26, 2304  }
 0x72b   : > { %7180 = vsyncadd (!%p6390_p7), %s5186_s26, 4294964992  ;;  %s11145_s8 = sadd.s32 4294967294, %s7243_s22  }
 0x72c   : > { %s5194_s3 = sand.u32 1, %s11145_s8  }
 0x72d   : > { %s5195_s0 = scalar_lea.sflag [#allocation16], %s5194_s3 }
 0x72e   : > { %7182 = dma.done.wait (!%p6390_p7), %s5195_s0, 4608  }
 0x72f   : > { %7184 = vsyncadd (!%p6390_p7), %s5195_s0, 4294962688  ;;  %s11146_s24 = sld [smem:[#allocation36_spill]] }
 0x735   : > { %p11147_p8 = scmp.ne.s32.totalorder %s11146_s24, 0 }
 0x737   : > { %p6396_p13 = pnand %p6407_p3, %p11147_p8 }
 0x739   : > { %7186 = dma.done.wait (!%p6396_p13), %s5195_s0, 18432  }
 0x73a   : > { %7188 = vsyncadd (!%p6396_p13), %s5195_s0, 4294948864  ;;  %s36_s22 = sadd.s32 1, %s7243_s22   ;;  %s11149_s30 = sld [smem:[#allocation26_spill]] }
 0x73b   : > { %p10379_p9 = scmp.ge.s32.totalorder %s36_s22, 6   ;;  %s11150_s12 = sld [smem:[#allocation27_spill]] }
 0x73c   : > { %s11151_s4 = sld [smem:[#allocation28_spill]]  ;;  %s11152_s14 = sld [smem:[#allocation39_spill]] }
 0x73d   : > { %s11153_s23 = sld [smem:[#allocation38_spill]]  ;;  %s11154_s29 = sld [smem:[#allocation40_spill]] }
 0x73e   : > { %s11155_s10 = smov %s7199_s11  ;;  %s11156_s11 = smov %s7620_s13 }
 0x73f   : > { %s11158_s15 = smov %s7219_s16  ;;  %s11159_s16 = smov %s7223_s17 }
 0x740   : > { %s11160_s17 = smov %s7615_s19  ;;  %s11161_s18 = smov %s7235_s20 }
 0x741   : > { %s11162_s19 = smov %s7239_s21  ;;  %35 = sbr.rel (!%p10379_p9) target bundleno = 28 (0x1c), region = 182 }
 0x742   : > { %s11157_s13 = smov %s11151_s4 }
 0x743   : > { %s11163_s20 = smov %s11153_s23  ;;  %s11164_s21 = smov %s11154_s29 }
 0x748   :  { %5209 = vsyncpa [#allocation3], 1 }
 0x749   :  { %5211 = vsyncpa [#allocation3 + $0x1], 1 }
 0x74a   :  { %5212 = vsyncpa [#allocation6], 1 }
 0x74b   :  { %5214 = vsyncpa [#allocation6 + $0x1], 1 }
 0x74c   :  { %5215 = vsyncpa [#allocation9], 1 }
 0x74d   :  { %5217 = vsyncpa [#allocation9 + $0x1], 1 }
 0x74e   :  { %5218 = vsyncpa [#allocation12], 1 }
 0x74f   :  { %5219 = vsyncpa [#allocation4], 1 }
 0x750   :  { %5221 = vsyncpa [#allocation4 + $0x1], 1 }
 0x751   :  { %5222 = vsyncpa [#allocation16], 1 }
 0x752   :  { %5224 = vsyncpa [#allocation16 + $0x1], 1 }

</bundles_post_ra>
